<compile_context>
chip_gen: v7x
topology: tpu7x:2x2x1
jax: 0.10.0
libtpu: 0.0.40
codegen_flags: <defaults>
</compile_context>

<pallas_src>
import functools

import jax
import jax.numpy as jnp
from jax.experimental import pallas as pl
from jax.experimental.pallas import tpu as pltpu

NUM_RELATIONS = 17
BN_EPS = 1e-5


def _round_up(x, m):
    return ((x + m - 1) // m) * m


def pack_relation_weights(w):
    """[R, cin, cout] -> [cin, R*block] with W[r] in its own 128-lane block."""
    r, cin, cout = w.shape
    block = _round_up(cout, 128)
    wp = jnp.pad(w, ((0, 0), (0, 0), (0, block - cout)))        # [R, cin, block]
    return jnp.transpose(wp, (1, 0, 2)).reshape(cin, r * block)  # [cin, R*block]


# ---------------------------------------------------------------------------
# Fused CTDEncoder forward kernel
# ---------------------------------------------------------------------------
def make_ctd_kernel(num_genes, num_dis, num_comp, num_path, hid, out_ch):
    n = num_genes + num_dis + num_comp + num_path
    r_rel = NUM_RELATIONS
    b1 = num_genes
    b2 = num_genes + num_dis
    b3 = num_genes + num_dis + num_comp

    def kernel(x_ref, adj_ref, et_ref,
               lin1_w_ref, lin1_b_ref,
               c1_root_ref, c1_b_ref, c1_w_ref,
               c2_root_ref, c2_b_ref, c2_w_ref,
               c3_root_ref, c3_b_ref, c3_w_ref,
               bn1_g_ref, bn1_b_ref,
               bn2_g_ref, bn2_b_ref,
               bn3_g_ref, bn3_b_ref,
               out_ref):
        f32 = jnp.float32

        # --- gcn_norm(adj, add_self_loops=False): D^-1/2 A D^-1/2 ----------
        # Row-sum degree is used on BOTH sides (PyG SparseTensor gcn_norm
        # semantics, valid for asymmetric adj too); the (N,1)->(1,N)
        # relayout is only N elements.
        adj = adj_ref[...]
        deg = jnp.sum(adj, axis=1, keepdims=True)                  # (N, 1)
        dinv = jnp.where(deg > 0.0, jax.lax.rsqrt(deg), 0.0)
        adj_n = (dinv * adj) * dinv.reshape(1, n)
        et = et_ref[...]

        # --- one-hot segment matrices built from iota (static boundaries) --
        def seg_of(idx):
            return ((idx >= b1).astype(jnp.int32)
                    + (idx >= b2).astype(jnp.int32)
                    + (idx >= b3).astype(jnp.int32))

        node_l = jax.lax.broadcasted_iota(jnp.int32, (4, n), 1)
        seg_row = jax.lax.broadcasted_iota(jnp.int32, (4, n), 0)
        s_seg = (seg_of(node_l) == seg_row).astype(f32)            # (4, N)
        node_s = jax.lax.broadcasted_iota(jnp.int32, (n, 4), 0)
        seg_col = jax.lax.broadcasted_iota(jnp.int32, (n, 4), 1)
        st_seg = (seg_of(node_s) == seg_col).astype(f32)           # (N, 4)
        cnt = jnp.sum(s_seg, axis=1, keepdims=True)                # (4, 1)
        inv_cnt = 1.0 / jnp.maximum(cnt, 1.0)

        # --- WRGCNConv: out = x@root + b + sum_r A_r @ (x @ W_r) -----------
        def wrgcn(xin, root_ref, bias_ref, wall_ref, cout, relu):
            blk = _round_up(cout, 128)
            acc = (jnp.dot(xin, root_ref[...], preferred_element_type=f32)
                   + bias_ref[...])
            # One matmul produces all 17 relation projections side by side.
            y = jnp.dot(xin, wall_ref[...], preferred_element_type=f32)
            for r in range(r_rel):            # unrolled in-kernel loop
                a_r = jnp.where(et == r, adj_n, 0.0)
                acc = acc + jnp.dot(a_r, y[:, r * blk:r * blk + cout],
                                    preferred_element_type=f32)
            return jnp.maximum(acc, 0.0) if relu else acc

        # --- per-segment training-mode BatchNorm via one-hot matmuls -------
        def seg_bn(z, g_ref, b_ref):
            mean = jnp.dot(s_seg, z, preferred_element_type=f32) * inv_cnt
            centered = z - jnp.dot(st_seg, mean, preferred_element_type=f32)
            var = (jnp.dot(s_seg, centered * centered,
                           preferred_element_type=f32) * inv_cnt)
            scale = jnp.dot(st_seg, jax.lax.rsqrt(var + BN_EPS) * g_ref[...],
                            preferred_element_type=f32)
            shift = jnp.dot(st_seg, b_ref[...], preferred_element_type=f32)
            return centered * scale + shift

        # --- lin1 + ReLU ----------------------------------------------------
        h0 = jnp.maximum(
            jnp.dot(x_ref[...], lin1_w_ref[...], preferred_element_type=f32)
            + lin1_b_ref[...], 0.0)

        x1 = seg_bn(wrgcn(h0, c1_root_ref, c1_b_ref, c1_w_ref, hid, True),
                    bn1_g_ref, bn1_b_ref)
        x2 = seg_bn(wrgcn(x1, c2_root_ref, c2_b_ref, c2_w_ref, hid, True),
                    bn2_g_ref, bn2_b_ref)
        x3 = seg_bn(wrgcn(x2, c3_root_ref, c3_b_ref, c3_w_ref, out_ch, False),
                    bn3_g_ref, bn3_b_ref)
        out_ref[...] = x3

    return kernel


@functools.partial(jax.jit, static_argnums=(4, 5, 6))
def ctd_encoder_forward(x, adj, edge_type, params,
                        num_dis_nodes, num_comp_nodes, num_pathways):
    n = x.shape[0]
    num_genes = n - num_dis_nodes - num_comp_nodes - num_pathways
    hid = params["conv1_w"].shape[2]
    out_ch = params["conv3_w"].shape[2]

    kernel = make_ctd_kernel(num_genes, num_dis_nodes, num_comp_nodes,
                             num_pathways, hid, out_ch)

    args = (
        x, adj, edge_type.astype(jnp.int32),
        params["lin1_w"], params["lin1_b"],
        params["conv1_root"], params["conv1_b"],
        pack_relation_weights(params["conv1_w"]),
        params["conv2_root"], params["conv2_b"],
        pack_relation_weights(params["conv2_w"]),
        params["conv3_root"], params["conv3_b"],
        pack_relation_weights(params["conv3_w"]),
        params["bn1_gamma"], params["bn1_beta"],
        params["bn2_gamma"], params["bn2_beta"],
        params["bn3_gamma"], params["bn3_beta"],
    )

    # Rough resident-VMEM estimate; explicit limit kept under v7x's 64 MiB.
    est = sum(int(a.size) * a.dtype.itemsize for a in args)
    est += 2 * n * n * 4                               # adj_n + masked A_r temp
    est += n * NUM_RELATIONS * 128 * 4                 # packed projections
    est += 6 * n * max(hid, out_ch) * 4                # activations
    vmem_limit = int(min(48 * 1024 * 1024, max(32 * 1024 * 1024, 2 * est)))

    return pl.pallas_call(
        kernel,
        out_shape=jax.ShapeDtypeStruct((n, out_ch), jnp.float32),
        compiler_params=pltpu.CompilerParams(vmem_limit_bytes=vmem_limit),
    )(*args)


# ---------------------------------------------------------------------------
# Parameter initialization (deterministic, glorot-like; BN affine = PyTorch
# defaults weight=1, bias=0, stacked as [4 segments, C]).
# ---------------------------------------------------------------------------
def glorot(key, shape):
    fan_in, fan_out = shape[-2], shape[-1]
    scale = jnp.sqrt(6.0 / (fan_in + fan_out))
    return jax.random.uniform(key, shape, jnp.float32, -scale, scale)


def init_params(key, in_channels, out_channels):
    hid = in_channels // 2
    ks = jax.random.split(key, 7)
    return {
        "lin1_w": glorot(ks[0], (in_channels, out_channels)),
        "lin1_b": jnp.zeros((1, out_channels), jnp.float32),
        # conv1: out_channels -> hid
        "conv1_w": glorot(ks[1], (NUM_RELATIONS, out_channels, hid)),
        "conv1_root": glorot(ks[2], (out_channels, hid)),
        "conv1_b": jnp.zeros((1, hid), jnp.float32),
        # conv2: hid -> hid
        "conv2_w": glorot(ks[3], (NUM_RELATIONS, hid, hid)),
        "conv2_root": glorot(ks[4], (hid, hid)),
        "conv2_b": jnp.zeros((1, hid), jnp.float32),
        # conv3: hid -> out_channels
        "conv3_w": glorot(ks[5], (NUM_RELATIONS, hid, out_channels)),
        "conv3_root": glorot(ks[6], (hid, out_channels)),
        "conv3_b": jnp.zeros((1, out_channels), jnp.float32),
        # BatchNorm affine params per segment (gene, disease, compound, pathway)
        "bn1_gamma": jnp.ones((4, hid), jnp.float32),
        "bn1_beta": jnp.zeros((4, hid), jnp.float32),
        "bn2_gamma": jnp.ones((4, hid), jnp.float32),
        "bn2_beta": jnp.zeros((4, hid), jnp.float32),
        "bn3_gamma": jnp.ones((4, out_channels), jnp.float32),
        "bn3_beta": jnp.zeros((4, out_channels), jnp.float32),
    }


# ---------------------------------------------------------------------------
# Pure-JAX reference (original module semantics) for a correctness check.
# ---------------------------------------------------------------------------
def reference_forward(x, adj, edge_type, params, num_dis, num_comp, num_path):
    n = x.shape[0]
    num_genes = n - num_dis - num_comp - num_path
    deg = jnp.sum(adj, axis=1, keepdims=True)
    dinv = jnp.where(deg > 0.0, jax.lax.rsqrt(deg), 0.0)
    adj_n = dinv * adj * dinv.reshape(1, n)

    def wrgcn(xin, root, bias, w):
        out = xin @ root + bias
        for r in range(NUM_RELATIONS):
            a_r = jnp.where(edge_type == r, adj_n, 0.0)
            out = out + (a_r @ xin) @ w[r]
        return out

    def bn_seg(z, gamma, beta):
        bounds = [0, num_genes, num_genes + num_dis,
                  num_genes + num_dis + num_comp, n]
        segs = []
        for k in range(4):
            zs = z[bounds[k]:bounds[k + 1]]
            mean = jnp.mean(zs, axis=0, keepdims=True)
            var = jnp.mean((zs - mean) ** 2, axis=0, keepdims=True)
            segs.append((zs - mean) * jax.lax.rsqrt(var + BN_EPS)
                        * gamma[k] + beta[k])
        return jnp.concatenate(segs, axis=0)

    h0 = jnp.maximum(x @ params["lin1_w"] + params["lin1_b"], 0.0)
    x1 = bn_seg(jnp.maximum(wrgcn(h0, params["conv1_root"], params["conv1_b"],
                                  params["conv1_w"]), 0.0),
                params["bn1_gamma"], params["bn1_beta"])
    x2 = bn_seg(jnp.maximum(wrgcn(x1, params["conv2_root"], params["conv2_b"],
                                  params["conv2_w"]), 0.0),
                params["bn2_gamma"], params["bn2_beta"])
    x3 = bn_seg(wrgcn(x2, params["conv3_root"], params["conv3_b"],
                      params["conv3_w"]),
                params["bn3_gamma"], params["bn3_beta"])
    return x3


if __name__ == "__main__":
    in_channels = 16     # -> hidden = in_channels // 2 = 8
    out_channels = 8
    num_dis, num_comp, num_path = 8, 8, 8
    N = 40               # num_genes = 40 - 24 = 16

    key = jax.random.PRNGKey(0)
    kx, kadj, ket, kp = jax.random.split(key, 4)

    x = jax.random.normal(kx, (N, in_channels), jnp.float32)
    adj = (jax.random.uniform(kadj, (N, N)) < 0.3).astype(jnp.float32)
    edge_type = jax.random.randint(ket, (N, N), 0, NUM_RELATIONS).astype(jnp.int32)

    params = init_params(kp, in_channels, out_channels)

    out = ctd_encoder_forward(x, adj, edge_type, params,
                              num_dis, num_comp, num_path)
    out = jax.block_until_ready(out)
    assert out.shape == (N, out_channels)

    ref = reference_forward(x, adj, edge_type, params,
                            num_dis, num_comp, num_path)
    max_err = float(jnp.max(jnp.abs(out - ref)))
    assert jnp.allclose(out, ref, rtol=2e-2, atol=2e-2), max_err

    print("KERNEL_OK")
</pallas_src>

<mosaic_0001>
module attributes {stable_mosaic.version = 11 : i64} {
  func.func @kernel(%arg0: memref<40x16xf32, #tpu.memory_space<vmem>>, %arg1: memref<40x40xf32, #tpu.memory_space<vmem>>, %arg2: memref<40x40xi32, #tpu.memory_space<vmem>>, %arg3: memref<16x8xf32, #tpu.memory_space<vmem>>, %arg4: memref<1x8xf32, #tpu.memory_space<vmem>>, %arg5: memref<8x8xf32, #tpu.memory_space<vmem>>, %arg6: memref<1x8xf32, #tpu.memory_space<vmem>>, %arg7: memref<8x2176xf32, #tpu.memory_space<vmem>>, %arg8: memref<8x8xf32, #tpu.memory_space<vmem>>, %arg9: memref<1x8xf32, #tpu.memory_space<vmem>>, %arg10: memref<8x2176xf32, #tpu.memory_space<vmem>>, %arg11: memref<8x8xf32, #tpu.memory_space<vmem>>, %arg12: memref<1x8xf32, #tpu.memory_space<vmem>>, %arg13: memref<8x2176xf32, #tpu.memory_space<vmem>>, %arg14: memref<4x8xf32, #tpu.memory_space<vmem>>, %arg15: memref<4x8xf32, #tpu.memory_space<vmem>>, %arg16: memref<4x8xf32, #tpu.memory_space<vmem>>, %arg17: memref<4x8xf32, #tpu.memory_space<vmem>>, %arg18: memref<4x8xf32, #tpu.memory_space<vmem>>, %arg19: memref<4x8xf32, #tpu.memory_space<vmem>>, %arg20: memref<40x8xf32, #tpu.memory_space<vmem>>) attributes {dimension_semantics = [], scalar_prefetch = 0 : i64, scratch_operands = 0 : i64, tpu.core_type = #tpu.core_type<tc>} {
    %c0 = arith.constant 0 : index
    %c0_0 = arith.constant 0 : index
    %0 = vector.load %arg1[%c0, %c0_0] : memref<40x40xf32, #tpu.memory_space<vmem>>, vector<40x40xf32>
    %cst = arith.constant dense<0.000000e+00> : vector<40xf32>
    %1 = vector.multi_reduction <add>, %0, %cst [1] : vector<40x40xf32> to vector<40xf32>
    %2 = vector.shape_cast %1 : vector<40xf32> to vector<40x1xf32>
    %cst_1 = arith.constant 0.000000e+00 : f32
    %3 = vector.broadcast %cst_1 : f32 to vector<40x1xf32>
    %4 = arith.cmpf ogt, %2, %3 : vector<40x1xf32>
    %5 = math.rsqrt %2 : vector<40x1xf32>
    %cst_2 = arith.constant 0.000000e+00 : f32
    %6 = vector.broadcast %cst_2 : f32 to vector<40x1xf32>
    %7 = arith.select %4, %5, %6 : vector<40x1xi1>, vector<40x1xf32>
    %8 = vector.broadcast %7 : vector<40x1xf32> to vector<40x40xf32>
    %9 = arith.mulf %8, %0 : vector<40x40xf32>
    %10 = vector.shape_cast %7 : vector<40x1xf32> to vector<1x40xf32>
    %11 = vector.broadcast %10 : vector<1x40xf32> to vector<40x40xf32>
    %12 = arith.mulf %9, %11 : vector<40x40xf32>
    %c0_3 = arith.constant 0 : index
    %c0_4 = arith.constant 0 : index
    %13 = vector.load %arg2[%c0_3, %c0_4] : memref<40x40xi32, #tpu.memory_space<vmem>>, vector<40x40xi32>
    %14 = tpu.iota {dimensions = array<i32: 1>} : vector<4x40xi32>
    %15 = tpu.iota {dimensions = array<i32: 0>} : vector<4x40xi32>
    %c16_i32 = arith.constant 16 : i32
    %16 = vector.broadcast %c16_i32 : i32 to vector<4x40xi32>
    %17 = arith.cmpi sge, %14, %16 : vector<4x40xi32>
    %18 = arith.extui %17 : vector<4x40xi1> to vector<4x40xi32>
    %c24_i32 = arith.constant 24 : i32
    %19 = vector.broadcast %c24_i32 : i32 to vector<4x40xi32>
    %20 = arith.cmpi sge, %14, %19 : vector<4x40xi32>
    %21 = arith.extui %20 : vector<4x40xi1> to vector<4x40xi32>
    %22 = arith.addi %18, %21 : vector<4x40xi32>
    %c32_i32 = arith.constant 32 : i32
    %23 = vector.broadcast %c32_i32 : i32 to vector<4x40xi32>
    %24 = arith.cmpi sge, %14, %23 : vector<4x40xi32>
    %25 = arith.extui %24 : vector<4x40xi1> to vector<4x40xi32>
    %26 = arith.addi %22, %25 : vector<4x40xi32>
    %27 = arith.cmpi eq, %26, %15 : vector<4x40xi32>
    %28 = arith.extui %27 : vector<4x40xi1> to vector<4x40xi32>
    %29 = arith.sitofp %28 : vector<4x40xi32> to vector<4x40xf32>
    %30 = tpu.iota {dimensions = array<i32: 0>} : vector<40x4xi32>
    %31 = tpu.iota {dimensions = array<i32: 1>} : vector<40x4xi32>
    %c16_i32_5 = arith.constant 16 : i32
    %32 = vector.broadcast %c16_i32_5 : i32 to vector<40x4xi32>
    %33 = arith.cmpi sge, %30, %32 : vector<40x4xi32>
    %34 = arith.extui %33 : vector<40x4xi1> to vector<40x4xi32>
    %c24_i32_6 = arith.constant 24 : i32
    %35 = vector.broadcast %c24_i32_6 : i32 to vector<40x4xi32>
    %36 = arith.cmpi sge, %30, %35 : vector<40x4xi32>
    %37 = arith.extui %36 : vector<40x4xi1> to vector<40x4xi32>
    %38 = arith.addi %34, %37 : vector<40x4xi32>
    %c32_i32_7 = arith.constant 32 : i32
    %39 = vector.broadcast %c32_i32_7 : i32 to vector<40x4xi32>
    %40 = arith.cmpi sge, %30, %39 : vector<40x4xi32>
    %41 = arith.extui %40 : vector<40x4xi1> to vector<40x4xi32>
    %42 = arith.addi %38, %41 : vector<40x4xi32>
    %43 = arith.cmpi eq, %42, %31 : vector<40x4xi32>
    %44 = arith.extui %43 : vector<40x4xi1> to vector<40x4xi32>
    %45 = arith.sitofp %44 : vector<40x4xi32> to vector<40x4xf32>
    %cst_8 = arith.constant dense<0.000000e+00> : vector<4xf32>
    %46 = vector.multi_reduction <add>, %29, %cst_8 [1] : vector<4x40xf32> to vector<4xf32>
    %47 = vector.shape_cast %46 : vector<4xf32> to vector<4x1xf32>
    %cst_9 = arith.constant 1.000000e+00 : f32
    %48 = vector.broadcast %cst_9 : f32 to vector<4x1xf32>
    %49 = arith.maximumf %47, %48 : vector<4x1xf32>
    %cst_10 = arith.constant 1.000000e+00 : f32
    %50 = vector.broadcast %cst_10 : f32 to vector<4x1xf32>
    %51 = arith.divf %50, %49 : vector<4x1xf32>
    %c0_11 = arith.constant 0 : index
    %c0_12 = arith.constant 0 : index
    %52 = vector.load %arg0[%c0_11, %c0_12] : memref<40x16xf32, #tpu.memory_space<vmem>>, vector<40x16xf32>
    %c0_13 = arith.constant 0 : index
    %c0_14 = arith.constant 0 : index
    %53 = vector.load %arg3[%c0_13, %c0_14] : memref<16x8xf32, #tpu.memory_space<vmem>>, vector<16x8xf32>
    %cst_15 = arith.constant dense<0.000000e+00> : vector<40x8xf32>
    %54 = tpu.matmul %52, %53, %cst_15 {dimension_numbers = #tpu.dot_dimension_numbers<[1], [0], [0], [1], [0, 0, 1, 1], [], []>} : vector<40x16xf32>, vector<16x8xf32>, vector<40x8xf32> -> vector<40x8xf32>
    %c0_16 = arith.constant 0 : index
    %c0_17 = arith.constant 0 : index
    %55 = vector.load %arg4[%c0_16, %c0_17] : memref<1x8xf32, #tpu.memory_space<vmem>>, vector<1x8xf32>
    %56 = vector.broadcast %55 : vector<1x8xf32> to vector<40x8xf32>
    %57 = arith.addf %54, %56 : vector<40x8xf32>
    %cst_18 = arith.constant 0.000000e+00 : f32
    %58 = vector.broadcast %cst_18 : f32 to vector<40x8xf32>
    %59 = arith.maximumf %57, %58 : vector<40x8xf32>
    %c0_19 = arith.constant 0 : index
    %c0_20 = arith.constant 0 : index
    %60 = vector.load %arg5[%c0_19, %c0_20] : memref<8x8xf32, #tpu.memory_space<vmem>>, vector<8x8xf32>
    %cst_21 = arith.constant dense<0.000000e+00> : vector<40x8xf32>
    %61 = tpu.matmul %59, %60, %cst_21 {dimension_numbers = #tpu.dot_dimension_numbers<[1], [0], [0], [1], [0, 0, 1, 1], [], []>} : vector<40x8xf32>, vector<8x8xf32>, vector<40x8xf32> -> vector<40x8xf32>
    %c0_22 = arith.constant 0 : index
    %c0_23 = arith.constant 0 : index
    %62 = vector.load %arg6[%c0_22, %c0_23] : memref<1x8xf32, #tpu.memory_space<vmem>>, vector<1x8xf32>
    %63 = vector.broadcast %62 : vector<1x8xf32> to vector<40x8xf32>
    %64 = arith.addf %61, %63 : vector<40x8xf32>
    %c0_24 = arith.constant 0 : index
    %c0_25 = arith.constant 0 : index
    %65 = vector.load %arg7[%c0_24, %c0_25] : memref<8x2176xf32, #tpu.memory_space<vmem>>, vector<8x2176xf32>
    %cst_26 = arith.constant dense<0.000000e+00> : vector<40x2176xf32>
    %66 = tpu.matmul %59, %65, %cst_26 {dimension_numbers = #tpu.dot_dimension_numbers<[1], [0], [0], [1], [0, 0, 1, 1], [], []>} : vector<40x8xf32>, vector<8x2176xf32>, vector<40x2176xf32> -> vector<40x2176xf32>
    %c0_i32 = arith.constant 0 : i32
    %67 = vector.broadcast %c0_i32 : i32 to vector<40x40xi32>
    %68 = arith.cmpi eq, %13, %67 : vector<40x40xi32>
    %cst_27 = arith.constant 0.000000e+00 : f32
    %69 = vector.broadcast %cst_27 : f32 to vector<40x40xf32>
    %70 = arith.select %68, %12, %69 : vector<40x40xi1>, vector<40x40xf32>
    %71 = vector.extract_strided_slice %66 {offsets = [0, 0], sizes = [40, 8], strides = [1, 1]} : vector<40x2176xf32> to vector<40x8xf32>
    %cst_28 = arith.constant dense<0.000000e+00> : vector<40x8xf32>
    %72 = tpu.matmul %70, %71, %cst_28 {dimension_numbers = #tpu.dot_dimension_numbers<[1], [0], [0], [1], [0, 0, 1, 1], [], []>} : vector<40x40xf32>, vector<40x8xf32>, vector<40x8xf32> -> vector<40x8xf32>
    %73 = arith.addf %64, %72 : vector<40x8xf32>
    %c1_i32 = arith.constant 1 : i32
    %74 = vector.broadcast %c1_i32 : i32 to vector<40x40xi32>
    %75 = arith.cmpi eq, %13, %74 : vector<40x40xi32>
    %cst_29 = arith.constant 0.000000e+00 : f32
    %76 = vector.broadcast %cst_29 : f32 to vector<40x40xf32>
    %77 = arith.select %75, %12, %76 : vector<40x40xi1>, vector<40x40xf32>
    %78 = vector.extract_strided_slice %66 {offsets = [0, 128], sizes = [40, 8], strides = [1, 1]} : vector<40x2176xf32> to vector<40x8xf32>
    %cst_30 = arith.constant dense<0.000000e+00> : vector<40x8xf32>
    %79 = tpu.matmul %77, %78, %cst_30 {dimension_numbers = #tpu.dot_dimension_numbers<[1], [0], [0], [1], [0, 0, 1, 1], [], []>} : vector<40x40xf32>, vector<40x8xf32>, vector<40x8xf32> -> vector<40x8xf32>
    %80 = arith.addf %73, %79 : vector<40x8xf32>
    %c2_i32 = arith.constant 2 : i32
    %81 = vector.broadcast %c2_i32 : i32 to vector<40x40xi32>
    %82 = arith.cmpi eq, %13, %81 : vector<40x40xi32>
    %cst_31 = arith.constant 0.000000e+00 : f32
    %83 = vector.broadcast %cst_31 : f32 to vector<40x40xf32>
    %84 = arith.select %82, %12, %83 : vector<40x40xi1>, vector<40x40xf32>
    %85 = vector.extract_strided_slice %66 {offsets = [0, 256], sizes = [40, 8], strides = [1, 1]} : vector<40x2176xf32> to vector<40x8xf32>
    %cst_32 = arith.constant dense<0.000000e+00> : vector<40x8xf32>
    %86 = tpu.matmul %84, %85, %cst_32 {dimension_numbers = #tpu.dot_dimension_numbers<[1], [0], [0], [1], [0, 0, 1, 1], [], []>} : vector<40x40xf32>, vector<40x8xf32>, vector<40x8xf32> -> vector<40x8xf32>
    %87 = arith.addf %80, %86 : vector<40x8xf32>
    %c3_i32 = arith.constant 3 : i32
    %88 = vector.broadcast %c3_i32 : i32 to vector<40x40xi32>
    %89 = arith.cmpi eq, %13, %88 : vector<40x40xi32>
    %cst_33 = arith.constant 0.000000e+00 : f32
    %90 = vector.broadcast %cst_33 : f32 to vector<40x40xf32>
    %91 = arith.select %89, %12, %90 : vector<40x40xi1>, vector<40x40xf32>
    %92 = vector.extract_strided_slice %66 {offsets = [0, 384], sizes = [40, 8], strides = [1, 1]} : vector<40x2176xf32> to vector<40x8xf32>
    %cst_34 = arith.constant dense<0.000000e+00> : vector<40x8xf32>
    %93 = tpu.matmul %91, %92, %cst_34 {dimension_numbers = #tpu.dot_dimension_numbers<[1], [0], [0], [1], [0, 0, 1, 1], [], []>} : vector<40x40xf32>, vector<40x8xf32>, vector<40x8xf32> -> vector<40x8xf32>
    %94 = arith.addf %87, %93 : vector<40x8xf32>
    %c4_i32 = arith.constant 4 : i32
    %95 = vector.broadcast %c4_i32 : i32 to vector<40x40xi32>
    %96 = arith.cmpi eq, %13, %95 : vector<40x40xi32>
    %cst_35 = arith.constant 0.000000e+00 : f32
    %97 = vector.broadcast %cst_35 : f32 to vector<40x40xf32>
    %98 = arith.select %96, %12, %97 : vector<40x40xi1>, vector<40x40xf32>
    %99 = vector.extract_strided_slice %66 {offsets = [0, 512], sizes = [40, 8], strides = [1, 1]} : vector<40x2176xf32> to vector<40x8xf32>
    %cst_36 = arith.constant dense<0.000000e+00> : vector<40x8xf32>
    %100 = tpu.matmul %98, %99, %cst_36 {dimension_numbers = #tpu.dot_dimension_numbers<[1], [0], [0], [1], [0, 0, 1, 1], [], []>} : vector<40x40xf32>, vector<40x8xf32>, vector<40x8xf32> -> vector<40x8xf32>
    %101 = arith.addf %94, %100 : vector<40x8xf32>
    %c5_i32 = arith.constant 5 : i32
    %102 = vector.broadcast %c5_i32 : i32 to vector<40x40xi32>
    %103 = arith.cmpi eq, %13, %102 : vector<40x40xi32>
    %cst_37 = arith.constant 0.000000e+00 : f32
    %104 = vector.broadcast %cst_37 : f32 to vector<40x40xf32>
    %105 = arith.select %103, %12, %104 : vector<40x40xi1>, vector<40x40xf32>
    %106 = vector.extract_strided_slice %66 {offsets = [0, 640], sizes = [40, 8], strides = [1, 1]} : vector<40x2176xf32> to vector<40x8xf32>
    %cst_38 = arith.constant dense<0.000000e+00> : vector<40x8xf32>
    %107 = tpu.matmul %105, %106, %cst_38 {dimension_numbers = #tpu.dot_dimension_numbers<[1], [0], [0], [1], [0, 0, 1, 1], [], []>} : vector<40x40xf32>, vector<40x8xf32>, vector<40x8xf32> -> vector<40x8xf32>
    %108 = arith.addf %101, %107 : vector<40x8xf32>
    %c6_i32 = arith.constant 6 : i32
    %109 = vector.broadcast %c6_i32 : i32 to vector<40x40xi32>
    %110 = arith.cmpi eq, %13, %109 : vector<40x40xi32>
    %cst_39 = arith.constant 0.000000e+00 : f32
    %111 = vector.broadcast %cst_39 : f32 to vector<40x40xf32>
    %112 = arith.select %110, %12, %111 : vector<40x40xi1>, vector<40x40xf32>
    %113 = vector.extract_strided_slice %66 {offsets = [0, 768], sizes = [40, 8], strides = [1, 1]} : vector<40x2176xf32> to vector<40x8xf32>
    %cst_40 = arith.constant dense<0.000000e+00> : vector<40x8xf32>
    %114 = tpu.matmul %112, %113, %cst_40 {dimension_numbers = #tpu.dot_dimension_numbers<[1], [0], [0], [1], [0, 0, 1, 1], [], []>} : vector<40x40xf32>, vector<40x8xf32>, vector<40x8xf32> -> vector<40x8xf32>
    %115 = arith.addf %108, %114 : vector<40x8xf32>
    %c7_i32 = arith.constant 7 : i32
    %116 = vector.broadcast %c7_i32 : i32 to vector<40x40xi32>
    %117 = arith.cmpi eq, %13, %116 : vector<40x40xi32>
    %cst_41 = arith.constant 0.000000e+00 : f32
    %118 = vector.broadcast %cst_41 : f32 to vector<40x40xf32>
    %119 = arith.select %117, %12, %118 : vector<40x40xi1>, vector<40x40xf32>
    %120 = vector.extract_strided_slice %66 {offsets = [0, 896], sizes = [40, 8], strides = [1, 1]} : vector<40x2176xf32> to vector<40x8xf32>
    %cst_42 = arith.constant dense<0.000000e+00> : vector<40x8xf32>
    %121 = tpu.matmul %119, %120, %cst_42 {dimension_numbers = #tpu.dot_dimension_numbers<[1], [0], [0], [1], [0, 0, 1, 1], [], []>} : vector<40x40xf32>, vector<40x8xf32>, vector<40x8xf32> -> vector<40x8xf32>
    %122 = arith.addf %115, %121 : vector<40x8xf32>
    %c8_i32 = arith.constant 8 : i32
    %123 = vector.broadcast %c8_i32 : i32 to vector<40x40xi32>
    %124 = arith.cmpi eq, %13, %123 : vector<40x40xi32>
    %cst_43 = arith.constant 0.000000e+00 : f32
    %125 = vector.broadcast %cst_43 : f32 to vector<40x40xf32>
    %126 = arith.select %124, %12, %125 : vector<40x40xi1>, vector<40x40xf32>
    %127 = vector.extract_strided_slice %66 {offsets = [0, 1024], sizes = [40, 8], strides = [1, 1]} : vector<40x2176xf32> to vector<40x8xf32>
    %cst_44 = arith.constant dense<0.000000e+00> : vector<40x8xf32>
    %128 = tpu.matmul %126, %127, %cst_44 {dimension_numbers = #tpu.dot_dimension_numbers<[1], [0], [0], [1], [0, 0, 1, 1], [], []>} : vector<40x40xf32>, vector<40x8xf32>, vector<40x8xf32> -> vector<40x8xf32>
    %129 = arith.addf %122, %128 : vector<40x8xf32>
    %c9_i32 = arith.constant 9 : i32
    %130 = vector.broadcast %c9_i32 : i32 to vector<40x40xi32>
    %131 = arith.cmpi eq, %13, %130 : vector<40x40xi32>
    %cst_45 = arith.constant 0.000000e+00 : f32
    %132 = vector.broadcast %cst_45 : f32 to vector<40x40xf32>
    %133 = arith.select %131, %12, %132 : vector<40x40xi1>, vector<40x40xf32>
    %134 = vector.extract_strided_slice %66 {offsets = [0, 1152], sizes = [40, 8], strides = [1, 1]} : vector<40x2176xf32> to vector<40x8xf32>
    %cst_46 = arith.constant dense<0.000000e+00> : vector<40x8xf32>
    %135 = tpu.matmul %133, %134, %cst_46 {dimension_numbers = #tpu.dot_dimension_numbers<[1], [0], [0], [1], [0, 0, 1, 1], [], []>} : vector<40x40xf32>, vector<40x8xf32>, vector<40x8xf32> -> vector<40x8xf32>
    %136 = arith.addf %129, %135 : vector<40x8xf32>
    %c10_i32 = arith.constant 10 : i32
    %137 = vector.broadcast %c10_i32 : i32 to vector<40x40xi32>
    %138 = arith.cmpi eq, %13, %137 : vector<40x40xi32>
    %cst_47 = arith.constant 0.000000e+00 : f32
    %139 = vector.broadcast %cst_47 : f32 to vector<40x40xf32>
    %140 = arith.select %138, %12, %139 : vector<40x40xi1>, vector<40x40xf32>
    %141 = vector.extract_strided_slice %66 {offsets = [0, 1280], sizes = [40, 8], strides = [1, 1]} : vector<40x2176xf32> to vector<40x8xf32>
    %cst_48 = arith.constant dense<0.000000e+00> : vector<40x8xf32>
    %142 = tpu.matmul %140, %141, %cst_48 {dimension_numbers = #tpu.dot_dimension_numbers<[1], [0], [0], [1], [0, 0, 1, 1], [], []>} : vector<40x40xf32>, vector<40x8xf32>, vector<40x8xf32> -> vector<40x8xf32>
    %143 = arith.addf %136, %142 : vector<40x8xf32>
    %c11_i32 = arith.constant 11 : i32
    %144 = vector.broadcast %c11_i32 : i32 to vector<40x40xi32>
    %145 = arith.cmpi eq, %13, %144 : vector<40x40xi32>
    %cst_49 = arith.constant 0.000000e+00 : f32
    %146 = vector.broadcast %cst_49 : f32 to vector<40x40xf32>
    %147 = arith.select %145, %12, %146 : vector<40x40xi1>, vector<40x40xf32>
    %148 = vector.extract_strided_slice %66 {offsets = [0, 1408], sizes = [40, 8], strides = [1, 1]} : vector<40x2176xf32> to vector<40x8xf32>
    %cst_50 = arith.constant dense<0.000000e+00> : vector<40x8xf32>
    %149 = tpu.matmul %147, %148, %cst_50 {dimension_numbers = #tpu.dot_dimension_numbers<[1], [0], [0], [1], [0, 0, 1, 1], [], []>} : vector<40x40xf32>, vector<40x8xf32>, vector<40x8xf32> -> vector<40x8xf32>
    %150 = arith.addf %143, %149 : vector<40x8xf32>
    %c12_i32 = arith.constant 12 : i32
    %151 = vector.broadcast %c12_i32 : i32 to vector<40x40xi32>
    %152 = arith.cmpi eq, %13, %151 : vector<40x40xi32>
    %cst_51 = arith.constant 0.000000e+00 : f32
    %153 = vector.broadcast %cst_51 : f32 to vector<40x40xf32>
    %154 = arith.select %152, %12, %153 : vector<40x40xi1>, vector<40x40xf32>
    %155 = vector.extract_strided_slice %66 {offsets = [0, 1536], sizes = [40, 8], strides = [1, 1]} : vector<40x2176xf32> to vector<40x8xf32>
    %cst_52 = arith.constant dense<0.000000e+00> : vector<40x8xf32>
    %156 = tpu.matmul %154, %155, %cst_52 {dimension_numbers = #tpu.dot_dimension_numbers<[1], [0], [0], [1], [0, 0, 1, 1], [], []>} : vector<40x40xf32>, vector<40x8xf32>, vector<40x8xf32> -> vector<40x8xf32>
    %157 = arith.addf %150, %156 : vector<40x8xf32>
    %c13_i32 = arith.constant 13 : i32
    %158 = vector.broadcast %c13_i32 : i32 to vector<40x40xi32>
    %159 = arith.cmpi eq, %13, %158 : vector<40x40xi32>
    %cst_53 = arith.constant 0.000000e+00 : f32
    %160 = vector.broadcast %cst_53 : f32 to vector<40x40xf32>
    %161 = arith.select %159, %12, %160 : vector<40x40xi1>, vector<40x40xf32>
    %162 = vector.extract_strided_slice %66 {offsets = [0, 1664], sizes = [40, 8], strides = [1, 1]} : vector<40x2176xf32> to vector<40x8xf32>
    %cst_54 = arith.constant dense<0.000000e+00> : vector<40x8xf32>
    %163 = tpu.matmul %161, %162, %cst_54 {dimension_numbers = #tpu.dot_dimension_numbers<[1], [0], [0], [1], [0, 0, 1, 1], [], []>} : vector<40x40xf32>, vector<40x8xf32>, vector<40x8xf32> -> vector<40x8xf32>
    %164 = arith.addf %157, %163 : vector<40x8xf32>
    %c14_i32 = arith.constant 14 : i32
    %165 = vector.broadcast %c14_i32 : i32 to vector<40x40xi32>
    %166 = arith.cmpi eq, %13, %165 : vector<40x40xi32>
    %cst_55 = arith.constant 0.000000e+00 : f32
    %167 = vector.broadcast %cst_55 : f32 to vector<40x40xf32>
    %168 = arith.select %166, %12, %167 : vector<40x40xi1>, vector<40x40xf32>
    %169 = vector.extract_strided_slice %66 {offsets = [0, 1792], sizes = [40, 8], strides = [1, 1]} : vector<40x2176xf32> to vector<40x8xf32>
    %cst_56 = arith.constant dense<0.000000e+00> : vector<40x8xf32>
    %170 = tpu.matmul %168, %169, %cst_56 {dimension_numbers = #tpu.dot_dimension_numbers<[1], [0], [0], [1], [0, 0, 1, 1], [], []>} : vector<40x40xf32>, vector<40x8xf32>, vector<40x8xf32> -> vector<40x8xf32>
    %171 = arith.addf %164, %170 : vector<40x8xf32>
    %c15_i32 = arith.constant 15 : i32
    %172 = vector.broadcast %c15_i32 : i32 to vector<40x40xi32>
    %173 = arith.cmpi eq, %13, %172 : vector<40x40xi32>
    %cst_57 = arith.constant 0.000000e+00 : f32
    %174 = vector.broadcast %cst_57 : f32 to vector<40x40xf32>
    %175 = arith.select %173, %12, %174 : vector<40x40xi1>, vector<40x40xf32>
    %176 = vector.extract_strided_slice %66 {offsets = [0, 1920], sizes = [40, 8], strides = [1, 1]} : vector<40x2176xf32> to vector<40x8xf32>
    %cst_58 = arith.constant dense<0.000000e+00> : vector<40x8xf32>
    %177 = tpu.matmul %175, %176, %cst_58 {dimension_numbers = #tpu.dot_dimension_numbers<[1], [0], [0], [1], [0, 0, 1, 1], [], []>} : vector<40x40xf32>, vector<40x8xf32>, vector<40x8xf32> -> vector<40x8xf32>
    %178 = arith.addf %171, %177 : vector<40x8xf32>
    %c16_i32_59 = arith.constant 16 : i32
    %179 = vector.broadcast %c16_i32_59 : i32 to vector<40x40xi32>
    %180 = arith.cmpi eq, %13, %179 : vector<40x40xi32>
    %cst_60 = arith.constant 0.000000e+00 : f32
    %181 = vector.broadcast %cst_60 : f32 to vector<40x40xf32>
    %182 = arith.select %180, %12, %181 : vector<40x40xi1>, vector<40x40xf32>
    %183 = vector.extract_strided_slice %66 {offsets = [0, 2048], sizes = [40, 8], strides = [1, 1]} : vector<40x2176xf32> to vector<40x8xf32>
    %cst_61 = arith.constant dense<0.000000e+00> : vector<40x8xf32>
    %184 = tpu.matmul %182, %183, %cst_61 {dimension_numbers = #tpu.dot_dimension_numbers<[1], [0], [0], [1], [0, 0, 1, 1], [], []>} : vector<40x40xf32>, vector<40x8xf32>, vector<40x8xf32> -> vector<40x8xf32>
    %185 = arith.addf %178, %184 : vector<40x8xf32>
    %cst_62 = arith.constant 0.000000e+00 : f32
    %186 = vector.broadcast %cst_62 : f32 to vector<40x8xf32>
    %187 = arith.maximumf %185, %186 : vector<40x8xf32>
    %cst_63 = arith.constant dense<0.000000e+00> : vector<4x8xf32>
    %188 = tpu.matmul %29, %187, %cst_63 {dimension_numbers = #tpu.dot_dimension_numbers<[1], [0], [0], [1], [0, 0, 1, 1], [], []>} : vector<4x40xf32>, vector<40x8xf32>, vector<4x8xf32> -> vector<4x8xf32>
    %189 = vector.broadcast %51 : vector<4x1xf32> to vector<4x8xf32>
    %190 = arith.mulf %188, %189 : vector<4x8xf32>
    %cst_64 = arith.constant dense<0.000000e+00> : vector<40x8xf32>
    %191 = tpu.matmul %45, %190, %cst_64 {dimension_numbers = #tpu.dot_dimension_numbers<[1], [0], [0], [1], [0, 0, 1, 1], [], []>} : vector<40x4xf32>, vector<4x8xf32>, vector<40x8xf32> -> vector<40x8xf32>
    %192 = arith.subf %187, %191 : vector<40x8xf32>
    %193 = arith.mulf %192, %192 : vector<40x8xf32>
    %cst_65 = arith.constant dense<0.000000e+00> : vector<4x8xf32>
    %194 = tpu.matmul %29, %193, %cst_65 {dimension_numbers = #tpu.dot_dimension_numbers<[1], [0], [0], [1], [0, 0, 1, 1], [], []>} : vector<4x40xf32>, vector<40x8xf32>, vector<4x8xf32> -> vector<4x8xf32>
    %195 = vector.broadcast %51 : vector<4x1xf32> to vector<4x8xf32>
    %196 = arith.mulf %194, %195 : vector<4x8xf32>
    %cst_66 = arith.constant 9.99999974E-6 : f32
    %197 = vector.broadcast %cst_66 : f32 to vector<4x8xf32>
    %198 = arith.addf %196, %197 : vector<4x8xf32>
    %199 = math.rsqrt %198 : vector<4x8xf32>
    %c0_67 = arith.constant 0 : index
    %c0_68 = arith.constant 0 : index
    %200 = vector.load %arg14[%c0_67, %c0_68] : memref<4x8xf32, #tpu.memory_space<vmem>>, vector<4x8xf32>
    %201 = arith.mulf %199, %200 : vector<4x8xf32>
    %cst_69 = arith.constant dense<0.000000e+00> : vector<40x8xf32>
    %202 = tpu.matmul %45, %201, %cst_69 {dimension_numbers = #tpu.dot_dimension_numbers<[1], [0], [0], [1], [0, 0, 1, 1], [], []>} : vector<40x4xf32>, vector<4x8xf32>, vector<40x8xf32> -> vector<40x8xf32>
    %c0_70 = arith.constant 0 : index
    %c0_71 = arith.constant 0 : index
    %203 = vector.load %arg15[%c0_70, %c0_71] : memref<4x8xf32, #tpu.memory_space<vmem>>, vector<4x8xf32>
    %cst_72 = arith.constant dense<0.000000e+00> : vector<40x8xf32>
    %204 = tpu.matmul %45, %203, %cst_72 {dimension_numbers = #tpu.dot_dimension_numbers<[1], [0], [0], [1], [0, 0, 1, 1], [], []>} : vector<40x4xf32>, vector<4x8xf32>, vector<40x8xf32> -> vector<40x8xf32>
    %205 = arith.mulf %192, %202 : vector<40x8xf32>
    %206 = arith.addf %205, %204 : vector<40x8xf32>
    %c0_73 = arith.constant 0 : index
    %c0_74 = arith.constant 0 : index
    %207 = vector.load %arg8[%c0_73, %c0_74] : memref<8x8xf32, #tpu.memory_space<vmem>>, vector<8x8xf32>
    %cst_75 = arith.constant dense<0.000000e+00> : vector<40x8xf32>
    %208 = tpu.matmul %206, %207, %cst_75 {dimension_numbers = #tpu.dot_dimension_numbers<[1], [0], [0], [1], [0, 0, 1, 1], [], []>} : vector<40x8xf32>, vector<8x8xf32>, vector<40x8xf32> -> vector<40x8xf32>
    %c0_76 = arith.constant 0 : index
    %c0_77 = arith.constant 0 : index
    %209 = vector.load %arg9[%c0_76, %c0_77] : memref<1x8xf32, #tpu.memory_space<vmem>>, vector<1x8xf32>
    %210 = vector.broadcast %209 : vector<1x8xf32> to vector<40x8xf32>
    %211 = arith.addf %208, %210 : vector<40x8xf32>
    %c0_78 = arith.constant 0 : index
    %c0_79 = arith.constant 0 : index
    %212 = vector.load %arg10[%c0_78, %c0_79] : memref<8x2176xf32, #tpu.memory_space<vmem>>, vector<8x2176xf32>
    %cst_80 = arith.constant dense<0.000000e+00> : vector<40x2176xf32>
    %213 = tpu.matmul %206, %212, %cst_80 {dimension_numbers = #tpu.dot_dimension_numbers<[1], [0], [0], [1], [0, 0, 1, 1], [], []>} : vector<40x8xf32>, vector<8x2176xf32>, vector<40x2176xf32> -> vector<40x2176xf32>
    %c0_i32_81 = arith.constant 0 : i32
    %214 = vector.broadcast %c0_i32_81 : i32 to vector<40x40xi32>
    %215 = arith.cmpi eq, %13, %214 : vector<40x40xi32>
    %cst_82 = arith.constant 0.000000e+00 : f32
    %216 = vector.broadcast %cst_82 : f32 to vector<40x40xf32>
    %217 = arith.select %215, %12, %216 : vector<40x40xi1>, vector<40x40xf32>
    %218 = vector.extract_strided_slice %213 {offsets = [0, 0], sizes = [40, 8], strides = [1, 1]} : vector<40x2176xf32> to vector<40x8xf32>
    %cst_83 = arith.constant dense<0.000000e+00> : vector<40x8xf32>
    %219 = tpu.matmul %217, %218, %cst_83 {dimension_numbers = #tpu.dot_dimension_numbers<[1], [0], [0], [1], [0, 0, 1, 1], [], []>} : vector<40x40xf32>, vector<40x8xf32>, vector<40x8xf32> -> vector<40x8xf32>
    %220 = arith.addf %211, %219 : vector<40x8xf32>
    %c1_i32_84 = arith.constant 1 : i32
    %221 = vector.broadcast %c1_i32_84 : i32 to vector<40x40xi32>
    %222 = arith.cmpi eq, %13, %221 : vector<40x40xi32>
    %cst_85 = arith.constant 0.000000e+00 : f32
    %223 = vector.broadcast %cst_85 : f32 to vector<40x40xf32>
    %224 = arith.select %222, %12, %223 : vector<40x40xi1>, vector<40x40xf32>
    %225 = vector.extract_strided_slice %213 {offsets = [0, 128], sizes = [40, 8], strides = [1, 1]} : vector<40x2176xf32> to vector<40x8xf32>
    %cst_86 = arith.constant dense<0.000000e+00> : vector<40x8xf32>
    %226 = tpu.matmul %224, %225, %cst_86 {dimension_numbers = #tpu.dot_dimension_numbers<[1], [0], [0], [1], [0, 0, 1, 1], [], []>} : vector<40x40xf32>, vector<40x8xf32>, vector<40x8xf32> -> vector<40x8xf32>
    %227 = arith.addf %220, %226 : vector<40x8xf32>
    %c2_i32_87 = arith.constant 2 : i32
    %228 = vector.broadcast %c2_i32_87 : i32 to vector<40x40xi32>
    %229 = arith.cmpi eq, %13, %228 : vector<40x40xi32>
    %cst_88 = arith.constant 0.000000e+00 : f32
    %230 = vector.broadcast %cst_88 : f32 to vector<40x40xf32>
    %231 = arith.select %229, %12, %230 : vector<40x40xi1>, vector<40x40xf32>
    %232 = vector.extract_strided_slice %213 {offsets = [0, 256], sizes = [40, 8], strides = [1, 1]} : vector<40x2176xf32> to vector<40x8xf32>
    %cst_89 = arith.constant dense<0.000000e+00> : vector<40x8xf32>
    %233 = tpu.matmul %231, %232, %cst_89 {dimension_numbers = #tpu.dot_dimension_numbers<[1], [0], [0], [1], [0, 0, 1, 1], [], []>} : vector<40x40xf32>, vector<40x8xf32>, vector<40x8xf32> -> vector<40x8xf32>
    %234 = arith.addf %227, %233 : vector<40x8xf32>
    %c3_i32_90 = arith.constant 3 : i32
    %235 = vector.broadcast %c3_i32_90 : i32 to vector<40x40xi32>
    %236 = arith.cmpi eq, %13, %235 : vector<40x40xi32>
    %cst_91 = arith.constant 0.000000e+00 : f32
    %237 = vector.broadcast %cst_91 : f32 to vector<40x40xf32>
    %238 = arith.select %236, %12, %237 : vector<40x40xi1>, vector<40x40xf32>
    %239 = vector.extract_strided_slice %213 {offsets = [0, 384], sizes = [40, 8], strides = [1, 1]} : vector<40x2176xf32> to vector<40x8xf32>
    %cst_92 = arith.constant dense<0.000000e+00> : vector<40x8xf32>
    %240 = tpu.matmul %238, %239, %cst_92 {dimension_numbers = #tpu.dot_dimension_numbers<[1], [0], [0], [1], [0, 0, 1, 1], [], []>} : vector<40x40xf32>, vector<40x8xf32>, vector<40x8xf32> -> vector<40x8xf32>
    %241 = arith.addf %234, %240 : vector<40x8xf32>
    %c4_i32_93 = arith.constant 4 : i32
    %242 = vector.broadcast %c4_i32_93 : i32 to vector<40x40xi32>
    %243 = arith.cmpi eq, %13, %242 : vector<40x40xi32>
    %cst_94 = arith.constant 0.000000e+00 : f32
    %244 = vector.broadcast %cst_94 : f32 to vector<40x40xf32>
    %245 = arith.select %243, %12, %244 : vector<40x40xi1>, vector<40x40xf32>
    %246 = vector.extract_strided_slice %213 {offsets = [0, 512], sizes = [40, 8], strides = [1, 1]} : vector<40x2176xf32> to vector<40x8xf32>
    %cst_95 = arith.constant dense<0.000000e+00> : vector<40x8xf32>
    %247 = tpu.matmul %245, %246, %cst_95 {dimension_numbers = #tpu.dot_dimension_numbers<[1], [0], [0], [1], [0, 0, 1, 1], [], []>} : vector<40x40xf32>, vector<40x8xf32>, vector<40x8xf32> -> vector<40x8xf32>
    %248 = arith.addf %241, %247 : vector<40x8xf32>
    %c5_i32_96 = arith.constant 5 : i32
    %249 = vector.broadcast %c5_i32_96 : i32 to vector<40x40xi32>
    %250 = arith.cmpi eq, %13, %249 : vector<40x40xi32>
    %cst_97 = arith.constant 0.000000e+00 : f32
    %251 = vector.broadcast %cst_97 : f32 to vector<40x40xf32>
    %252 = arith.select %250, %12, %251 : vector<40x40xi1>, vector<40x40xf32>
    %253 = vector.extract_strided_slice %213 {offsets = [0, 640], sizes = [40, 8], strides = [1, 1]} : vector<40x2176xf32> to vector<40x8xf32>
    %cst_98 = arith.constant dense<0.000000e+00> : vector<40x8xf32>
    %254 = tpu.matmul %252, %253, %cst_98 {dimension_numbers = #tpu.dot_dimension_numbers<[1], [0], [0], [1], [0, 0, 1, 1], [], []>} : vector<40x40xf32>, vector<40x8xf32>, vector<40x8xf32> -> vector<40x8xf32>
    %255 = arith.addf %248, %254 : vector<40x8xf32>
    %c6_i32_99 = arith.constant 6 : i32
    %256 = vector.broadcast %c6_i32_99 : i32 to vector<40x40xi32>
    %257 = arith.cmpi eq, %13, %256 : vector<40x40xi32>
    %cst_100 = arith.constant 0.000000e+00 : f32
    %258 = vector.broadcast %cst_100 : f32 to vector<40x40xf32>
    %259 = arith.select %257, %12, %258 : vector<40x40xi1>, vector<40x40xf32>
    %260 = vector.extract_strided_slice %213 {offsets = [0, 768], sizes = [40, 8], strides = [1, 1]} : vector<40x2176xf32> to vector<40x8xf32>
    %cst_101 = arith.constant dense<0.000000e+00> : vector<40x8xf32>
    %261 = tpu.matmul %259, %260, %cst_101 {dimension_numbers = #tpu.dot_dimension_numbers<[1], [0], [0], [1], [0, 0, 1, 1], [], []>} : vector<40x40xf32>, vector<40x8xf32>, vector<40x8xf32> -> vector<40x8xf32>
    %262 = arith.addf %255, %261 : vector<40x8xf32>
    %c7_i32_102 = arith.constant 7 : i32
    %263 = vector.broadcast %c7_i32_102 : i32 to vector<40x40xi32>
    %264 = arith.cmpi eq, %13, %263 : vector<40x40xi32>
    %cst_103 = arith.constant 0.000000e+00 : f32
    %265 = vector.broadcast %cst_103 : f32 to vector<40x40xf32>
    %266 = arith.select %264, %12, %265 : vector<40x40xi1>, vector<40x40xf32>
    %267 = vector.extract_strided_slice %213 {offsets = [0, 896], sizes = [40, 8], strides = [1, 1]} : vector<40x2176xf32> to vector<40x8xf32>
    %cst_104 = arith.constant dense<0.000000e+00> : vector<40x8xf32>
    %268 = tpu.matmul %266, %267, %cst_104 {dimension_numbers = #tpu.dot_dimension_numbers<[1], [0], [0], [1], [0, 0, 1, 1], [], []>} : vector<40x40xf32>, vector<40x8xf32>, vector<40x8xf32> -> vector<40x8xf32>
    %269 = arith.addf %262, %268 : vector<40x8xf32>
    %c8_i32_105 = arith.constant 8 : i32
    %270 = vector.broadcast %c8_i32_105 : i32 to vector<40x40xi32>
    %271 = arith.cmpi eq, %13, %270 : vector<40x40xi32>
    %cst_106 = arith.constant 0.000000e+00 : f32
    %272 = vector.broadcast %cst_106 : f32 to vector<40x40xf32>
    %273 = arith.select %271, %12, %272 : vector<40x40xi1>, vector<40x40xf32>
    %274 = vector.extract_strided_slice %213 {offsets = [0, 1024], sizes = [40, 8], strides = [1, 1]} : vector<40x2176xf32> to vector<40x8xf32>
    %cst_107 = arith.constant dense<0.000000e+00> : vector<40x8xf32>
    %275 = tpu.matmul %273, %274, %cst_107 {dimension_numbers = #tpu.dot_dimension_numbers<[1], [0], [0], [1], [0, 0, 1, 1], [], []>} : vector<40x40xf32>, vector<40x8xf32>, vector<40x8xf32> -> vector<40x8xf32>
    %276 = arith.addf %269, %275 : vector<40x8xf32>
    %c9_i32_108 = arith.constant 9 : i32
    %277 = vector.broadcast %c9_i32_108 : i32 to vector<40x40xi32>
    %278 = arith.cmpi eq, %13, %277 : vector<40x40xi32>
    %cst_109 = arith.constant 0.000000e+00 : f32
    %279 = vector.broadcast %cst_109 : f32 to vector<40x40xf32>
    %280 = arith.select %278, %12, %279 : vector<40x40xi1>, vector<40x40xf32>
    %281 = vector.extract_strided_slice %213 {offsets = [0, 1152], sizes = [40, 8], strides = [1, 1]} : vector<40x2176xf32> to vector<40x8xf32>
    %cst_110 = arith.constant dense<0.000000e+00> : vector<40x8xf32>
    %282 = tpu.matmul %280, %281, %cst_110 {dimension_numbers = #tpu.dot_dimension_numbers<[1], [0], [0], [1], [0, 0, 1, 1], [], []>} : vector<40x40xf32>, vector<40x8xf32>, vector<40x8xf32> -> vector<40x8xf32>
    %283 = arith.addf %276, %282 : vector<40x8xf32>
    %c10_i32_111 = arith.constant 10 : i32
    %284 = vector.broadcast %c10_i32_111 : i32 to vector<40x40xi32>
    %285 = arith.cmpi eq, %13, %284 : vector<40x40xi32>
    %cst_112 = arith.constant 0.000000e+00 : f32
    %286 = vector.broadcast %cst_112 : f32 to vector<40x40xf32>
    %287 = arith.select %285, %12, %286 : vector<40x40xi1>, vector<40x40xf32>
    %288 = vector.extract_strided_slice %213 {offsets = [0, 1280], sizes = [40, 8], strides = [1, 1]} : vector<40x2176xf32> to vector<40x8xf32>
    %cst_113 = arith.constant dense<0.000000e+00> : vector<40x8xf32>
    %289 = tpu.matmul %287, %288, %cst_113 {dimension_numbers = #tpu.dot_dimension_numbers<[1], [0], [0], [1], [0, 0, 1, 1], [], []>} : vector<40x40xf32>, vector<40x8xf32>, vector<40x8xf32> -> vector<40x8xf32>
    %290 = arith.addf %283, %289 : vector<40x8xf32>
    %c11_i32_114 = arith.constant 11 : i32
    %291 = vector.broadcast %c11_i32_114 : i32 to vector<40x40xi32>
    %292 = arith.cmpi eq, %13, %291 : vector<40x40xi32>
    %cst_115 = arith.constant 0.000000e+00 : f32
    %293 = vector.broadcast %cst_115 : f32 to vector<40x40xf32>
    %294 = arith.select %292, %12, %293 : vector<40x40xi1>, vector<40x40xf32>
    %295 = vector.extract_strided_slice %213 {offsets = [0, 1408], sizes = [40, 8], strides = [1, 1]} : vector<40x2176xf32> to vector<40x8xf32>
    %cst_116 = arith.constant dense<0.000000e+00> : vector<40x8xf32>
    %296 = tpu.matmul %294, %295, %cst_116 {dimension_numbers = #tpu.dot_dimension_numbers<[1], [0], [0], [1], [0, 0, 1, 1], [], []>} : vector<40x40xf32>, vector<40x8xf32>, vector<40x8xf32> -> vector<40x8xf32>
    %297 = arith.addf %290, %296 : vector<40x8xf32>
    %c12_i32_117 = arith.constant 12 : i32
    %298 = vector.broadcast %c12_i32_117 : i32 to vector<40x40xi32>
    %299 = arith.cmpi eq, %13, %298 : vector<40x40xi32>
    %cst_118 = arith.constant 0.000000e+00 : f32
    %300 = vector.broadcast %cst_118 : f32 to vector<40x40xf32>
    %301 = arith.select %299, %12, %300 : vector<40x40xi1>, vector<40x40xf32>
    %302 = vector.extract_strided_slice %213 {offsets = [0, 1536], sizes = [40, 8], strides = [1, 1]} : vector<40x2176xf32> to vector<40x8xf32>
    %cst_119 = arith.constant dense<0.000000e+00> : vector<40x8xf32>
    %303 = tpu.matmul %301, %302, %cst_119 {dimension_numbers = #tpu.dot_dimension_numbers<[1], [0], [0], [1], [0, 0, 1, 1], [], []>} : vector<40x40xf32>, vector<40x8xf32>, vector<40x8xf32> -> vector<40x8xf32>
    %304 = arith.addf %297, %303 : vector<40x8xf32>
    %c13_i32_120 = arith.constant 13 : i32
    %305 = vector.broadcast %c13_i32_120 : i32 to vector<40x40xi32>
    %306 = arith.cmpi eq, %13, %305 : vector<40x40xi32>
    %cst_121 = arith.constant 0.000000e+00 : f32
    %307 = vector.broadcast %cst_121 : f32 to vector<40x40xf32>
    %308 = arith.select %306, %12, %307 : vector<40x40xi1>, vector<40x40xf32>
    %309 = vector.extract_strided_slice %213 {offsets = [0, 1664], sizes = [40, 8], strides = [1, 1]} : vector<40x2176xf32> to vector<40x8xf32>
    %cst_122 = arith.constant dense<0.000000e+00> : vector<40x8xf32>
    %310 = tpu.matmul %308, %309, %cst_122 {dimension_numbers = #tpu.dot_dimension_numbers<[1], [0], [0], [1], [0, 0, 1, 1], [], []>} : vector<40x40xf32>, vector<40x8xf32>, vector<40x8xf32> -> vector<40x8xf32>
    %311 = arith.addf %304, %310 : vector<40x8xf32>
    %c14_i32_123 = arith.constant 14 : i32
    %312 = vector.broadcast %c14_i32_123 : i32 to vector<40x40xi32>
    %313 = arith.cmpi eq, %13, %312 : vector<40x40xi32>
    %cst_124 = arith.constant 0.000000e+00 : f32
    %314 = vector.broadcast %cst_124 : f32 to vector<40x40xf32>
    %315 = arith.select %313, %12, %314 : vector<40x40xi1>, vector<40x40xf32>
    %316 = vector.extract_strided_slice %213 {offsets = [0, 1792], sizes = [40, 8], strides = [1, 1]} : vector<40x2176xf32> to vector<40x8xf32>
    %cst_125 = arith.constant dense<0.000000e+00> : vector<40x8xf32>
    %317 = tpu.matmul %315, %316, %cst_125 {dimension_numbers = #tpu.dot_dimension_numbers<[1], [0], [0], [1], [0, 0, 1, 1], [], []>} : vector<40x40xf32>, vector<40x8xf32>, vector<40x8xf32> -> vector<40x8xf32>
    %318 = arith.addf %311, %317 : vector<40x8xf32>
    %c15_i32_126 = arith.constant 15 : i32
    %319 = vector.broadcast %c15_i32_126 : i32 to vector<40x40xi32>
    %320 = arith.cmpi eq, %13, %319 : vector<40x40xi32>
    %cst_127 = arith.constant 0.000000e+00 : f32
    %321 = vector.broadcast %cst_127 : f32 to vector<40x40xf32>
    %322 = arith.select %320, %12, %321 : vector<40x40xi1>, vector<40x40xf32>
    %323 = vector.extract_strided_slice %213 {offsets = [0, 1920], sizes = [40, 8], strides = [1, 1]} : vector<40x2176xf32> to vector<40x8xf32>
    %cst_128 = arith.constant dense<0.000000e+00> : vector<40x8xf32>
    %324 = tpu.matmul %322, %323, %cst_128 {dimension_numbers = #tpu.dot_dimension_numbers<[1], [0], [0], [1], [0, 0, 1, 1], [], []>} : vector<40x40xf32>, vector<40x8xf32>, vector<40x8xf32> -> vector<40x8xf32>
    %325 = arith.addf %318, %324 : vector<40x8xf32>
    %c16_i32_129 = arith.constant 16 : i32
    %326 = vector.broadcast %c16_i32_129 : i32 to vector<40x40xi32>
    %327 = arith.cmpi eq, %13, %326 : vector<40x40xi32>
    %cst_130 = arith.constant 0.000000e+00 : f32
    %328 = vector.broadcast %cst_130 : f32 to vector<40x40xf32>
    %329 = arith.select %327, %12, %328 : vector<40x40xi1>, vector<40x40xf32>
    %330 = vector.extract_strided_slice %213 {offsets = [0, 2048], sizes = [40, 8], strides = [1, 1]} : vector<40x2176xf32> to vector<40x8xf32>
    %cst_131 = arith.constant dense<0.000000e+00> : vector<40x8xf32>
    %331 = tpu.matmul %329, %330, %cst_131 {dimension_numbers = #tpu.dot_dimension_numbers<[1], [0], [0], [1], [0, 0, 1, 1], [], []>} : vector<40x40xf32>, vector<40x8xf32>, vector<40x8xf32> -> vector<40x8xf32>
    %332 = arith.addf %325, %331 : vector<40x8xf32>
    %cst_132 = arith.constant 0.000000e+00 : f32
    %333 = vector.broadcast %cst_132 : f32 to vector<40x8xf32>
    %334 = arith.maximumf %332, %333 : vector<40x8xf32>
    %cst_133 = arith.constant dense<0.000000e+00> : vector<4x8xf32>
    %335 = tpu.matmul %29, %334, %cst_133 {dimension_numbers = #tpu.dot_dimension_numbers<[1], [0], [0], [1], [0, 0, 1, 1], [], []>} : vector<4x40xf32>, vector<40x8xf32>, vector<4x8xf32> -> vector<4x8xf32>
    %336 = vector.broadcast %51 : vector<4x1xf32> to vector<4x8xf32>
    %337 = arith.mulf %335, %336 : vector<4x8xf32>
    %cst_134 = arith.constant dense<0.000000e+00> : vector<40x8xf32>
    %338 = tpu.matmul %45, %337, %cst_134 {dimension_numbers = #tpu.dot_dimension_numbers<[1], [0], [0], [1], [0, 0, 1, 1], [], []>} : vector<40x4xf32>, vector<4x8xf32>, vector<40x8xf32> -> vector<40x8xf32>
    %339 = arith.subf %334, %338 : vector<40x8xf32>
    %340 = arith.mulf %339, %339 : vector<40x8xf32>
    %cst_135 = arith.constant dense<0.000000e+00> : vector<4x8xf32>
    %341 = tpu.matmul %29, %340, %cst_135 {dimension_numbers = #tpu.dot_dimension_numbers<[1], [0], [0], [1], [0, 0, 1, 1], [], []>} : vector<4x40xf32>, vector<40x8xf32>, vector<4x8xf32> -> vector<4x8xf32>
    %342 = vector.broadcast %51 : vector<4x1xf32> to vector<4x8xf32>
    %343 = arith.mulf %341, %342 : vector<4x8xf32>
    %cst_136 = arith.constant 9.99999974E-6 : f32
    %344 = vector.broadcast %cst_136 : f32 to vector<4x8xf32>
    %345 = arith.addf %343, %344 : vector<4x8xf32>
    %346 = math.rsqrt %345 : vector<4x8xf32>
    %c0_137 = arith.constant 0 : index
    %c0_138 = arith.constant 0 : index
    %347 = vector.load %arg16[%c0_137, %c0_138] : memref<4x8xf32, #tpu.memory_space<vmem>>, vector<4x8xf32>
    %348 = arith.mulf %346, %347 : vector<4x8xf32>
    %cst_139 = arith.constant dense<0.000000e+00> : vector<40x8xf32>
    %349 = tpu.matmul %45, %348, %cst_139 {dimension_numbers = #tpu.dot_dimension_numbers<[1], [0], [0], [1], [0, 0, 1, 1], [], []>} : vector<40x4xf32>, vector<4x8xf32>, vector<40x8xf32> -> vector<40x8xf32>
    %c0_140 = arith.constant 0 : index
    %c0_141 = arith.constant 0 : index
    %350 = vector.load %arg17[%c0_140, %c0_141] : memref<4x8xf32, #tpu.memory_space<vmem>>, vector<4x8xf32>
    %cst_142 = arith.constant dense<0.000000e+00> : vector<40x8xf32>
    %351 = tpu.matmul %45, %350, %cst_142 {dimension_numbers = #tpu.dot_dimension_numbers<[1], [0], [0], [1], [0, 0, 1, 1], [], []>} : vector<40x4xf32>, vector<4x8xf32>, vector<40x8xf32> -> vector<40x8xf32>
    %352 = arith.mulf %339, %349 : vector<40x8xf32>
    %353 = arith.addf %352, %351 : vector<40x8xf32>
    %c0_143 = arith.constant 0 : index
    %c0_144 = arith.constant 0 : index
    %354 = vector.load %arg11[%c0_143, %c0_144] : memref<8x8xf32, #tpu.memory_space<vmem>>, vector<8x8xf32>
    %cst_145 = arith.constant dense<0.000000e+00> : vector<40x8xf32>
    %355 = tpu.matmul %353, %354, %cst_145 {dimension_numbers = #tpu.dot_dimension_numbers<[1], [0], [0], [1], [0, 0, 1, 1], [], []>} : vector<40x8xf32>, vector<8x8xf32>, vector<40x8xf32> -> vector<40x8xf32>
    %c0_146 = arith.constant 0 : index
    %c0_147 = arith.constant 0 : index
    %356 = vector.load %arg12[%c0_146, %c0_147] : memref<1x8xf32, #tpu.memory_space<vmem>>, vector<1x8xf32>
    %357 = vector.broadcast %356 : vector<1x8xf32> to vector<40x8xf32>
    %358 = arith.addf %355, %357 : vector<40x8xf32>
    %c0_148 = arith.constant 0 : index
    %c0_149 = arith.constant 0 : index
    %359 = vector.load %arg13[%c0_148, %c0_149] : memref<8x2176xf32, #tpu.memory_space<vmem>>, vector<8x2176xf32>
    %cst_150 = arith.constant dense<0.000000e+00> : vector<40x2176xf32>
    %360 = tpu.matmul %353, %359, %cst_150 {dimension_numbers = #tpu.dot_dimension_numbers<[1], [0], [0], [1], [0, 0, 1, 1], [], []>} : vector<40x8xf32>, vector<8x2176xf32>, vector<40x2176xf32> -> vector<40x2176xf32>
    %c0_i32_151 = arith.constant 0 : i32
    %361 = vector.broadcast %c0_i32_151 : i32 to vector<40x40xi32>
    %362 = arith.cmpi eq, %13, %361 : vector<40x40xi32>
    %cst_152 = arith.constant 0.000000e+00 : f32
    %363 = vector.broadcast %cst_152 : f32 to vector<40x40xf32>
    %364 = arith.select %362, %12, %363 : vector<40x40xi1>, vector<40x40xf32>
    %365 = vector.extract_strided_slice %360 {offsets = [0, 0], sizes = [40, 8], strides = [1, 1]} : vector<40x2176xf32> to vector<40x8xf32>
    %cst_153 = arith.constant dense<0.000000e+00> : vector<40x8xf32>
    %366 = tpu.matmul %364, %365, %cst_153 {dimension_numbers = #tpu.dot_dimension_numbers<[1], [0], [0], [1], [0, 0, 1, 1], [], []>} : vector<40x40xf32>, vector<40x8xf32>, vector<40x8xf32> -> vector<40x8xf32>
    %367 = arith.addf %358, %366 : vector<40x8xf32>
    %c1_i32_154 = arith.constant 1 : i32
    %368 = vector.broadcast %c1_i32_154 : i32 to vector<40x40xi32>
    %369 = arith.cmpi eq, %13, %368 : vector<40x40xi32>
    %cst_155 = arith.constant 0.000000e+00 : f32
    %370 = vector.broadcast %cst_155 : f32 to vector<40x40xf32>
    %371 = arith.select %369, %12, %370 : vector<40x40xi1>, vector<40x40xf32>
    %372 = vector.extract_strided_slice %360 {offsets = [0, 128], sizes = [40, 8], strides = [1, 1]} : vector<40x2176xf32> to vector<40x8xf32>
    %cst_156 = arith.constant dense<0.000000e+00> : vector<40x8xf32>
    %373 = tpu.matmul %371, %372, %cst_156 {dimension_numbers = #tpu.dot_dimension_numbers<[1], [0], [0], [1], [0, 0, 1, 1], [], []>} : vector<40x40xf32>, vector<40x8xf32>, vector<40x8xf32> -> vector<40x8xf32>
    %374 = arith.addf %367, %373 : vector<40x8xf32>
    %c2_i32_157 = arith.constant 2 : i32
    %375 = vector.broadcast %c2_i32_157 : i32 to vector<40x40xi32>
    %376 = arith.cmpi eq, %13, %375 : vector<40x40xi32>
    %cst_158 = arith.constant 0.000000e+00 : f32
    %377 = vector.broadcast %cst_158 : f32 to vector<40x40xf32>
    %378 = arith.select %376, %12, %377 : vector<40x40xi1>, vector<40x40xf32>
    %379 = vector.extract_strided_slice %360 {offsets = [0, 256], sizes = [40, 8], strides = [1, 1]} : vector<40x2176xf32> to vector<40x8xf32>
    %cst_159 = arith.constant dense<0.000000e+00> : vector<40x8xf32>
    %380 = tpu.matmul %378, %379, %cst_159 {dimension_numbers = #tpu.dot_dimension_numbers<[1], [0], [0], [1], [0, 0, 1, 1], [], []>} : vector<40x40xf32>, vector<40x8xf32>, vector<40x8xf32> -> vector<40x8xf32>
    %381 = arith.addf %374, %380 : vector<40x8xf32>
    %c3_i32_160 = arith.constant 3 : i32
    %382 = vector.broadcast %c3_i32_160 : i32 to vector<40x40xi32>
    %383 = arith.cmpi eq, %13, %382 : vector<40x40xi32>
    %cst_161 = arith.constant 0.000000e+00 : f32
    %384 = vector.broadcast %cst_161 : f32 to vector<40x40xf32>
    %385 = arith.select %383, %12, %384 : vector<40x40xi1>, vector<40x40xf32>
    %386 = vector.extract_strided_slice %360 {offsets = [0, 384], sizes = [40, 8], strides = [1, 1]} : vector<40x2176xf32> to vector<40x8xf32>
    %cst_162 = arith.constant dense<0.000000e+00> : vector<40x8xf32>
    %387 = tpu.matmul %385, %386, %cst_162 {dimension_numbers = #tpu.dot_dimension_numbers<[1], [0], [0], [1], [0, 0, 1, 1], [], []>} : vector<40x40xf32>, vector<40x8xf32>, vector<40x8xf32> -> vector<40x8xf32>
    %388 = arith.addf %381, %387 : vector<40x8xf32>
    %c4_i32_163 = arith.constant 4 : i32
    %389 = vector.broadcast %c4_i32_163 : i32 to vector<40x40xi32>
    %390 = arith.cmpi eq, %13, %389 : vector<40x40xi32>
    %cst_164 = arith.constant 0.000000e+00 : f32
    %391 = vector.broadcast %cst_164 : f32 to vector<40x40xf32>
    %392 = arith.select %390, %12, %391 : vector<40x40xi1>, vector<40x40xf32>
    %393 = vector.extract_strided_slice %360 {offsets = [0, 512], sizes = [40, 8], strides = [1, 1]} : vector<40x2176xf32> to vector<40x8xf32>
    %cst_165 = arith.constant dense<0.000000e+00> : vector<40x8xf32>
    %394 = tpu.matmul %392, %393, %cst_165 {dimension_numbers = #tpu.dot_dimension_numbers<[1], [0], [0], [1], [0, 0, 1, 1], [], []>} : vector<40x40xf32>, vector<40x8xf32>, vector<40x8xf32> -> vector<40x8xf32>
    %395 = arith.addf %388, %394 : vector<40x8xf32>
    %c5_i32_166 = arith.constant 5 : i32
    %396 = vector.broadcast %c5_i32_166 : i32 to vector<40x40xi32>
    %397 = arith.cmpi eq, %13, %396 : vector<40x40xi32>
    %cst_167 = arith.constant 0.000000e+00 : f32
    %398 = vector.broadcast %cst_167 : f32 to vector<40x40xf32>
    %399 = arith.select %397, %12, %398 : vector<40x40xi1>, vector<40x40xf32>
    %400 = vector.extract_strided_slice %360 {offsets = [0, 640], sizes = [40, 8], strides = [1, 1]} : vector<40x2176xf32> to vector<40x8xf32>
    %cst_168 = arith.constant dense<0.000000e+00> : vector<40x8xf32>
    %401 = tpu.matmul %399, %400, %cst_168 {dimension_numbers = #tpu.dot_dimension_numbers<[1], [0], [0], [1], [0, 0, 1, 1], [], []>} : vector<40x40xf32>, vector<40x8xf32>, vector<40x8xf32> -> vector<40x8xf32>
    %402 = arith.addf %395, %401 : vector<40x8xf32>
    %c6_i32_169 = arith.constant 6 : i32
    %403 = vector.broadcast %c6_i32_169 : i32 to vector<40x40xi32>
    %404 = arith.cmpi eq, %13, %403 : vector<40x40xi32>
    %cst_170 = arith.constant 0.000000e+00 : f32
    %405 = vector.broadcast %cst_170 : f32 to vector<40x40xf32>
    %406 = arith.select %404, %12, %405 : vector<40x40xi1>, vector<40x40xf32>
    %407 = vector.extract_strided_slice %360 {offsets = [0, 768], sizes = [40, 8], strides = [1, 1]} : vector<40x2176xf32> to vector<40x8xf32>
    %cst_171 = arith.constant dense<0.000000e+00> : vector<40x8xf32>
    %408 = tpu.matmul %406, %407, %cst_171 {dimension_numbers = #tpu.dot_dimension_numbers<[1], [0], [0], [1], [0, 0, 1, 1], [], []>} : vector<40x40xf32>, vector<40x8xf32>, vector<40x8xf32> -> vector<40x8xf32>
    %409 = arith.addf %402, %408 : vector<40x8xf32>
    %c7_i32_172 = arith.constant 7 : i32
    %410 = vector.broadcast %c7_i32_172 : i32 to vector<40x40xi32>
    %411 = arith.cmpi eq, %13, %410 : vector<40x40xi32>
    %cst_173 = arith.constant 0.000000e+00 : f32
    %412 = vector.broadcast %cst_173 : f32 to vector<40x40xf32>
    %413 = arith.select %411, %12, %412 : vector<40x40xi1>, vector<40x40xf32>
    %414 = vector.extract_strided_slice %360 {offsets = [0, 896], sizes = [40, 8], strides = [1, 1]} : vector<40x2176xf32> to vector<40x8xf32>
    %cst_174 = arith.constant dense<0.000000e+00> : vector<40x8xf32>
    %415 = tpu.matmul %413, %414, %cst_174 {dimension_numbers = #tpu.dot_dimension_numbers<[1], [0], [0], [1], [0, 0, 1, 1], [], []>} : vector<40x40xf32>, vector<40x8xf32>, vector<40x8xf32> -> vector<40x8xf32>
    %416 = arith.addf %409, %415 : vector<40x8xf32>
    %c8_i32_175 = arith.constant 8 : i32
    %417 = vector.broadcast %c8_i32_175 : i32 to vector<40x40xi32>
    %418 = arith.cmpi eq, %13, %417 : vector<40x40xi32>
    %cst_176 = arith.constant 0.000000e+00 : f32
    %419 = vector.broadcast %cst_176 : f32 to vector<40x40xf32>
    %420 = arith.select %418, %12, %419 : vector<40x40xi1>, vector<40x40xf32>
    %421 = vector.extract_strided_slice %360 {offsets = [0, 1024], sizes = [40, 8], strides = [1, 1]} : vector<40x2176xf32> to vector<40x8xf32>
    %cst_177 = arith.constant dense<0.000000e+00> : vector<40x8xf32>
    %422 = tpu.matmul %420, %421, %cst_177 {dimension_numbers = #tpu.dot_dimension_numbers<[1], [0], [0], [1], [0, 0, 1, 1], [], []>} : vector<40x40xf32>, vector<40x8xf32>, vector<40x8xf32> -> vector<40x8xf32>
    %423 = arith.addf %416, %422 : vector<40x8xf32>
    %c9_i32_178 = arith.constant 9 : i32
    %424 = vector.broadcast %c9_i32_178 : i32 to vector<40x40xi32>
    %425 = arith.cmpi eq, %13, %424 : vector<40x40xi32>
    %cst_179 = arith.constant 0.000000e+00 : f32
    %426 = vector.broadcast %cst_179 : f32 to vector<40x40xf32>
    %427 = arith.select %425, %12, %426 : vector<40x40xi1>, vector<40x40xf32>
    %428 = vector.extract_strided_slice %360 {offsets = [0, 1152], sizes = [40, 8], strides = [1, 1]} : vector<40x2176xf32> to vector<40x8xf32>
    %cst_180 = arith.constant dense<0.000000e+00> : vector<40x8xf32>
    %429 = tpu.matmul %427, %428, %cst_180 {dimension_numbers = #tpu.dot_dimension_numbers<[1], [0], [0], [1], [0, 0, 1, 1], [], []>} : vector<40x40xf32>, vector<40x8xf32>, vector<40x8xf32> -> vector<40x8xf32>
    %430 = arith.addf %423, %429 : vector<40x8xf32>
    %c10_i32_181 = arith.constant 10 : i32
    %431 = vector.broadcast %c10_i32_181 : i32 to vector<40x40xi32>
    %432 = arith.cmpi eq, %13, %431 : vector<40x40xi32>
    %cst_182 = arith.constant 0.000000e+00 : f32
    %433 = vector.broadcast %cst_182 : f32 to vector<40x40xf32>
    %434 = arith.select %432, %12, %433 : vector<40x40xi1>, vector<40x40xf32>
    %435 = vector.extract_strided_slice %360 {offsets = [0, 1280], sizes = [40, 8], strides = [1, 1]} : vector<40x2176xf32> to vector<40x8xf32>
    %cst_183 = arith.constant dense<0.000000e+00> : vector<40x8xf32>
    %436 = tpu.matmul %434, %435, %cst_183 {dimension_numbers = #tpu.dot_dimension_numbers<[1], [0], [0], [1], [0, 0, 1, 1], [], []>} : vector<40x40xf32>, vector<40x8xf32>, vector<40x8xf32> -> vector<40x8xf32>
    %437 = arith.addf %430, %436 : vector<40x8xf32>
    %c11_i32_184 = arith.constant 11 : i32
    %438 = vector.broadcast %c11_i32_184 : i32 to vector<40x40xi32>
    %439 = arith.cmpi eq, %13, %438 : vector<40x40xi32>
    %cst_185 = arith.constant 0.000000e+00 : f32
    %440 = vector.broadcast %cst_185 : f32 to vector<40x40xf32>
    %441 = arith.select %439, %12, %440 : vector<40x40xi1>, vector<40x40xf32>
    %442 = vector.extract_strided_slice %360 {offsets = [0, 1408], sizes = [40, 8], strides = [1, 1]} : vector<40x2176xf32> to vector<40x8xf32>
    %cst_186 = arith.constant dense<0.000000e+00> : vector<40x8xf32>
    %443 = tpu.matmul %441, %442, %cst_186 {dimension_numbers = #tpu.dot_dimension_numbers<[1], [0], [0], [1], [0, 0, 1, 1], [], []>} : vector<40x40xf32>, vector<40x8xf32>, vector<40x8xf32> -> vector<40x8xf32>
    %444 = arith.addf %437, %443 : vector<40x8xf32>
    %c12_i32_187 = arith.constant 12 : i32
    %445 = vector.broadcast %c12_i32_187 : i32 to vector<40x40xi32>
    %446 = arith.cmpi eq, %13, %445 : vector<40x40xi32>
    %cst_188 = arith.constant 0.000000e+00 : f32
    %447 = vector.broadcast %cst_188 : f32 to vector<40x40xf32>
    %448 = arith.select %446, %12, %447 : vector<40x40xi1>, vector<40x40xf32>
    %449 = vector.extract_strided_slice %360 {offsets = [0, 1536], sizes = [40, 8], strides = [1, 1]} : vector<40x2176xf32> to vector<40x8xf32>
    %cst_189 = arith.constant dense<0.000000e+00> : vector<40x8xf32>
    %450 = tpu.matmul %448, %449, %cst_189 {dimension_numbers = #tpu.dot_dimension_numbers<[1], [0], [0], [1], [0, 0, 1, 1], [], []>} : vector<40x40xf32>, vector<40x8xf32>, vector<40x8xf32> -> vector<40x8xf32>
    %451 = arith.addf %444, %450 : vector<40x8xf32>
    %c13_i32_190 = arith.constant 13 : i32
    %452 = vector.broadcast %c13_i32_190 : i32 to vector<40x40xi32>
    %453 = arith.cmpi eq, %13, %452 : vector<40x40xi32>
    %cst_191 = arith.constant 0.000000e+00 : f32
    %454 = vector.broadcast %cst_191 : f32 to vector<40x40xf32>
    %455 = arith.select %453, %12, %454 : vector<40x40xi1>, vector<40x40xf32>
    %456 = vector.extract_strided_slice %360 {offsets = [0, 1664], sizes = [40, 8], strides = [1, 1]} : vector<40x2176xf32> to vector<40x8xf32>
    %cst_192 = arith.constant dense<0.000000e+00> : vector<40x8xf32>
    %457 = tpu.matmul %455, %456, %cst_192 {dimension_numbers = #tpu.dot_dimension_numbers<[1], [0], [0], [1], [0, 0, 1, 1], [], []>} : vector<40x40xf32>, vector<40x8xf32>, vector<40x8xf32> -> vector<40x8xf32>
    %458 = arith.addf %451, %457 : vector<40x8xf32>
    %c14_i32_193 = arith.constant 14 : i32
    %459 = vector.broadcast %c14_i32_193 : i32 to vector<40x40xi32>
    %460 = arith.cmpi eq, %13, %459 : vector<40x40xi32>
    %cst_194 = arith.constant 0.000000e+00 : f32
    %461 = vector.broadcast %cst_194 : f32 to vector<40x40xf32>
    %462 = arith.select %460, %12, %461 : vector<40x40xi1>, vector<40x40xf32>
    %463 = vector.extract_strided_slice %360 {offsets = [0, 1792], sizes = [40, 8], strides = [1, 1]} : vector<40x2176xf32> to vector<40x8xf32>
    %cst_195 = arith.constant dense<0.000000e+00> : vector<40x8xf32>
    %464 = tpu.matmul %462, %463, %cst_195 {dimension_numbers = #tpu.dot_dimension_numbers<[1], [0], [0], [1], [0, 0, 1, 1], [], []>} : vector<40x40xf32>, vector<40x8xf32>, vector<40x8xf32> -> vector<40x8xf32>
    %465 = arith.addf %458, %464 : vector<40x8xf32>
    %c15_i32_196 = arith.constant 15 : i32
    %466 = vector.broadcast %c15_i32_196 : i32 to vector<40x40xi32>
    %467 = arith.cmpi eq, %13, %466 : vector<40x40xi32>
    %cst_197 = arith.constant 0.000000e+00 : f32
    %468 = vector.broadcast %cst_197 : f32 to vector<40x40xf32>
    %469 = arith.select %467, %12, %468 : vector<40x40xi1>, vector<40x40xf32>
    %470 = vector.extract_strided_slice %360 {offsets = [0, 1920], sizes = [40, 8], strides = [1, 1]} : vector<40x2176xf32> to vector<40x8xf32>
    %cst_198 = arith.constant dense<0.000000e+00> : vector<40x8xf32>
    %471 = tpu.matmul %469, %470, %cst_198 {dimension_numbers = #tpu.dot_dimension_numbers<[1], [0], [0], [1], [0, 0, 1, 1], [], []>} : vector<40x40xf32>, vector<40x8xf32>, vector<40x8xf32> -> vector<40x8xf32>
    %472 = arith.addf %465, %471 : vector<40x8xf32>
    %c16_i32_199 = arith.constant 16 : i32
    %473 = vector.broadcast %c16_i32_199 : i32 to vector<40x40xi32>
    %474 = arith.cmpi eq, %13, %473 : vector<40x40xi32>
    %cst_200 = arith.constant 0.000000e+00 : f32
    %475 = vector.broadcast %cst_200 : f32 to vector<40x40xf32>
    %476 = arith.select %474, %12, %475 : vector<40x40xi1>, vector<40x40xf32>
    %477 = vector.extract_strided_slice %360 {offsets = [0, 2048], sizes = [40, 8], strides = [1, 1]} : vector<40x2176xf32> to vector<40x8xf32>
    %cst_201 = arith.constant dense<0.000000e+00> : vector<40x8xf32>
    %478 = tpu.matmul %476, %477, %cst_201 {dimension_numbers = #tpu.dot_dimension_numbers<[1], [0], [0], [1], [0, 0, 1, 1], [], []>} : vector<40x40xf32>, vector<40x8xf32>, vector<40x8xf32> -> vector<40x8xf32>
    %479 = arith.addf %472, %478 : vector<40x8xf32>
    %cst_202 = arith.constant dense<0.000000e+00> : vector<4x8xf32>
    %480 = tpu.matmul %29, %479, %cst_202 {dimension_numbers = #tpu.dot_dimension_numbers<[1], [0], [0], [1], [0, 0, 1, 1], [], []>} : vector<4x40xf32>, vector<40x8xf32>, vector<4x8xf32> -> vector<4x8xf32>
    %481 = vector.broadcast %51 : vector<4x1xf32> to vector<4x8xf32>
    %482 = arith.mulf %480, %481 : vector<4x8xf32>
    %cst_203 = arith.constant dense<0.000000e+00> : vector<40x8xf32>
    %483 = tpu.matmul %45, %482, %cst_203 {dimension_numbers = #tpu.dot_dimension_numbers<[1], [0], [0], [1], [0, 0, 1, 1], [], []>} : vector<40x4xf32>, vector<4x8xf32>, vector<40x8xf32> -> vector<40x8xf32>
    %484 = arith.subf %479, %483 : vector<40x8xf32>
    %485 = arith.mulf %484, %484 : vector<40x8xf32>
    %cst_204 = arith.constant dense<0.000000e+00> : vector<4x8xf32>
    %486 = tpu.matmul %29, %485, %cst_204 {dimension_numbers = #tpu.dot_dimension_numbers<[1], [0], [0], [1], [0, 0, 1, 1], [], []>} : vector<4x40xf32>, vector<40x8xf32>, vector<4x8xf32> -> vector<4x8xf32>
    %487 = vector.broadcast %51 : vector<4x1xf32> to vector<4x8xf32>
    %488 = arith.mulf %486, %487 : vector<4x8xf32>
    %cst_205 = arith.constant 9.99999974E-6 : f32
    %489 = vector.broadcast %cst_205 : f32 to vector<4x8xf32>
    %490 = arith.addf %488, %489 : vector<4x8xf32>
    %491 = math.rsqrt %490 : vector<4x8xf32>
    %c0_206 = arith.constant 0 : index
    %c0_207 = arith.constant 0 : index
    %492 = vector.load %arg18[%c0_206, %c0_207] : memref<4x8xf32, #tpu.memory_space<vmem>>, vector<4x8xf32>
    %493 = arith.mulf %491, %492 : vector<4x8xf32>
    %cst_208 = arith.constant dense<0.000000e+00> : vector<40x8xf32>
    %494 = tpu.matmul %45, %493, %cst_208 {dimension_numbers = #tpu.dot_dimension_numbers<[1], [0], [0], [1], [0, 0, 1, 1], [], []>} : vector<40x4xf32>, vector<4x8xf32>, vector<40x8xf32> -> vector<40x8xf32>
    %c0_209 = arith.constant 0 : index
    %c0_210 = arith.constant 0 : index
    %495 = vector.load %arg19[%c0_209, %c0_210] : memref<4x8xf32, #tpu.memory_space<vmem>>, vector<4x8xf32>
    %cst_211 = arith.constant dense<0.000000e+00> : vector<40x8xf32>
    %496 = tpu.matmul %45, %495, %cst_211 {dimension_numbers = #tpu.dot_dimension_numbers<[1], [0], [0], [1], [0, 0, 1, 1], [], []>} : vector<40x4xf32>, vector<4x8xf32>, vector<40x8xf32> -> vector<40x8xf32>
    %497 = arith.mulf %484, %494 : vector<40x8xf32>
    %498 = arith.addf %497, %496 : vector<40x8xf32>
    %c0_212 = arith.constant 0 : index
    %c0_213 = arith.constant 0 : index
    %499 = vector.load %arg20[%c0_212, %c0_213] : memref<40x8xf32, #tpu.memory_space<vmem>>, vector<40x8xf32>
    tpu.vector_store %arg20[%c0_212, %c0_213], %498 {strides = array<i32>} : memref<40x8xf32, #tpu.memory_space<vmem>>, vector<40x8xf32>,
    return
  }
}

</mosaic_0001>

<bundles_post_ra>
// kernel: ctd_encoder_forward.1
= control target key start
LH: loop header
LB: loop body
LE: loop exit
PB: predicated region body
PF: predicated region fallthrough
CT: control target
= control target key end

     0   :  { %v17221_v0 = vmov 0.0|0.0   ;;  %vm13603_vm0 = vmmov 0   ;;  %v17226_v3 = vmov 0.0   ;;  %vm261_vm1 = vcmask 130048   ;;  %s17196_s3 = inlined_call_operand.vmem [shape: f32[16,8], index: 3, kind: input, shape index: {}]   ;;  %s17197_s0 = inlined_call_operand.vmem [shape: f32[40,16], index: 0, kind: input, shape index: {}]   ;;  %s17198_s5 = inlined_call_operand.vmem [shape: f32[8,8], index: 5, kind: input, shape index: {}]   ;;  %s17199_s7 = inlined_call_operand.vmem [shape: f32[8,2176], index: 7, kind: input, shape index: {}]   ;;  %s17200_s1 = inlined_call_operand.vmem [shape: f32[40,40], index: 1, kind: input, shape index: {}]   ;;  %s17201_s4 = inlined_call_operand.vmem [shape: f32[1,8], index: 4, kind: input, shape index: {}]   ;;  %s17202_s2 = inlined_call_operand.vmem [shape: s32[40,40], index: 2, kind: input, shape index: {}]   ;;  %s17203_s6 = inlined_call_operand.vmem [shape: f32[1,8], index: 6, kind: input, shape index: {}]   ;;  %s17204_s14 = inlined_call_operand.vmem [shape: f32[4,8], index: 14, kind: input, shape index: {}]   ;;  %s17205_s15 = inlined_call_operand.vmem [shape: f32[4,8], index: 15, kind: input, shape index: {}]   ;;  %s17206_s8 = inlined_call_operand.vmem [shape: f32[8,8], index: 8, kind: input, shape index: {}]   ;;  %s17207_s10 = inlined_call_operand.vmem [shape: f32[8,2176], index: 10, kind: input, shape index: {}]   ;;  %s17208_s9 = inlined_call_operand.vmem [shape: f32[1,8], index: 9, kind: input, shape index: {}]   ;;  %s17209_s16 = inlined_call_operand.vmem [shape: f32[4,8], index: 16, kind: input, shape index: {}]   ;;  %s17210_s17 = inlined_call_operand.vmem [shape: f32[4,8], index: 17, kind: input, shape index: {}]   ;;  %s17211_s11 = inlined_call_operand.vmem [shape: f32[8,8], index: 11, kind: input, shape index: {}]   ;;  %s17212_s13 = inlined_call_operand.vmem [shape: f32[8,2176], index: 13, kind: input, shape index: {}]   ;;  %s17213_s12 = inlined_call_operand.vmem [shape: f32[1,8], index: 12, kind: input, shape index: {}]   ;;  %s17214_s18 = inlined_call_operand.vmem [shape: f32[4,8], index: 18, kind: input, shape index: {}]   ;;  %s17215_s19 = inlined_call_operand.vmem [shape: f32[4,8], index: 19, kind: input, shape index: {}]   ;;  %s17216_s20 = inlined_call_operand.vmem [shape: f32[40,8], index: 20, kind: output, shape index: {}]  }
   0x1   :  { %17360 = sst [smem:[#allocation78_spill]] %s17196_s3  ;;  %12715 = vmatprep.subr.bf16.mxu0 %v17221_v0  ;;  %11092 = vmatprep.mubr.msk.f32.mxu0 %vm13603_vm0, %v17226_v3  ;;  %vm70_vm2 = vcmask 326656   ;;  %v9971_v23 = vld [vmem:[%s17201_s4] ss:$0 sm:$0xff]  ;;  %vm380_vm3 = vcmask 64512   ;;  %v111_v54 = vlaneseq  ;;  %vm122_vm7 = vcmask 130112  }
   0x2   :  { %17361 = sst [smem:[#allocation79_spill]] %s17197_s0  ;;  %s17365_s23 = sld [smem:[#allocation78_spill]]  ;;  %11124 = vmatprep.subr.mxu1 %v17226_v3  ;;  %11126 = vmatprep.mubr.msk.f32.mxu1 %vm13603_vm0, %v17226_v3  ;;  %vm129_vm9 = vcmask 195712   ;;  %vm136_vm11 = vcmask 261312   ;;  %vm143_vm12 = vcmask 326912  }
   0x3   :  { %17362 = sst [smem:[#allocation80_spill]] %s17198_s5  ;;  %s17366_s26 = sld [smem:[#allocation79_spill]]  ;;  %v13949_v59 = vand.u32 127, %v111_v54  ;;  %v13952_v61 = vshrl.u32 %v111_v54, 7 }
   0x4   :  { %17363 = sst [smem:[#allocation81_spill]] %s17199_s7 }
   0x5   :  { %17364 = sst [smem:[#allocation82_spill]] %s17200_s1  ;;  %s17367_s1 = sld [smem:[#allocation80_spill]]  ;;  %17370 = vst [vmem:[#allocation2_spill] sm:$0xff] %v13949_v59  ;;  %17371 = vst [vmem:[#allocation3_spill] sm:$0xff] %v13952_v61  ;;  %v124_v63 = vadd.s32 4294967280, %v13949_v59 }
   0x6   :  { %s17368_s7 = sld [smem:[#allocation81_spill]]  ;;  %s17369_s29 = sld [smem:[#allocation82_spill]] }
   0x8   :  { %v252_v1 = vld [vmem:[%s17365_s23] sm:$0xff]  ;;  %v253_v2 = vld [vmem:[%s17365_s23 + $0x8] sm:$0xff] }
   0x9   :  { %v12716_v4 = vpack.c.bf16 %v253_v2, %v252_v1  ;;  %v247_v5 = vld [vmem:[%s17366_s26] sm:$0xff]  ;;  %v248_v7 = vld [vmem:[%s17366_s26 + $0x8] sm:$0xff]  ;;  %v249_v8 = vld [vmem:[%s17366_s26 + $0x10] sm:$0xff]  ;;  %v117_v2 = vadd.s32 4294967288, %v13949_v59 }
   0xa   :  { %v250_v9 = vld [vmem:[%s17366_s26 + $0x18] sm:$0xff]  ;;  %v251_v10 = vld [vmem:[%s17366_s26 + $0x20] sm:$0xff] }
   0xb   :  { %12717 = vmatpush3.bf16.msra.mxu0 %v12716_v4  ;;  %v372_v6 = vld [vmem:[%s17367_s1] sm:$0xff] }
   0xc   :  { %11107 = vmatprep.subr.mxu0 %v17226_v3  ;;  %v502_v11 = vld [vmem:[%s17368_s7 + $0x80] sm:$0xff]  ;;  %v487_v12 = vld [vmem:[%s17368_s7 + $0x8] sm:$0xff]  ;;  %v13774_v15 = vld [vmem:[%s17369_s29 + $0x10] sm:$0xff] }
   0xd   :  { %11125 = vmatpush3.msra.mxu1 %v502_v11  ;;  %v13767_v13 = vld [vmem:[%s17369_s29] sm:$0xff]  ;;  %v13779_v16 = vld [vmem:[%s17369_s29 + $0x8] sm:$0xff]  ;;  %v77_v17 = vsel %vm70_vm2, %v13774_v15, 0.0  ;;  %v13788_v19 = vld [vmem:[%s17369_s29 + $0x18] sm:$0xff] }
   0xe   :  { %11093 = vmatmul.mubr.msk.f32.vlgmr.msra.gmra.mrb[0].mxu0 %vm261_vm1, %v247_v5  ;;  %12730 = vmatprep.subr.bf16.mxu1 %v17221_v0  ;;  %v71_v14 = vsel %vm70_vm2, %v13767_v13, 0.0  ;;  %v74_v18 = vsel %vm70_vm2, %v13779_v16, 0.0  ;;  %v13793_v20 = vld [vmem:[%s17369_s29 + $0x20] sm:$0xff]  ;;  %v80_v21 = vsel %vm70_vm2, %v13788_v19, 0.0  ;;  %v489_v32 = vld [vmem:[%s17368_s7 + $0x18] sm:$0xff]  ;;  %v488_v46 = vld [vmem:[%s17368_s7 + $0x10] sm:$0xff]  ;;  %v115_v5 = vsub.s32 %v13949_v59, %v13952_v61 }
   0xf   :  { %11095 = vmatprep.mubr.msk.f32.mxu0 %vm13603_vm0, %v17226_v3  ;;  %11108 = vmatpush3.msra.mxu0 %v372_v6  ;;  %v83_v22 = vsel %vm70_vm2, %v13793_v20, 0.0  ;;  %v486_v29 = vld [vmem:[%s17368_s7] sm:$0xff]  ;;  %v491_v47 = vld [vmem:[%s17368_s7 + $0x28] sm:$0xff]  ;;  %v493_v49 = vld [vmem:[%s17368_s7 + $0x38] sm:$0xff] }
  0x10   :  { %503 = vmatprep.subr.mxu0 %v487_v12  ;;  %72 = vadd.xlane.f32.xlu0 %v71_v14  ;;  %v490_v48 = vld [vmem:[%s17368_s7 + $0x20] sm:$0xff]  ;;  %v492_v50 = vld [vmem:[%s17368_s7 + $0x30] sm:$0xff]  ;;  %v495_v51 = vld [vmem:[%s17368_s7 + $0x48] sm:$0xff] }
  0x11   :  { %78 = vadd.xlane.f32.xlu1 %v77_v17  ;;  %v494_v52 = vld [vmem:[%s17368_s7 + $0x40] sm:$0xff]  ;;  %v497_v53 = vld [vmem:[%s17368_s7 + $0x58] sm:$0xff]  ;;  %v496_v56 = vld [vmem:[%s17368_s7 + $0x50] sm:$0xff] }
  0x12   :  { %11096 = vmatmul.mubr.msk.f32.gmra.mrb[2].mxu0 %vm261_vm1, %v248_v7  ;;  %v499_v57 = vld [vmem:[%s17368_s7 + $0x68] sm:$0xff]  ;;  %v127_v7 = vsub.s32 %v124_v63, %v13952_v61 }
  0x13   :  { %11098 = vmatprep.mubr.msk.f32.mxu0 %vm13603_vm0, %v17226_v3 }
  0x14   :  { %75 = vadd.xlane.f32.xlu0 %v74_v18 }
  0x15   :  { %81 = vadd.xlane.f32.xlu1 %v80_v21 }
  0x16   :  { %11099 = vmatmul.mubr.msk.f32.gmra.mrb[4].mxu0 %vm261_vm1, %v249_v8  ;;  %v131_v8 = vadd.s32 4294967272, %v13949_v59 }
  0x17   :  { %11101 = vmatprep.mubr.msk.f32.mxu0 %vm13603_vm0, %v17226_v3 }
  0x18   :  { %84 = vadd.xlane.f32.xlu0 %v83_v22  ;;  %v134_v22 = vsub.s32 %v131_v8, %v13952_v61 }
  0x1a   :  { %11102 = vmatmul.mubr.msk.f32.gmra.mrb[6].mxu0 %vm261_vm1, %v250_v9  ;;  %v120_v9 = vsub.s32 %v117_v2, %v13952_v61 }
  0x1b   :  { %11104 = vmatprep.mubr.msk.f32.mxu0 %vm13603_vm0, %v17226_v3 }
  0x1e   :  { %11105 = vmatmul.mubr.msk.f32.gmra.mrb[8].mxu0 %vm261_vm1, %v251_v10  ;;  %v138_v10 = vadd.s32 4294967264, %v13949_v59 }
  0x1f   :  { %11109 = vmatprep.mubr.msk.f32.mxu0 %vm13603_vm0, %v17226_v3 }
  0x9d   :  { %v73_v55 = vpop.xlane.xlu0 %72 }
  0x9e   :  { %13584 = vrsqrt.f32 %v73_v55  ;;  %v79_v58 = vpop.xlane.xlu1 %78  ;;  %vm86_vm4 = vcmp.gt.f32.partialorder %v73_v55, 0.0 }
  0x9f   :  { %13586 = vrsqrt.f32 %v79_v58  ;;  %vm88_vm5 = vcmp.gt.f32.partialorder %v79_v58, 0.0  ;;  %v500_v58 = vld [vmem:[%s17368_s7 + $0x70] sm:$0xff] }
  0xa1   :  { %v76_v60 = vpop.xlane.xlu0 %75 }
  0xa2   :  { %13588 = vrsqrt.f32 %v76_v60  ;;  %v82_v62 = vpop.xlane.xlu1 %81  ;;  %vm87_vm6 = vcmp.gt.f32.partialorder %v76_v60, 0.0 }
  0xa3   :  { %13590 = vrsqrt.f32 %v82_v62  ;;  %vm89_vm8 = vcmp.gt.f32.partialorder %v82_v62, 0.0 }
  0xa5   :  { %v85_v1 = vpop.xlane.xlu0 %84 }
  0xa6   :  { %13592 = vrsqrt.f32 %v85_v1  ;;  %vm90_vm10 = vcmp.gt.f32.partialorder %v85_v1, 0.0 }
  0xa8   :  { %v13585_v4 = vpop.eup %13584 }
  0xa9   :  { %v96_v6 = vsel %vm86_vm4, %v13585_v4, 0.0  ;;  %v13587_v11 = vpop.eup %13586 }
  0xaa   :  { %v116_v14 = vrot.slane %v96_v6, %v115_v5  ;;  %v98_v17 = vsel %vm88_vm5, %v13587_v11, 0.0 }
  0xab   :  { %v128_v18 = vrot.slane %v98_v17, %v127_v7 }
  0xac   :  { %v13589_v12 = vpop.eup %13588 }
  0xad   :  { %v97_v21 = vsel %vm87_vm6, %v13589_v12, 0.0 }
  0xe1   :  { %v343_v24 = vpop.f32.mrb[0].mxu0 }
  0xe2   :  { %v344_v25 = vadd.f32 %v9971_v23, %v343_v24  ;;  %v11094_v26 = vpop.f32.mrb[1].mxu0  ;;  %v141_v24 = vsub.s32 %v138_v10, %v13952_v61 }
  0xe4   :  { %v13802_v27 = vmax.f32 %v344_v25, 0.0  ;;  %v13591_v25 = vpop.eup %13590 }
  0xe5   :  { %v348_v28 = vpop.f32.mrb[2].mxu0  ;;  %v13593_v26 = vpop.eup %13592 }
  0xe6   :  { %v349_v30 = vadd.f32 %v9971_v23, %v348_v28  ;;  %v11097_v31 = vpop.f32.mrb[3].mxu0  ;;  %11110 = vmatmul.mubr.msk.f32.vlgmr.msra.gmra.mrb[10].mxu0 %vm380_vm3, %v13802_v27  ;;  %11127 = vmatmul.mubr.msk.f32.vlgmr.msra.gmra.mrb[0].mxu1 %vm380_vm3, %v13802_v27 }
  0xe7   :  { %11112 = vmatprep.mubr.msk.f32.mxu0 %vm13603_vm0, %v17226_v3  ;;  %11129 = vmatprep.mubr.msk.f32.mxu1 %vm13603_vm0, %v17226_v3 }
  0xe8   :  { %v13818_v33 = vmax.f32 %v349_v30, 0.0  ;;  %504 = vmatpush1.msra.mxu0 %v486_v29  ;;  %v99_v29 = vsel %vm89_vm8, %v13591_v25, 0.0 }
  0xe9   :  { %v353_v34 = vpop.f32.mrb[4].mxu0  ;;  %598 = vmatprep.subr.mxu0 %v489_v32  ;;  %v135_v31 = vrot.slane %v99_v29, %v134_v22  ;;  %v100_v32 = vsel %vm90_vm10, %v13593_v26, 0.0 }
  0xea   :  { %v354_v35 = vadd.f32 %v9971_v23, %v353_v34  ;;  %v11100_v36 = vpop.f32.mrb[5].mxu0  ;;  %11113 = vmatmul.mubr.msk.f32.gmra.mrb[12].mxu0 %vm380_vm3, %v13818_v33  ;;  %11130 = vmatmul.mubr.msk.f32.gmra.mrb[2].mxu1 %vm380_vm3, %v13818_v33  ;;  %v101_v34 = vmul.f32 %v96_v6, %v13767_v13  ;;  %v13991_v13 = vld [vmem:[%s17202_s2] sm:$0xff] }
  0xeb   :  { %11115 = vmatprep.mubr.msk.f32.mxu0 %vm13603_vm0, %v17226_v3  ;;  %11132 = vmatprep.mubr.msk.f32.mxu1 %vm13603_vm0, %v17226_v3  ;;  %v498_v36 = vld [vmem:[%s17368_s7 + $0x60] sm:$0xff]  ;;  %vm1953_vm13 = vcmp.eq.s32.totalorder %v13991_v13, 5  ;;  %vm2073_vm14 = vcmp.eq.s32.totalorder %v13991_v13, 6  ;;  %vm2193_vm10 = vcmp.eq.s32.totalorder %v13991_v13, 7 }
  0xec   :  { %v13828_v37 = vmax.f32 %v354_v35, 0.0  ;;  %v142_v35 = vrot.slane %v100_v32, %v141_v24 }
  0xed   :  { %v358_v38 = vpop.f32.mrb[6].mxu0 }
  0xee   :  { %v359_v39 = vadd.f32 %v9971_v23, %v358_v38  ;;  %v11103_v40 = vpop.f32.mrb[7].mxu0  ;;  %11116 = vmatmul.mubr.msk.f32.gmra.mrb[14].mxu0 %vm380_vm3, %v13828_v37  ;;  %11133 = vmatmul.mubr.msk.f32.gmra.mrb[4].mxu1 %vm380_vm3, %v13828_v37 }
  0xef   :  { %11118 = vmatprep.mubr.msk.f32.mxu0 %vm13603_vm0, %v17226_v3  ;;  %11135 = vmatprep.mubr.msk.f32.mxu1 %vm13603_vm0, %v17226_v3 }
  0xf0   :  { %v13838_v41 = vmax.f32 %v359_v39, 0.0  ;;  %v501_v39 = vld [vmem:[%s17368_s7 + $0x78] sm:$0xff] }
  0xf1   :  { %v363_v42 = vpop.f32.mrb[8].mxu0 }
  0xf2   :  { %v364_v43 = vadd.f32 %v9971_v23, %v363_v42  ;;  %v11106_v44 = vpop.f32.mrb[9].mxu0  ;;  %11119 = vmatmul.mubr.msk.f32.gmra.mrb[16].mxu0 %vm380_vm3, %v13838_v41  ;;  %11136 = vmatmul.mubr.msk.f32.gmra.mrb[6].mxu1 %vm380_vm3, %v13838_v41  ;;  %v121_v23 = vrot.slane %v97_v21, %v120_v9 }
  0xf3   :  { %11121 = vmatprep.mubr.msk.f32.mxu0 %vm13603_vm0, %v17226_v3  ;;  %11138 = vmatprep.mubr.msk.f32.mxu1 %vm13603_vm0, %v17226_v3 }
  0xf4   :  { %v13848_v45 = vmax.f32 %v364_v43, 0.0  ;;  %v123_v28 = vsel %vm122_vm7, %v121_v23, %v116_v14 }
  0xf5   :  { %v130_v30 = vsel %vm129_vm9, %v128_v18, %v123_v28 }
  0xf6   :  { %11122 = vmatmul.mubr.msk.f32.gmra.mrb[18].mxu0 %vm380_vm3, %v13848_v45  ;;  %11139 = vmatmul.mubr.msk.f32.gmra.mrb[8].mxu1 %vm380_vm3, %v13848_v45  ;;  %v137_v38 = vsel %vm136_vm11, %v135_v31, %v130_v30 }
  0xf7   :  { %567 = vmatprep.mubr.f32.mxu0 %v17226_v3  ;;  %11201 = vmatprep.mubr.msk.f32.mxu1 %vm13603_vm0, %v17226_v3  ;;  %v144_v40 = vsel %vm143_vm12, %v142_v35, %v137_v38 }
  0xf8   :  { %v13986_v42 = vmul.f32 %v144_v40, %v101_v34 }
  0xfa   :  { %9983 = vmatmul.mubr.msk.f32.vlgmr.msra.gmra.mrb[20].mxu0 %vm380_vm3, %v13802_v27  ;;  %v13999_v43 = vsel %vm1953_vm13, %v13986_v42, 0.0  ;;  %v14002_v44 = vsel %vm2073_vm14, %v13986_v42, 0.0  ;;  %v14085_v2 = vsel %vm2193_vm10, %v13986_v42, 0.0 }
  0xfb   :  { %573 = vmatprep.mubr.f32.mxu0 %v17226_v3  ;;  %599 = vmatpush1.msra.mxu0 %v488_v46  ;;  %17372 = vst [vmem:[#allocation4_spill] sm:$0xff] %v13999_v43  ;;  %17373 = vst [vmem:[#allocation5_spill] sm:$0xff] %v14002_v44  ;;  %v103_v46 = vmul.f32 %v98_v17, %v13774_v15  ;;  %v14025_v15 = vld [vmem:[%s17202_s2 + $0x10] sm:$0xff] }
  0xfc   :  { %693 = vmatprep.subr.mxu0 %v491_v47  ;;  %v102_v47 = vmul.f32 %v97_v21, %v13779_v16  ;;  %vm1955_vm1 = vcmp.eq.s32.totalorder %v14025_v15, 5  ;;  %vm2075_vm7 = vcmp.eq.s32.totalorder %v14025_v15, 6  ;;  %17382 = vst [vmem:[#allocation14_spill] sm:$0xff] %v14085_v2  ;;  %vm2195_vm12 = vcmp.eq.s32.totalorder %v14025_v15, 7 }
  0xfe   :  { %9984 = vmatmul.mubr.msk.f32.gmra.mrb[22].mxu0 %vm380_vm3, %v13818_v33 }
  0xff   :  { %579 = vmatprep.mubr.f32.mxu0 %v17226_v3 }
 0x102   :  { %9985 = vmatmul.mubr.msk.f32.gmra.mrb[24].mxu0 %vm380_vm3, %v13828_v37 }
 0x103   :  { %585 = vmatprep.mubr.f32.mxu0 %v17226_v3 }
 0x106   :  { %9986 = vmatmul.mubr.msk.f32.gmra.mrb[26].mxu0 %vm380_vm3, %v13838_v41 }
 0x107   :  { %591 = vmatprep.mubr.f32.mxu0 %v17226_v3 }
 0x10a   :  { %9987 = vmatmul.mubr.msk.f32.gmra.mrb[28].mxu0 %vm380_vm3, %v13848_v45 }
 0x10b   :  { %662 = vmatprep.mubr.f32.mxu0 %v17226_v3 }
 0x10e   :  { %9988 = vmatmul.mubr.msk.f32.vlgmr.msra.gmra.mrb[30].mxu0 %vm380_vm3, %v13802_v27 }
 0x10f   :  { %668 = vmatprep.mubr.f32.mxu0 %v17226_v3  ;;  %694 = vmatpush1.msra.mxu0 %v490_v48  ;;  %v104_v48 = vmul.f32 %v99_v29, %v13788_v19 }
 0x110   :  { %788 = vmatprep.subr.mxu0 %v493_v49  ;;  %v105_v49 = vmul.f32 %v100_v32, %v13793_v20  ;;  %v14035_v20 = vld [vmem:[%s17202_s2 + $0x18] sm:$0xff] }
 0x111   :  { %v14028_v16 = vmul.f32 %v144_v40, %v104_v48  ;;  %vm1956_vm4 = vcmp.eq.s32.totalorder %v14035_v20, 5  ;;  %vm2076_vm8 = vcmp.eq.s32.totalorder %v14035_v20, 6  ;;  %vm2196_vm13 = vcmp.eq.s32.totalorder %v14035_v20, 7 }
 0x112   :  { %9989 = vmatmul.mubr.msk.f32.gmra.mrb[32].mxu0 %vm380_vm3, %v13818_v33  ;;  %v14030_v19 = vmul.f32 %v144_v40, %v105_v49  ;;  %vm2436_vm10 = vcmp.eq.s32.totalorder %v14035_v20, 9 }
 0x113   :  { %674 = vmatprep.mubr.f32.mxu0 %v17226_v3  ;;  %v14075_v63 = vsel %vm2076_vm8, %v14028_v16, 0.0  ;;  %v14097_v6 = vsel %vm2196_vm13, %v14028_v16, 0.0  ;;  %v14141_v21 = vsel %vm2436_vm10, %v14028_v16, 0.0 }
 0x114   :  { %17380 = vst [vmem:[#allocation12_spill] sm:$0xff] %v14075_v63 }
 0x116   :  { %9990 = vmatmul.mubr.msk.f32.gmra.mrb[34].mxu0 %vm380_vm3, %v13828_v37 }
 0x117   :  { %680 = vmatprep.mubr.f32.mxu0 %v17226_v3 }
 0x11a   :  { %9991 = vmatmul.mubr.msk.f32.gmra.mrb[36].mxu0 %vm380_vm3, %v13838_v41 }
 0x11b   :  { %686 = vmatprep.mubr.f32.mxu0 %v17226_v3 }
 0x11e   :  { %9992 = vmatmul.mubr.msk.f32.gmra.mrb[38].mxu0 %vm380_vm3, %v13848_v45 }
 0x11f   :  { %757 = vmatprep.mubr.f32.mxu0 %v17226_v3 }
 0x122   :  { %9993 = vmatmul.mubr.msk.f32.vlgmr.msra.gmra.mrb[40].mxu0 %vm380_vm3, %v13802_v27 }
 0x123   :  { %763 = vmatprep.mubr.f32.mxu0 %v17226_v3  ;;  %789 = vmatpush1.msra.mxu0 %v492_v50  ;;  %v14013_v50 = vmul.f32 %v144_v40, %v102_v47 }
 0x124   :  { %883 = vmatprep.subr.mxu0 %v495_v51  ;;  %v14015_v51 = vmul.f32 %v144_v40, %v103_v46 }
 0x126   :  { %9994 = vmatmul.mubr.msk.f32.gmra.mrb[42].mxu0 %vm380_vm3, %v13818_v33  ;;  %v14050_v55 = vsel %vm1955_vm1, %v14015_v51, 0.0  ;;  %v14070_v62 = vsel %vm2075_vm7, %v14015_v51, 0.0  ;;  %v14094_v5 = vsel %vm2195_vm12, %v14015_v51, 0.0  ;;  %vm2433_vm7 = vcmp.eq.s32.totalorder %v13991_v13, 9 }
 0x127   :  { %769 = vmatprep.mubr.f32.mxu0 %v17226_v3  ;;  %17375 = vst [vmem:[#allocation7_spill] sm:$0xff] %v14050_v55  ;;  %17379 = vst [vmem:[#allocation11_spill] sm:$0xff] %v14070_v62  ;;  %v14130_v14 = vsel %vm2433_vm7, %v13986_v42, 0.0  ;;  %vm2553_vm12 = vcmp.eq.s32.totalorder %v13991_v13, 10  ;;  %vm2676_vm7 = vcmp.eq.s32.totalorder %v14035_v20, 11 }
 0x128   :  { %17383 = vst [vmem:[#allocation15_spill] sm:$0xff] %v14094_v5  ;;  %v14149_v23 = vsel %vm2553_vm12, %v13986_v42, 0.0  ;;  %v14184_v32 = vsel %vm2676_vm7, %v14028_v16, 0.0  ;;  %vm2796_vm12 = vcmp.eq.s32.totalorder %v14035_v20, 12 }
 0x12a   :  { %9995 = vmatmul.mubr.msk.f32.gmra.mrb[44].mxu0 %vm380_vm3, %v13828_v37 }
 0x12b   :  { %775 = vmatprep.mubr.f32.mxu0 %v17226_v3 }
 0x12e   :  { %9996 = vmatmul.mubr.msk.f32.gmra.mrb[46].mxu0 %vm380_vm3, %v13838_v41 }
 0x12f   :  { %781 = vmatprep.mubr.f32.mxu0 %v17226_v3 }
 0x132   :  { %9997 = vmatmul.mubr.msk.f32.gmra.mrb[48].mxu0 %vm380_vm3, %v13848_v45 }
 0x133   :  { %852 = vmatprep.mubr.f32.mxu0 %v17226_v3 }
 0x136   :  { %9998 = vmatmul.mubr.msk.f32.vlgmr.msra.gmra.mrb[50].mxu0 %vm380_vm3, %v13802_v27 }
 0x137   :  { %858 = vmatprep.mubr.f32.mxu0 %v17226_v3  ;;  %884 = vmatpush1.msra.mxu0 %v494_v52  ;;  %v14020_v52 = vld [vmem:[%s17202_s2 + $0x8] sm:$0xff] }
 0x138   :  { %978 = vmatprep.subr.mxu0 %v497_v53  ;;  %v14040_v53 = vld [vmem:[%s17202_s2 + $0x20] sm:$0xff]  ;;  %vm1954_vm15 = vcmp.eq.s32.totalorder %v14020_v52, 5  ;;  %vm2074_vm6 = vcmp.eq.s32.totalorder %v14020_v52, 6  ;;  %vm2194_vm11 = vcmp.eq.s32.totalorder %v14020_v52, 7  ;;  %vm2314_vm1 = vcmp.eq.s32.totalorder %v14020_v52, 8 }
 0x139   :  { %v14047_v54 = vsel %vm1954_vm15, %v14013_v50, 0.0  ;;  %vm1957_vm5 = vcmp.eq.s32.totalorder %v14040_v53, 5  ;;  %v14067_v60 = vsel %vm2074_vm6, %v14013_v50, 0.0  ;;  %vm2077_vm9 = vcmp.eq.s32.totalorder %v14040_v53, 6 }
 0x13a   :  { %9999 = vmatmul.mubr.msk.f32.gmra.mrb[52].mxu0 %vm380_vm3, %v13818_v33  ;;  %17374 = vst [vmem:[#allocation6_spill] sm:$0xff] %v14047_v54  ;;  %17378 = vst [vmem:[#allocation10_spill] sm:$0xff] %v14067_v60  ;;  %v14078_v1 = vsel %vm2077_vm9, %v14030_v19, 0.0  ;;  %v14088_v4 = vsel %vm2194_vm11, %v14013_v50, 0.0  ;;  %vm2197_vm14 = vcmp.eq.s32.totalorder %v14040_v53, 7  ;;  %vm2313_vm15 = vcmp.eq.s32.totalorder %v13991_v13, 8 }
 0x13b   :  { %864 = vmatprep.mubr.f32.mxu0 %v17226_v3  ;;  %17381 = vst [vmem:[#allocation13_spill] sm:$0xff] %v14078_v1  ;;  %v14103_v7 = vsel %vm2197_vm14, %v14030_v19, 0.0  ;;  %v14106_v8 = vsel %vm2313_vm15, %v13986_v42, 0.0  ;;  %v14111_v9 = vsel %vm2314_vm1, %v14013_v50, 0.0  ;;  %vm2317_vm6 = vcmp.eq.s32.totalorder %v14040_v53, 8 }
 0x13c   :  { %v14124_v12 = vsel %vm2317_vm6, %v14030_v19, 0.0  ;;  %vm2434_vm8 = vcmp.eq.s32.totalorder %v14020_v52, 9  ;;  %vm2435_vm9 = vcmp.eq.s32.totalorder %v14025_v15, 9  ;;  %vm2437_vm11 = vcmp.eq.s32.totalorder %v14040_v53, 9 }
 0x13d   :  { %v14133_v17 = vsel %vm2434_vm8, %v14013_v50, 0.0  ;;  %v14138_v18 = vsel %vm2435_vm9, %v14015_v51, 0.0  ;;  %v14146_v22 = vsel %vm2437_vm11, %v14030_v19, 0.0  ;;  %vm2554_vm13 = vcmp.eq.s32.totalorder %v14020_v52, 10 }
 0x13e   :  { %10000 = vmatmul.mubr.msk.f32.gmra.mrb[54].mxu0 %vm380_vm3, %v13828_v37  ;;  %vm2555_vm14 = vcmp.eq.s32.totalorder %v14025_v15, 10  ;;  %v14156_v24 = vsel %vm2554_vm13, %v14013_v50, 0.0  ;;  %vm2556_vm15 = vcmp.eq.s32.totalorder %v14035_v20, 10  ;;  %vm2557_vm1 = vcmp.eq.s32.totalorder %v14040_v53, 10 }
 0x13f   :  { %870 = vmatprep.mubr.f32.mxu0 %v17226_v3  ;;  %v14159_v25 = vsel %vm2555_vm14, %v14015_v51, 0.0  ;;  %v14165_v26 = vsel %vm2556_vm15, %v14028_v16, 0.0  ;;  %v14168_v28 = vsel %vm2557_vm1, %v14030_v19, 0.0  ;;  %vm2675_vm6 = vcmp.eq.s32.totalorder %v14025_v15, 11 }
 0x140   :  { %v14181_v31 = vsel %vm2675_vm6, %v14015_v51, 0.0  ;;  %vm2677_vm8 = vcmp.eq.s32.totalorder %v14040_v53, 11  ;;  %vm2793_vm9 = vcmp.eq.s32.totalorder %v13991_v13, 12  ;;  %vm2794_vm10 = vcmp.eq.s32.totalorder %v14020_v52, 12 }
 0x141   :  { %v14191_v34 = vsel %vm2677_vm8, %v14030_v19, 0.0  ;;  %v14194_v35 = vsel %vm2793_vm9, %v13986_v42, 0.0  ;;  %vm2795_vm11 = vcmp.eq.s32.totalorder %v14025_v15, 12  ;;  %vm2797_vm13 = vcmp.eq.s32.totalorder %v14040_v53, 12 }
 0x142   :  { %10001 = vmatmul.mubr.msk.f32.gmra.mrb[56].mxu0 %vm380_vm3, %v13838_v41  ;;  %17384 = vst [vmem:[#allocation16_spill] sm:$0xff] %v14191_v34  ;;  %17385 = vst [vmem:[#allocation17_spill] sm:$0xff] %v14194_v35  ;;  %v14203_v38 = vsel %vm2795_vm11, %v14015_v51, 0.0  ;;  %v14211_v40 = vsel %vm2797_vm13, %v14030_v19, 0.0  ;;  %vm2913_vm14 = vcmp.eq.s32.totalorder %v13991_v13, 13  ;;  %vm2914_vm15 = vcmp.eq.s32.totalorder %v14020_v52, 13 }
 0x143   :  { %876 = vmatprep.mubr.f32.mxu0 %v17226_v3  ;;  %17387 = vst [vmem:[#allocation19_spill] sm:$0xff] %v14203_v38  ;;  %17389 = vst [vmem:[#allocation21_spill] sm:$0xff] %v14211_v40  ;;  %v14216_v46 = vsel %vm2913_vm14, %v13986_v42, 0.0  ;;  %v14219_v47 = vsel %vm2914_vm15, %v14013_v50, 0.0  ;;  %vm2915_vm1 = vcmp.eq.s32.totalorder %v14025_v15, 13  ;;  %vm3033_vm6 = vcmp.eq.s32.totalorder %v13991_v13, 14 }
 0x144   :  { %17390 = vst [vmem:[#allocation22_spill] sm:$0xff] %v14216_v46  ;;  %17391 = vst [vmem:[#allocation23_spill] sm:$0xff] %v14219_v47  ;;  %v14226_v48 = vsel %vm2915_vm1, %v14015_v51, 0.0  ;;  %vm3034_vm7 = vcmp.eq.s32.totalorder %v14020_v52, 14  ;;  %vm3035_vm8 = vcmp.eq.s32.totalorder %v14025_v15, 14  ;;  %vm3036_vm9 = vcmp.eq.s32.totalorder %v14035_v20, 14 }
 0x145   :  { %17392 = vst [vmem:[#allocation24_spill] sm:$0xff] %v14226_v48  ;;  %v14243_v61 = vsel %vm3034_vm7, %v14013_v50, 0.0  ;;  %v14246_v59 = vsel %vm3035_vm8, %v14015_v51, 0.0  ;;  %vm3153_vm11 = vcmp.eq.s32.totalorder %v13991_v13, 15  ;;  %vm3155_vm13 = vcmp.eq.s32.totalorder %v14025_v15, 15 }
 0x146   :  { %10002 = vmatmul.mubr.msk.f32.gmra.mrb[58].mxu0 %vm380_vm3, %v13848_v45  ;;  %17396 = vst [vmem:[#allocation28_spill] sm:$0xff] %v14243_v61  ;;  %17397 = vst [vmem:[#allocation29_spill] sm:$0xff] %v14246_v59  ;;  %v14261_v61 = vsel %vm3153_vm11, %v13986_v42, 0.0  ;;  %vm3156_vm14 = vcmp.eq.s32.totalorder %v14035_v20, 15  ;;  %vm3157_vm15 = vcmp.eq.s32.totalorder %v14040_v53, 15  ;;  %vm3273_vm1 = vcmp.eq.s32.totalorder %v13991_v13, 16 }
 0x147   :  { %947 = vmatprep.mubr.f32.mxu0 %v17226_v3  ;;  %17400 = vst [vmem:[#allocation32_spill] sm:$0xff] %v14261_v61  ;;  %vm3277_vm7 = vcmp.eq.s32.totalorder %v14040_v53, 16  ;;  %vm1353_vm8 = vcmp.eq.s32.totalorder %v13991_v13, 0  ;;  %vm1356_vm11 = vcmp.eq.s32.totalorder %v14035_v20, 0 }
 0x14a   :  { %10003 = vmatmul.mubr.msk.f32.vlgmr.msra.gmra.mrb[60].mxu0 %vm380_vm3, %v13802_v27 }
 0x14b   :  { %953 = vmatprep.mubr.f32.mxu0 %v17226_v3  ;;  %979 = vmatpush1.msra.mxu0 %v496_v56  ;;  %v14056_v56 = vsel %vm1956_vm4, %v14028_v16, 0.0  ;;  %vm2315_vm4 = vcmp.eq.s32.totalorder %v14025_v15, 8 }
 0x14c   :  { %1073 = vmatprep.subr.mxu0 %v499_v57  ;;  %17376 = vst [vmem:[#allocation8_spill] sm:$0xff] %v14056_v56  ;;  %v14059_v57 = vsel %vm1957_vm5, %v14030_v19, 0.0  ;;  %v14114_v10 = vsel %vm2315_vm4, %v14015_v51, 0.0  ;;  %vm2316_vm5 = vcmp.eq.s32.totalorder %v14035_v20, 8  ;;  %vm2673_vm4 = vcmp.eq.s32.totalorder %v13991_v13, 11 }
 0x14d   :  { %17377 = vst [vmem:[#allocation9_spill] sm:$0xff] %v14059_v57  ;;  %v14121_v11 = vsel %vm2316_vm5, %v14028_v16, 0.0  ;;  %vm2674_vm5 = vcmp.eq.s32.totalorder %v14020_v52, 11  ;;  %v14173_v29 = vsel %vm2673_vm4, %v13986_v42, 0.0  ;;  %vm2916_vm4 = vcmp.eq.s32.totalorder %v14035_v20, 13 }
 0x14e   :  { %10004 = vmatmul.mubr.msk.f32.gmra.mrb[62].mxu0 %vm380_vm3, %v13818_v33  ;;  %v14176_v30 = vsel %vm2674_vm5, %v14013_v50, 0.0  ;;  %v14229_v49 = vsel %vm2916_vm4, %v14028_v16, 0.0  ;;  %vm2917_vm5 = vcmp.eq.s32.totalorder %v14040_v53, 13  ;;  %vm3274_vm4 = vcmp.eq.s32.totalorder %v14020_v52, 16 }
 0x14f   :  { %959 = vmatprep.mubr.f32.mxu0 %v17226_v3  ;;  %17393 = vst [vmem:[#allocation25_spill] sm:$0xff] %v14229_v49  ;;  %v14286_v61 = vsel %vm3274_vm4, %v14013_v50, 0.0  ;;  %vm1475_vm4 = vcmp.eq.s32.totalorder %v14025_v15, 1 }
 0x150   :  { %17407 = vst [vmem:[#allocation38_spill] sm:$0xff] %v14286_v61 }
 0x152   :  { %10005 = vmatmul.mubr.msk.f32.gmra.mrb[64].mxu0 %vm380_vm3, %v13828_v37 }
 0x153   :  { %965 = vmatprep.mubr.f32.mxu0 %v17226_v3 }
 0x156   :  { %10006 = vmatmul.mubr.msk.f32.gmra.mrb[66].mxu0 %vm380_vm3, %v13838_v41 }
 0x157   :  { %971 = vmatprep.mubr.f32.mxu0 %v17226_v3 }
 0x15a   :  { %10007 = vmatmul.mubr.msk.f32.gmra.mrb[68].mxu0 %vm380_vm3, %v13848_v45 }
 0x15b   :  { %1042 = vmatprep.mubr.f32.mxu0 %v17226_v3 }
 0x15e   :  { %10008 = vmatmul.mubr.msk.f32.vlgmr.msra.gmra.mrb[70].mxu0 %vm380_vm3, %v13802_v27 }
 0x15f   :  { %1048 = vmatprep.mubr.f32.mxu0 %v17226_v3  ;;  %1074 = vmatpush1.msra.mxu0 %v498_v36  ;;  %v14200_v36 = vsel %vm2794_vm10, %v14013_v50, 0.0  ;;  %vm3037_vm10 = vcmp.eq.s32.totalorder %v14040_v53, 14 }
 0x160   :  { %1168 = vmatprep.subr.mxu0 %v501_v39  ;;  %17386 = vst [vmem:[#allocation18_spill] sm:$0xff] %v14200_v36  ;;  %v14208_v39 = vsel %vm2796_vm12, %v14028_v16, 0.0  ;;  %vm3154_vm12 = vcmp.eq.s32.totalorder %v14020_v52, 15 }
 0x161   :  { %17388 = vst [vmem:[#allocation20_spill] sm:$0xff] %v14208_v39  ;;  %v14264_v59 = vsel %vm3154_vm12, %v14013_v50, 0.0  ;;  %vm1357_vm12 = vcmp.eq.s32.totalorder %v14040_v53, 0 }
 0x162   :  { %10009 = vmatmul.mubr.msk.f32.gmra.mrb[72].mxu0 %vm380_vm3, %v13818_v33  ;;  %17401 = vst [vmem:[#allocation33_spill] sm:$0xff] %v14264_v59  ;;  %v14281_v59 = vsel %vm3273_vm1, %v13986_v42, 0.0  ;;  %vm1594_vm1 = vcmp.eq.s32.totalorder %v14020_v52, 2 }
 0x163   :  { %1054 = vmatprep.mubr.f32.mxu0 %v17226_v3  ;;  %17406 = vst [vmem:[#allocation37_spill] sm:$0xff] %v14281_v59  ;;  %v14299_v59 = vsel %vm3277_vm7, %v14030_v19, 0.0  ;;  %vm1596_vm7 = vcmp.eq.s32.totalorder %v14035_v20, 2 }
 0x164   :  { %17410 = vst [vmem:[#allocation41_spill] sm:$0xff] %v14299_v59 }
 0x166   :  { %10010 = vmatmul.mubr.msk.f32.gmra.mrb[74].mxu0 %vm380_vm3, %v13828_v37 }
 0x167   :  { %1060 = vmatprep.mubr.f32.mxu0 %v17226_v3 }
 0x16a   :  { %10011 = vmatmul.mubr.msk.f32.gmra.mrb[76].mxu0 %vm380_vm3, %v13838_v41 }
 0x16b   :  { %1066 = vmatprep.mubr.f32.mxu0 %v17226_v3 }
 0x16e   :  { %10012 = vmatmul.mubr.msk.f32.gmra.mrb[78].mxu0 %vm380_vm3, %v13848_v45 }
 0x16f   :  { %1137 = vmatprep.mubr.f32.mxu0 %v17226_v3 }
 0x172   :  { %10013 = vmatmul.mubr.msk.f32.vlgmr.msra.gmra.mrb[80].mxu0 %vm380_vm3, %v13802_v27 }
 0x173   :  { %1143 = vmatprep.mubr.f32.mxu0 %v17226_v3  ;;  %1169 = vmatpush1.msra.mxu0 %v500_v58  ;;  %v14235_v58 = vsel %vm2917_vm5, %v14030_v19, 0.0  ;;  %vm3275_vm5 = vcmp.eq.s32.totalorder %v14025_v15, 16 }
 0x174   :  { %12718 = vmatprep.subr.bf16.mxu0 %v17221_v0  ;;  %17394 = vst [vmem:[#allocation26_spill] sm:$0xff] %v14235_v58  ;;  %v14238_v0 = vsel %vm3033_vm6, %v13986_v42, 0.0  ;;  %v14254_v58 = vsel %vm3037_vm10, %v14030_v19, 0.0  ;;  %vm3276_vm6 = vcmp.eq.s32.totalorder %v14035_v20, 16  ;;  %vm1355_vm10 = vcmp.eq.s32.totalorder %v14025_v15, 0 }
 0x175   :  { %17395 = vst [vmem:[#allocation27_spill] sm:$0xff] %v14238_v0  ;;  %17399 = vst [vmem:[#allocation31_spill] sm:$0xff] %v14254_v58  ;;  %v14270_v58 = vsel %vm3155_vm13, %v14015_v51, 0.0  ;;  %v14273_v0 = vsel %vm3156_vm14, %v14028_v16, 0.0  ;;  %vm1473_vm13 = vcmp.eq.s32.totalorder %v13991_v13, 1  ;;  %vm1593_vm14 = vcmp.eq.s32.totalorder %v13991_v13, 2 }
 0x176   :  { %10014 = vmatmul.mubr.msk.f32.gmra.mrb[82].mxu0 %vm380_vm3, %v13818_v33  ;;  %17403 = vst [vmem:[#allocation34_spill] sm:$0xff] %v14270_v58  ;;  %17404 = vst [vmem:[#allocation35_spill] sm:$0xff] %v14273_v0  ;;  %v14289_v58 = vsel %vm3275_vm5, %v14015_v51, 0.0  ;;  %vm1595_vm5 = vcmp.eq.s32.totalorder %v14025_v15, 2 }
 0x177   :  { %1149 = vmatprep.mubr.f32.mxu0 %v17226_v3  ;;  %17408 = vst [vmem:[#allocation39_spill] sm:$0xff] %v14289_v58 }
 0x17a   :  { %10015 = vmatmul.mubr.msk.f32.gmra.mrb[84].mxu0 %vm380_vm3, %v13828_v37 }
 0x17b   :  { %1155 = vmatprep.mubr.f32.mxu0 %v17226_v3 }
 0x17e   :  { %10016 = vmatmul.mubr.msk.f32.gmra.mrb[86].mxu0 %vm380_vm3, %v13838_v41 }
 0x17f   :  { %1161 = vmatprep.mubr.f32.mxu0 %v17226_v3 }
 0x182   :  { %10017 = vmatmul.mubr.msk.f32.gmra.mrb[88].mxu0 %vm380_vm3, %v13848_v45 }
 0x183   :  { %1232 = vmatprep.mubr.f32.mxu0 %v17226_v3  ;;  %v14251_v3 = vsel %vm3036_vm9, %v14028_v16, 0.0  ;;  %vm1354_vm9 = vcmp.eq.s32.totalorder %v14020_v52, 0 }
 0x184   :  { %17398 = vst [vmem:[#allocation30_spill] sm:$0xff] %v14251_v3  ;;  %v17402_v3 = vmov 0.0  }
 0x186   :  { %10018 = vmatmul.mubr.msk.f32.vlgmr.msra.gmra.mrb[90].mxu0 %vm380_vm3, %v13802_v27  ;;  %v14278_v27 = vsel %vm3157_vm15, %v14030_v19, 0.0  ;;  %vm1474_vm15 = vcmp.eq.s32.totalorder %v14020_v52, 1 }
 0x187   :  { %1238 = vmatprep.mubr.f32.mxu0 %v17402_v3  ;;  %17405 = vst [vmem:[#allocation36_spill] sm:$0xff] %v14278_v27  ;;  %v14296_v27 = vsel %vm3276_vm6, %v14028_v16, 0.0  ;;  %vm1476_vm6 = vcmp.eq.s32.totalorder %v14035_v20, 1 }
 0x188   :  { %17409 = vst [vmem:[#allocation40_spill] sm:$0xff] %v14296_v27 }
 0x18a   :  { %10019 = vmatmul.mubr.msk.f32.gmra.mrb[92].mxu0 %vm380_vm3, %v13818_v33 }
 0x18b   :  { %1244 = vmatprep.mubr.f32.mxu0 %v17402_v3 }
 0x18e   :  { %10020 = vmatmul.mubr.msk.f32.gmra.mrb[94].mxu0 %vm380_vm3, %v13828_v37  ;;  %v17416_v37 = vmov 0.0|0.0  }
 0x18f   :  { %1250 = vmatprep.mubr.f32.mxu0 %v17402_v3 }
 0x192   :  { %10021 = vmatmul.mubr.msk.f32.gmra.mrb[96].mxu0 %vm380_vm3, %v13838_v41 }
 0x193   :  { %1256 = vmatprep.mubr.f32.mxu0 %v17402_v3 }
 0x196   :  { %10022 = vmatmul.mubr.msk.f32.gmra.mrb[98].mxu0 %vm380_vm3, %v13848_v45 }
 0x197   :  { %11151 = vmatprep.mubr.msk.f32.mxu0 %vm13603_vm0, %v17402_v3 }
 0x1b9   :  { %v14312_v33 = vpop.f32.mrb[0].mxu1 }
 0x1ba   :  { %17411 = vst [vmem:[#allocation42_spill] sm:$0xff] %v14312_v33  ;;  %v11128_v59 = vpop.f32.mrb[1].mxu1 }
 0x1bd   :  { %v14314_v27 = vpop.f32.mrb[2].mxu1 }
 0x1be   :  { %17412 = vst [vmem:[#allocation43_spill] sm:$0xff] %v14314_v27  ;;  %v11131_v58 = vpop.f32.mrb[3].mxu1 }
 0x1c1   :  { %v14318_v61 = vpop.f32.mrb[4].mxu1 }
 0x1c2   :  { %17413 = vst [vmem:[#allocation44_spill] sm:$0xff] %v14318_v61  ;;  %v11134_v41 = vpop.f32.mrb[5].mxu1 }
 0x1c5   :  { %v14320_v0 = vpop.f32.mrb[6].mxu1 }
 0x1c6   :  { %17414 = vst [vmem:[#allocation45_spill] sm:$0xff] %v14320_v0  ;;  %v11137_v49 = vpop.f32.mrb[7].mxu1 }
 0x1c9   :  { %v14324_v48 = vpop.f32.mrb[8].mxu1 }
 0x1ca   :  { %17415 = vst [vmem:[#allocation46_spill] sm:$0xff] %v14324_v48  ;;  %v11140_v47 = vpop.f32.mrb[9].mxu1 }
 0x1cd   :  { %v569_v46 = vpop.f32.mrb[20].mxu0 }
 0x1ce   :  { %v571_v59 = vpop.f32.mrb[21].mxu0 }
 0x1d1   :  { %v575_v40 = vpop.f32.mrb[22].mxu0 }
 0x1d2   :  { %v12719_v39 = vpack.c.bf16 %v575_v40, %v569_v46  ;;  %v577_v38 = vpop.f32.mrb[23].mxu0  ;;  %v14330_v40 = vsel %vm1353_vm8, %v13986_v42, 0.0  ;;  %vm1477_vm8 = vcmp.eq.s32.totalorder %v14040_v53, 1 }
 0x1d3   :  { %v12725_v36 = vpack.c.bf16 %v577_v38, %v571_v59  ;;  %17417 = vst [vmem:[#allocation47_spill] sm:$0xff] %v14330_v40  ;;  %v14349_v59 = vsel %vm1355_vm10, %v14015_v51, 0.0  ;;  %vm1713_vm10 = vcmp.eq.s32.totalorder %v13991_v13, 3 }
 0x1d4   :  { %12720 = vmatpush3.bf16.msra.mxu0 %v12719_v39  ;;  %v14339_v39 = vsel %vm1354_vm9, %v14013_v50, 0.0  ;;  %17419 = vst [vmem:[#allocation49_spill] sm:$0xff] %v14349_v59  ;;  %vm1597_vm9 = vcmp.eq.s32.totalorder %v14040_v53, 2 }
 0x1d5   :  { %v581_v58 = vpop.f32.mrb[24].mxu0  ;;  %12721 = vmatprep.subr.bf16.mxu0 %v17416_v37  ;;  %17418 = vst [vmem:[#allocation48_spill] sm:$0xff] %v14339_v39 }
 0x1d6   :  { %v583_v41 = vpop.f32.mrb[25].mxu0 }
 0x1d9   :  { %v587_v33 = vpop.f32.mrb[26].mxu0 }
 0x1da   :  { %v12722_v27 = vpack.c.bf16 %v587_v33, %v581_v58  ;;  %v589_v35 = vpop.f32.mrb[27].mxu0 }
 0x1db   :  { %v12728_v34 = vpack.c.bf16 %v589_v35, %v583_v41 }
 0x1dc   :  { %12723 = vmatpush3.bf16.msra.mxu0 %v12722_v27 }
 0x1dd   :  { %v593_v49 = vpop.f32.mrb[28].mxu0  ;;  %11149 = vmatprep.subr.mxu0 %v17402_v3 }
 0x1de   :  { %v595_v47 = vpop.f32.mrb[29].mxu0 }
 0x1e0   :  { %11150 = vmatpush3.msra.mxu0 %v593_v49 }
 0x1e1   :  { %v664_v38 = vpop.f32.mrb[30].mxu0  ;;  %11152 = vmatmul.mubr.msk.f32.vlgmr.msra.gmra.mrb[10].mxu0 %vm70_vm2, %v14330_v40  ;;  %12724 = vmatprep.subr.bf16.mxu0 %v17416_v37 }
 0x1e2   :  { %v666_v35 = vpop.f32.mrb[31].mxu0  ;;  %12726 = vmatpush3.bf16.msra.mxu0 %v12725_v36  ;;  %11154 = vmatprep.mubr.msk.f32.mxu0 %vm13603_vm0, %v17402_v3 }
 0x1e3   :  { %12727 = vmatprep.subr.bf16.mxu0 %v17416_v37 }
 0x1e5   :  { %v670_v46 = vpop.f32.mrb[32].mxu0  ;;  %11155 = vmatmul.mubr.msk.f32.gmra.mrb[12].mxu0 %vm70_vm2, %v14339_v39 }
 0x1e6   :  { %v12731_v27 = vpack.c.bf16 %v670_v46, %v664_v38  ;;  %v672_v33 = vpop.f32.mrb[33].mxu0  ;;  %12729 = vmatpush3.bf16.msra.mxu0 %v12728_v34  ;;  %11157 = vmatprep.mubr.msk.f32.mxu0 %vm13603_vm0, %v17402_v3  ;;  %v14359_v34 = vsel %vm1356_vm11, %v14028_v16, 0.0  ;;  %v14367_v46 = vsel %vm1357_vm12, %v14030_v19, 0.0  ;;  %vm1714_vm11 = vcmp.eq.s32.totalorder %v14020_v52, 3 }
 0x1e7   :  { %v12737_v36 = vpack.c.bf16 %v672_v33, %v666_v35  ;;  %11174 = vmatprep.subr.mxu0 %v17402_v3  ;;  %17420 = vst [vmem:[#allocation50_spill] sm:$0xff] %v14359_v34  ;;  %17421 = vst [vmem:[#allocation51_spill] sm:$0xff] %v14367_v46  ;;  %vm1715_vm12 = vcmp.eq.s32.totalorder %v14025_v15, 3 }
 0x1e8   :  { %12732 = vmatpush3.bf16.msra.mxu1 %v12731_v27  ;;  %v14504_v40 = vsel %vm1715_vm12, %v14015_v51, 0.0 }
 0x1e9   :  { %v676_v58 = vpop.f32.mrb[34].mxu0  ;;  %11158 = vmatmul.mubr.msk.f32.gmra.mrb[14].mxu0 %vm70_vm2, %v14349_v59  ;;  %12733 = vmatprep.subr.bf16.mxu1 %v17416_v37  ;;  %17434 = vst [vmem:[#allocation64_spill] sm:$0xff] %v14504_v40 }
 0x1ea   :  { %v678_v41 = vpop.f32.mrb[35].mxu0  ;;  %11175 = vmatpush3.msra.mxu0 %v595_v47  ;;  %11160 = vmatprep.mubr.msk.f32.mxu0 %vm13603_vm0, %v17402_v3 }
 0x1eb   :  { %12820 = vmatprep.subr.bf16.mxu0 %v17416_v37 }
 0x1ed   :  { %v682_v49 = vpop.f32.mrb[36].mxu0  ;;  %11161 = vmatmul.mubr.msk.f32.gmra.mrb[16].mxu0 %vm70_vm2, %v14359_v34 }
 0x1ee   :  { %v12734_v38 = vpack.c.bf16 %v682_v49, %v676_v58  ;;  %v684_v35 = vpop.f32.mrb[37].mxu0  ;;  %11163 = vmatprep.mubr.msk.f32.mxu0 %vm13603_vm0, %v17402_v3  ;;  %v14377_v58 = vsel %vm1473_vm13, %v13986_v42, 0.0  ;;  %vm1716_vm13 = vcmp.eq.s32.totalorder %v14035_v20, 3 }
 0x1ef   :  { %v12740_v47 = vpack.c.bf16 %v684_v35, %v678_v41  ;;  %17422 = vst [vmem:[#allocation52_spill] sm:$0xff] %v14377_v58  ;;  %v14380_v41 = vsel %vm1593_vm14, %v13986_v42, 0.0  ;;  %v14396_v35 = vsel %vm1474_vm15, %v14013_v50, 0.0  ;;  %v14517_v39 = vsel %vm1716_vm13, %v14028_v16, 0.0 }
 0x1f0   :  { %12735 = vmatpush3.bf16.msra.mxu1 %v12734_v38  ;;  %17423 = vst [vmem:[#allocation53_spill] sm:$0xff] %v14380_v41  ;;  %17424 = vst [vmem:[#allocation54_spill] sm:$0xff] %v14396_v35  ;;  %vm1717_vm14 = vcmp.eq.s32.totalorder %v14040_v53, 3  ;;  %vm1833_vm15 = vcmp.eq.s32.totalorder %v13991_v13, 4  ;;  %vm3488_vm13 = vcmask 1043456  }
 0x1f1   :  { %v688_v27 = vpop.f32.mrb[38].mxu0  ;;  %11164 = vmatmul.mubr.msk.f32.gmra.mrb[18].mxu0 %vm70_vm2, %v14367_v46  ;;  %11199 = vmatprep.subr.mxu1 %v17402_v3  ;;  %17435 = vst [vmem:[#allocation65_spill] sm:$0xff] %v14517_v39  ;;  %v14530_v61 = vsel %vm1717_vm14, %v14030_v19, 0.0  ;;  %vm3472_vm14 = vcmask 31744  }
 0x1f2   :  { %v690_v33 = vpop.f32.mrb[39].mxu0  ;;  %11176 = vmatprep.mubr.msk.f32.mxu0 %vm13603_vm0, %v17402_v3  ;;  %17436 = vst [vmem:[#allocation66_spill] sm:$0xff] %v14530_v61 }
 0x1f4   :  { %11200 = vmatpush3.msra.mxu1 %v688_v27  ;;  %v14399_v27 = vsel %vm1594_vm1, %v14013_v50, 0.0  ;;  %vm1834_vm1 = vcmp.eq.s32.totalorder %v14020_v52, 4 }
 0x1f5   :  { %v759_v49 = vpop.f32.mrb[40].mxu0  ;;  %11177 = vmatmul.mubr.msk.f32.vlgmr.msra.gmra.mrb[10].mxu0 %vm70_vm2, %v14377_v58  ;;  %11202 = vmatmul.mubr.msk.f32.vlgmr.msra.gmra.mrb[10].mxu1 %vm70_vm2, %v14380_v41  ;;  %17425 = vst [vmem:[#allocation55_spill] sm:$0xff] %v14399_v27  ;;  %v14439_v58 = vsel %vm1596_vm7, %v14028_v16, 0.0 }
 0x1f6   :  { %12736 = vmatprep.subr.bf16.mxu1 %v17416_v37  ;;  %v14389_v38 = vpop.f32.mrb[41].mxu0  ;;  %11179 = vmatprep.mubr.msk.f32.mxu0 %vm13603_vm0, %v17402_v3  ;;  %17429 = vst [vmem:[#allocation59_spill] sm:$0xff] %v14439_v58 }
 0x1f7   :  { %12738 = vmatpush3.bf16.msra.mxu1 %v12737_v36  ;;  %11204 = vmatprep.mubr.msk.f32.mxu1 %vm13603_vm0, %v17402_v3 }
 0x1f8   :  { %12739 = vmatprep.subr.bf16.mxu1 %v17416_v37 }
 0x1f9   :  { %v765_v45 = vpop.f32.mrb[42].mxu0  ;;  %11180 = vmatmul.mubr.msk.f32.gmra.mrb[12].mxu0 %vm70_vm2, %v14396_v35  ;;  %11205 = vmatmul.mubr.msk.f32.gmra.mrb[12].mxu1 %vm70_vm2, %v14399_v27  ;;  %v14417_v35 = vsel %vm1475_vm4, %v14015_v51, 0.0  ;;  %v14420_v27 = vsel %vm1595_vm5, %v14015_v51, 0.0  ;;  %vm1835_vm4 = vcmp.eq.s32.totalorder %v14025_v15, 4  ;;  %vm1836_vm5 = vcmp.eq.s32.totalorder %v14035_v20, 4 }
 0x1fa   :  { %v12743_v36 = vpack.c.bf16 %v765_v45, %v759_v49  ;;  %v14408_v41 = vpop.f32.mrb[43].mxu0  ;;  %11182 = vmatprep.mubr.msk.f32.mxu0 %vm13603_vm0, %v17402_v3  ;;  %11207 = vmatprep.mubr.msk.f32.mxu1 %vm13603_vm0, %v17402_v3  ;;  %17426 = vst [vmem:[#allocation56_spill] sm:$0xff] %v14417_v35  ;;  %17427 = vst [vmem:[#allocation57_spill] sm:$0xff] %v14420_v27  ;;  %v14436_v49 = vsel %vm1476_vm6, %v14028_v16, 0.0  ;;  %vm1837_vm6 = vcmp.eq.s32.totalorder %v14040_v53, 4 }
 0x1fb   :  { %12741 = vmatpush3.bf16.msra.mxu1 %v12740_v47  ;;  %17428 = vst [vmem:[#allocation58_spill] sm:$0xff] %v14436_v49 }
 0x1fc   :  { %11224 = vmatprep.subr.mxu1 %v17402_v3 }
 0x1fd   :  { %v771_v45 = vpop.f32.mrb[44].mxu0  ;;  %11183 = vmatmul.mubr.msk.f32.gmra.mrb[14].mxu0 %vm70_vm2, %v14417_v35  ;;  %11208 = vmatmul.mubr.msk.f32.gmra.mrb[14].mxu1 %vm70_vm2, %v14420_v27 }
 0x1fe   :  { %v14429_v47 = vpop.f32.mrb[45].mxu0  ;;  %11185 = vmatprep.mubr.msk.f32.mxu0 %vm13603_vm0, %v17402_v3  ;;  %11210 = vmatprep.mubr.msk.f32.mxu1 %vm13603_vm0, %v17402_v3 }
 0x1ff   :  { %11225 = vmatpush3.msra.mxu1 %v690_v33 }
 0x200   :  { %12742 = vmatprep.subr.bf16.mxu1 %v17416_v37 }
 0x201   :  { %v777_v27 = vpop.f32.mrb[46].mxu0  ;;  %11186 = vmatmul.mubr.msk.f32.gmra.mrb[16].mxu0 %vm70_vm2, %v14436_v49  ;;  %11211 = vmatmul.mubr.msk.f32.gmra.mrb[16].mxu1 %vm70_vm2, %v14439_v58  ;;  %v14457_v49 = vsel %vm1477_vm8, %v14030_v19, 0.0  ;;  %v14460_v58 = vsel %vm1597_vm9, %v14030_v19, 0.0 }
 0x202   :  { %v12746_v33 = vpack.c.bf16 %v777_v27, %v771_v45  ;;  %v14448_v35 = vpop.f32.mrb[47].mxu0  ;;  %11188 = vmatprep.mubr.msk.f32.mxu0 %vm13603_vm0, %v17402_v3  ;;  %11213 = vmatprep.mubr.msk.f32.mxu1 %vm13603_vm0, %v17402_v3  ;;  %17430 = vst [vmem:[#allocation60_spill] sm:$0xff] %v14457_v49  ;;  %17431 = vst [vmem:[#allocation61_spill] sm:$0xff] %v14460_v58  ;;  %v14474_v45 = vsel %vm1713_vm10, %v13986_v42, 0.0 }
 0x203   :  { %17432 = vst [vmem:[#allocation62_spill] sm:$0xff] %v14474_v45 }
 0x205   :  { %v783_v34 = vpop.f32.mrb[48].mxu0  ;;  %11189 = vmatmul.mubr.msk.f32.gmra.mrb[18].mxu0 %vm70_vm2, %v14457_v49  ;;  %11214 = vmatmul.mubr.msk.f32.gmra.mrb[18].mxu1 %vm70_vm2, %v14460_v58  ;;  %v14487_v49 = vsel %vm1714_vm11, %v14013_v50, 0.0  ;;  %vm240_vm11 = vcmask 322560  }
 0x206   :  { %v14467_v27 = vpop.f32.mrb[49].mxu0  ;;  %11226 = vmatprep.mubr.msk.f32.mxu1 %vm13603_vm0, %v17402_v3  ;;  %11576 = vmatprep.mubr.msk.f32.mxu0 %vm13603_vm0, %v17402_v3  ;;  %17433 = vst [vmem:[#allocation63_spill] sm:$0xff] %v14487_v49 }
 0x209   :  { %v14476_v46 = vpop.f32.mrb[50].mxu0  ;;  %11227 = vmatmul.mubr.msk.f32.vlgmr.msra.gmra.mrb[10].mxu1 %vm70_vm2, %v14474_v45 }
 0x20a   :  { %12744 = vmatpush3.bf16.msra.mxu1 %v12743_v36  ;;  %v14481_v58 = vpop.f32.mrb[51].mxu0  ;;  %11229 = vmatprep.mubr.msk.f32.mxu1 %vm13603_vm0, %v17402_v3 }
 0x20b   :  { %12745 = vmatprep.subr.bf16.mxu1 %v17416_v37 }
 0x20d   :  { %v14489_v59 = vpop.f32.mrb[52].mxu0  ;;  %11230 = vmatmul.mubr.msk.f32.gmra.mrb[12].mxu1 %vm70_vm2, %v14487_v49 }
 0x20e   :  { %12747 = vmatpush3.bf16.msra.mxu1 %v12746_v33  ;;  %v14496_v45 = vpop.f32.mrb[53].mxu0  ;;  %11232 = vmatprep.mubr.msk.f32.mxu1 %vm13603_vm0, %v17402_v3 }
 0x20f   :  { %11249 = vmatprep.subr.mxu1 %v17402_v3 }
 0x211   :  { %v14506_v49 = vpop.f32.mrb[54].mxu0  ;;  %11233 = vmatmul.mubr.msk.f32.gmra.mrb[14].mxu1 %vm70_vm2, %v14504_v40 }
 0x212   :  { %11250 = vmatpush3.msra.mxu1 %v783_v34  ;;  %v14511_v33 = vpop.f32.mrb[55].mxu0  ;;  %11235 = vmatprep.mubr.msk.f32.mxu1 %vm13603_vm0, %v17402_v3  ;;  %v17438_v34 = vpack.c.bf16 %v14408_v41, %v14389_v38  ;;  %v17440_v41 = vpack.c.bf16 %v14448_v35, %v14429_v47  ;;  %v14590_v47 = vsel %vm1836_vm5, %v14028_v16, 0.0  ;;  %v14606_v16 = vsel %vm1837_vm6, %v14030_v19, 0.0 }
 0x213   :  { %12748 = vmatprep.subr.bf16.mxu1 %v17416_v37  ;;  %17442 = vst [vmem:[#allocation70_spill] sm:$0xff] %v14590_v47  ;;  %17443 = vst [vmem:[#allocation71_spill] sm:$0xff] %v14606_v16 }
 0x215   :  { %v872_v36 = vpop.f32.mrb[56].mxu0  ;;  %11236 = vmatmul.mubr.msk.f32.gmra.mrb[16].mxu1 %vm70_vm2, %v14517_v39 }
 0x216   :  { %v12758_v40 = vpack.c.bf16 %v872_v36, %v14506_v49  ;;  %v14523_v48 = vpop.f32.mrb[57].mxu0  ;;  %11238 = vmatprep.mubr.msk.f32.mxu1 %vm13603_vm0, %v17402_v3  ;;  %v14540_v49 = vsel %vm1833_vm15, %v13986_v42, 0.0  ;;  %v14556_v42 = vsel %vm1834_vm1, %v14013_v50, 0.0 }
 0x217   :  { %17437 = vst [vmem:[#allocation67_spill] sm:$0xff] %v14540_v49  ;;  %17439 = vst [vmem:[#allocation68_spill] sm:$0xff] %v14556_v42 }
 0x219   :  { %v878_v0 = vpop.f32.mrb[58].mxu0  ;;  %11239 = vmatmul.mubr.msk.f32.gmra.mrb[18].mxu1 %vm70_vm2, %v14530_v61 }
 0x21a   :  { %v14535_v39 = vpop.f32.mrb[59].mxu0  ;;  %11251 = vmatprep.mubr.msk.f32.mxu1 %vm13603_vm0, %v17402_v3 }
 0x21d   :  { %v14542_v36 = vpop.f32.mrb[60].mxu0  ;;  %11252 = vmatmul.mubr.msk.f32.vlgmr.msra.gmra.mrb[10].mxu1 %vm70_vm2, %v14540_v49 }
 0x21e   :  { %12750 = vmatpush3.bf16.msra.mxu1 %v17438_v34  ;;  %v14550_v13 = vpop.f32.mrb[61].mxu0  ;;  %11254 = vmatprep.mubr.msk.f32.mxu1 %vm13603_vm0, %v17402_v3  ;;  %v14576_v34 = vsel %vm1835_vm4, %v14015_v51, 0.0 }
 0x21f   :  { %12751 = vmatprep.subr.bf16.mxu1 %v17416_v37  ;;  %17441 = vst [vmem:[#allocation69_spill] sm:$0xff] %v14576_v34 }
 0x221   :  { %v14558_v61 = vpop.f32.mrb[62].mxu0  ;;  %11255 = vmatmul.mubr.msk.f32.gmra.mrb[12].mxu1 %vm70_vm2, %v14556_v42 }
 0x222   :  { %12753 = vmatpush3.bf16.msra.mxu1 %v17440_v41  ;;  %v14568_v38 = vpop.f32.mrb[63].mxu0  ;;  %11257 = vmatprep.mubr.msk.f32.mxu1 %vm13603_vm0, %v17402_v3  ;;  %v17444_v41 = vpack.c.bf16 %v14489_v59, %v14476_v46  ;;  %v17445_v59 = vpack.c.bf16 %v14496_v45, %v14481_v58 }
 0x223   :  { %11274 = vmatprep.subr.mxu1 %v17402_v3 }
 0x225   :  { %v14578_v15 = vpop.f32.mrb[64].mxu0  ;;  %11258 = vmatmul.mubr.msk.f32.gmra.mrb[14].mxu1 %vm70_vm2, %v14576_v34 }
 0x226   :  { %11275 = vmatpush3.msra.mxu1 %v14467_v27  ;;  %v14584_v35 = vpop.f32.mrb[65].mxu0  ;;  %11260 = vmatprep.mubr.msk.f32.mxu1 %vm13603_vm0, %v17402_v3 }
 0x227   :  { %12754 = vmatprep.subr.bf16.mxu1 %v17416_v37 }
 0x229   :  { %v14592_v51 = vpop.f32.mrb[66].mxu0  ;;  %11261 = vmatmul.mubr.msk.f32.gmra.mrb[16].mxu1 %vm70_vm2, %v14590_v47 }
 0x22a   :  { %v14599_v27 = vpop.f32.mrb[67].mxu0  ;;  %11263 = vmatprep.mubr.msk.f32.mxu1 %vm13603_vm0, %v17402_v3 }
 0x22d   :  { %v14608_v50 = vpop.f32.mrb[68].mxu0  ;;  %11264 = vmatmul.mubr.msk.f32.gmra.mrb[18].mxu1 %vm70_vm2, %v14606_v16 }
 0x22e   :  { %v14612_v53 = vpop.f32.mrb[69].mxu0  ;;  %11276 = vmatprep.mubr.msk.f32.mxu1 %vm13603_vm0, %v17402_v3 }
 0x231   :  { %v14616_v20 = vpop.f32.mrb[70].mxu0  ;;  %11277 = vmatmul.mubr.msk.f32.vlgmr.msra.gmra.mrb[10].mxu1 %vm70_vm2, %v13999_v43 }
 0x232   :  { %12756 = vmatpush3.bf16.msra.mxu1 %v17444_v41  ;;  %v14623_v19 = vpop.f32.mrb[71].mxu0  ;;  %11279 = vmatprep.mubr.msk.f32.mxu1 %vm13603_vm0, %v17402_v3 }
 0x233   :  { %12757 = vmatprep.subr.bf16.mxu1 %v17416_v37 }
 0x235   :  { %v14628_v52 = vpop.f32.mrb[72].mxu0  ;;  %11280 = vmatmul.mubr.msk.f32.gmra.mrb[12].mxu1 %vm70_vm2, %v14047_v54 }
 0x236   :  { %12759 = vmatpush3.bf16.msra.mxu1 %v12758_v40  ;;  %v14634_v43 = vpop.f32.mrb[73].mxu0  ;;  %11282 = vmatprep.mubr.msk.f32.mxu1 %vm13603_vm0, %v17402_v3 }
 0x237   :  { %11299 = vmatprep.subr.mxu1 %v17402_v3 }
 0x239   :  { %v14641_v46 = vpop.f32.mrb[74].mxu0  ;;  %11283 = vmatmul.mubr.msk.f32.gmra.mrb[14].mxu1 %vm70_vm2, %v14050_v55 }
 0x23a   :  { %11300 = vmatpush3.msra.mxu1 %v878_v0  ;;  %v14645_v41 = vpop.f32.mrb[75].mxu0  ;;  %11285 = vmatprep.mubr.msk.f32.mxu1 %vm13603_vm0, %v17402_v3 }
 0x23b   :  { %12760 = vmatprep.subr.bf16.mxu1 %v17416_v37 }
 0x23d   :  { %v14650_v40 = vpop.f32.mrb[76].mxu0  ;;  %11286 = vmatmul.mubr.msk.f32.gmra.mrb[16].mxu1 %vm70_vm2, %v14056_v56 }
 0x23e   :  { %v14656_v16 = vpop.f32.mrb[77].mxu0  ;;  %11288 = vmatprep.mubr.msk.f32.mxu1 %vm13603_vm0, %v17402_v3 }
 0x241   :  { %v14662_v55 = vpop.f32.mrb[78].mxu0  ;;  %11289 = vmatmul.mubr.msk.f32.gmra.mrb[18].mxu1 %vm70_vm2, %v14059_v57 }
 0x242   :  { %v14666_v54 = vpop.f32.mrb[79].mxu0  ;;  %11301 = vmatprep.mubr.msk.f32.mxu1 %vm13603_vm0, %v17402_v3 }
 0x245   :  { %v14670_v56 = vpop.f32.mrb[80].mxu0  ;;  %11302 = vmatmul.mubr.msk.f32.vlgmr.msra.gmra.mrb[10].mxu1 %vm70_vm2, %v14002_v44  ;;  %v17446_v44 = vpack.c.bf16 %v14523_v48, %v14511_v33  ;;  %v17447_v48 = vpack.c.bf16 %v14558_v61, %v14542_v36 }
 0x246   :  { %12762 = vmatpush3.bf16.msra.mxu1 %v17445_v59  ;;  %v14677_v0 = vpop.f32.mrb[81].mxu0  ;;  %11304 = vmatprep.mubr.msk.f32.mxu1 %vm13603_vm0, %v17402_v3 }
 0x247   :  { %12763 = vmatprep.subr.bf16.mxu1 %v17416_v37 }
 0x249   :  { %v14682_v57 = vpop.f32.mrb[82].mxu0  ;;  %11305 = vmatmul.mubr.msk.f32.gmra.mrb[12].mxu1 %vm70_vm2, %v14067_v60 }
 0x24a   :  { %12765 = vmatpush3.bf16.msra.mxu1 %v17446_v44  ;;  %v14691_v58 = vpop.f32.mrb[83].mxu0  ;;  %11307 = vmatprep.mubr.msk.f32.mxu1 %vm13603_vm0, %v17402_v3 }
 0x24b   :  { %11324 = vmatprep.subr.mxu1 %v17402_v3 }
 0x24d   :  { %v14698_v59 = vpop.f32.mrb[84].mxu0  ;;  %11308 = vmatmul.mubr.msk.f32.gmra.mrb[14].mxu1 %vm70_vm2, %v14070_v62 }
 0x24e   :  { %11325 = vmatpush3.msra.mxu1 %v14535_v39  ;;  %v14703_v47 = vpop.f32.mrb[85].mxu0  ;;  %11310 = vmatprep.mubr.msk.f32.mxu1 %vm13603_vm0, %v17402_v3 }
 0x24f   :  { %12766 = vmatprep.subr.bf16.mxu1 %v17416_v37 }
 0x251   :  { %v14708_v44 = vpop.f32.mrb[86].mxu0  ;;  %11311 = vmatmul.mubr.msk.f32.gmra.mrb[16].mxu1 %vm70_vm2, %v14075_v63 }
 0x252   :  { %v14714_v33 = vpop.f32.mrb[87].mxu0  ;;  %11313 = vmatprep.mubr.msk.f32.mxu1 %vm13603_vm0, %v17402_v3 }
 0x255   :  { %v14720_v45 = vpop.f32.mrb[88].mxu0  ;;  %11314 = vmatmul.mubr.msk.f32.gmra.mrb[18].mxu1 %vm70_vm2, %v14078_v1 }
 0x256   :  { %v14724_v62 = vpop.f32.mrb[89].mxu0  ;;  %11326 = vmatprep.mubr.msk.f32.mxu1 %vm13603_vm0, %v17402_v3 }
 0x259   :  { %v14728_v63 = vpop.f32.mrb[90].mxu0  ;;  %11327 = vmatmul.mubr.msk.f32.vlgmr.msra.gmra.mrb[10].mxu1 %vm70_vm2, %v14085_v2  ;;  %v17448_v2 = vpack.c.bf16 %v14592_v51, %v14578_v15  ;;  %v17449_v15 = vpack.c.bf16 %v14568_v38, %v14550_v13  ;;  %v17451_v13 = vpack.c.bf16 %v14628_v52, %v14616_v20  ;;  %v17452_v38 = vpack.c.bf16 %v14650_v40, %v14641_v46  ;;  %v17460_v20 = vld [vmem:[#allocation18_spill] sm:$0xff]  ;;  %v17464_v40 = vld [vmem:[#allocation21_spill] sm:$0xff] }
 0x25a   :  { %12768 = vmatpush3.bf16.msra.mxu1 %v17447_v48  ;;  %v14735_v39 = vpop.f32.mrb[91].mxu0  ;;  %11329 = vmatprep.mubr.msk.f32.mxu1 %vm13603_vm0, %v17402_v3  ;;  %v17454_v52 = vpack.c.bf16 %v14656_v16, %v14645_v41  ;;  %v17462_v16 = vld [vmem:[#allocation19_spill] sm:$0xff] }
 0x25b   :  { %12769 = vmatprep.subr.bf16.mxu1 %v17416_v37 }
 0x25d   :  { %v14740_v1 = vpop.f32.mrb[92].mxu0  ;;  %11330 = vmatmul.mubr.msk.f32.gmra.mrb[12].mxu1 %vm70_vm2, %v14088_v4 }
 0x25e   :  { %12771 = vmatpush3.bf16.msra.mxu1 %v17448_v2  ;;  %v14749_v61 = vpop.f32.mrb[93].mxu0  ;;  %11332 = vmatprep.mubr.msk.f32.mxu1 %vm13603_vm0, %v17402_v3 }
 0x25f   :  { %11349 = vmatprep.subr.mxu1 %v17402_v3 }
 0x261   :  { %v14756_v48 = vpop.f32.mrb[94].mxu0  ;;  %11333 = vmatmul.mubr.msk.f32.gmra.mrb[14].mxu1 %vm70_vm2, %v14094_v5 }
 0x262   :  { %11350 = vmatpush3.msra.mxu1 %v14608_v50  ;;  %v14761_v60 = vpop.f32.mrb[95].mxu0  ;;  %11335 = vmatprep.mubr.msk.f32.mxu1 %vm13603_vm0, %v17402_v3  ;;  %v17450_v50 = vpack.c.bf16 %v14599_v27, %v14584_v35  ;;  %v17459_v35 = vpack.c.bf16 %v14691_v58, %v14677_v0  ;;  %v17461_v27 = vpack.c.bf16 %v14714_v33, %v14703_v47  ;;  %v17463_v47 = vld [vmem:[#allocation20_spill] sm:$0xff]  ;;  %v17465_v58 = vld [vmem:[#allocation22_spill] sm:$0xff]  ;;  %v17467_v33 = vld [vmem:[#allocation23_spill] sm:$0xff] }
 0x263   :  { %12772 = vmatprep.subr.bf16.mxu1 %v17416_v37 }
 0x265   :  { %v14766_v2 = vpop.f32.mrb[96].mxu0  ;;  %11336 = vmatmul.mubr.msk.f32.gmra.mrb[16].mxu1 %vm70_vm2, %v14097_v6 }
 0x266   :  { %v14772_v51 = vpop.f32.mrb[97].mxu0  ;;  %11338 = vmatprep.mubr.msk.f32.mxu1 %vm13603_vm0, %v17402_v3 }
 0x269   :  { %v14778_v36 = vpop.f32.mrb[98].mxu0  ;;  %11339 = vmatmul.mubr.msk.f32.gmra.mrb[18].mxu1 %vm70_vm2, %v14103_v7 }
 0x26a   :  { %v14782_v5 = vpop.f32.mrb[99].mxu0  ;;  %11351 = vmatprep.mubr.msk.f32.mxu1 %vm13603_vm0, %v17402_v3 }
 0x26d   :  { %11352 = vmatmul.mubr.msk.f32.vlgmr.msra.gmra.mrb[10].mxu1 %vm70_vm2, %v14106_v8 }
 0x26e   :  { %12774 = vmatpush3.bf16.msra.mxu1 %v17449_v15  ;;  %11354 = vmatprep.mubr.msk.f32.mxu1 %vm13603_vm0, %v17402_v3  ;;  %v17468_v15 = vpack.c.bf16 %v14766_v2, %v14756_v48  ;;  %v17470_v48 = vld [vmem:[#allocation25_spill] sm:$0xff]  ;;  %v17471_v2 = vld [vmem:[#allocation26_spill] sm:$0xff] }
 0x26f   :  { %12775 = vmatprep.subr.bf16.mxu1 %v17416_v37 }
 0x271   :  { %11355 = vmatmul.mubr.msk.f32.gmra.mrb[12].mxu1 %vm70_vm2, %v14111_v9 }
 0x272   :  { %12777 = vmatpush3.bf16.msra.mxu1 %v17450_v50  ;;  %11357 = vmatprep.mubr.msk.f32.mxu1 %vm13603_vm0, %v17402_v3  ;;  %v17469_v50 = vld [vmem:[#allocation24_spill] sm:$0xff] }
 0x273   :  { %11374 = vmatprep.subr.mxu1 %v17402_v3 }
 0x275   :  { %11358 = vmatmul.mubr.msk.f32.gmra.mrb[14].mxu1 %vm70_vm2, %v14114_v10 }
 0x276   :  { %11375 = vmatpush3.msra.mxu1 %v14612_v53  ;;  %11360 = vmatprep.mubr.msk.f32.mxu1 %vm13603_vm0, %v17402_v3 }
 0x277   :  { %12778 = vmatprep.subr.bf16.mxu1 %v17416_v37 }
 0x279   :  { %11361 = vmatmul.mubr.msk.f32.gmra.mrb[16].mxu1 %vm70_vm2, %v14121_v11 }
 0x27a   :  { %11363 = vmatprep.mubr.msk.f32.mxu1 %vm13603_vm0, %v17402_v3 }
 0x27d   :  { %11364 = vmatmul.mubr.msk.f32.gmra.mrb[18].mxu1 %vm70_vm2, %v14124_v12 }
 0x27e   :  { %11376 = vmatprep.mubr.msk.f32.mxu1 %vm13603_vm0, %v17402_v3 }
 0x281   :  { %11377 = vmatmul.mubr.msk.f32.vlgmr.msra.gmra.mrb[10].mxu1 %vm70_vm2, %v14130_v14 }
 0x282   :  { %12780 = vmatpush3.bf16.msra.mxu1 %v17451_v13  ;;  %11379 = vmatprep.mubr.msk.f32.mxu1 %vm13603_vm0, %v17402_v3  ;;  %v17472_v13 = vld [vmem:[#allocation27_spill] sm:$0xff] }
 0x283   :  { %12781 = vmatprep.subr.bf16.mxu1 %v17416_v37 }
 0x285   :  { %11380 = vmatmul.mubr.msk.f32.gmra.mrb[12].mxu1 %vm70_vm2, %v14133_v17 }
 0x286   :  { %12783 = vmatpush3.bf16.msra.mxu1 %v17452_v38  ;;  %11382 = vmatprep.mubr.msk.f32.mxu1 %vm13603_vm0, %v17402_v3  ;;  %v17474_v38 = vld [vmem:[#allocation28_spill] sm:$0xff] }
 0x287   :  { %11399 = vmatprep.subr.mxu1 %v17402_v3 }
 0x289   :  { %11383 = vmatmul.mubr.msk.f32.gmra.mrb[14].mxu1 %vm70_vm2, %v14138_v18 }
 0x28a   :  { %11400 = vmatpush3.msra.mxu1 %v14662_v55  ;;  %11385 = vmatprep.mubr.msk.f32.mxu1 %vm13603_vm0, %v17402_v3  ;;  %v17453_v55 = vpack.c.bf16 %v14634_v43, %v14623_v19  ;;  %v17455_v43 = vpack.c.bf16 %v14682_v57, %v14670_v56  ;;  %v17457_v56 = vld [vmem:[#allocation16_spill] sm:$0xff]  ;;  %v17458_v57 = vld [vmem:[#allocation17_spill] sm:$0xff] }
 0x28b   :  { %12784 = vmatprep.subr.bf16.mxu1 %v17416_v37 }
 0x28d   :  { %11386 = vmatmul.mubr.msk.f32.gmra.mrb[16].mxu1 %vm70_vm2, %v14141_v21 }
 0x28e   :  { %11388 = vmatprep.mubr.msk.f32.mxu1 %vm13603_vm0, %v17402_v3 }
 0x291   :  { %11389 = vmatmul.mubr.msk.f32.gmra.mrb[18].mxu1 %vm70_vm2, %v14146_v22 }
 0x292   :  { %11401 = vmatprep.mubr.msk.f32.mxu1 %vm13603_vm0, %v17402_v3 }
 0x295   :  { %11402 = vmatmul.mubr.msk.f32.vlgmr.msra.gmra.mrb[10].mxu1 %vm70_vm2, %v14149_v23 }
 0x296   :  { %12786 = vmatpush3.bf16.msra.mxu1 %v17453_v55  ;;  %11404 = vmatprep.mubr.msk.f32.mxu1 %vm13603_vm0, %v17402_v3  ;;  %v17475_v55 = vpack.c.bf16 %v14772_v51, %v14761_v60  ;;  %v17478_v60 = vld [vmem:[#allocation31_spill] sm:$0xff]  ;;  %v17481_v51 = vld [vmem:[#allocation42_spill] sm:$0xff] }
 0x297   :  { %12787 = vmatprep.subr.bf16.mxu1 %v17416_v37 }
 0x299   :  { %11405 = vmatmul.mubr.msk.f32.gmra.mrb[12].mxu1 %vm70_vm2, %v14156_v24 }
 0x29a   :  { %12789 = vmatpush3.bf16.msra.mxu1 %v17454_v52  ;;  %11407 = vmatprep.mubr.msk.f32.mxu1 %vm13603_vm0, %v17402_v3  ;;  %v17476_v52 = vld [vmem:[#allocation29_spill] sm:$0xff] }
 0x29b   :  { %11424 = vmatprep.subr.mxu1 %v17402_v3 }
 0x29d   :  { %11408 = vmatmul.mubr.msk.f32.gmra.mrb[14].mxu1 %vm70_vm2, %v14159_v25 }
 0x29e   :  { %11425 = vmatpush3.msra.mxu1 %v14666_v54  ;;  %11410 = vmatprep.mubr.msk.f32.mxu1 %vm13603_vm0, %v17402_v3  ;;  %v17456_v54 = vpack.c.bf16 %v14708_v44, %v14698_v59 }
 0x29f   :  { %12790 = vmatprep.subr.bf16.mxu1 %v17416_v37 }
 0x2a1   :  { %11411 = vmatmul.mubr.msk.f32.gmra.mrb[16].mxu1 %vm70_vm2, %v14165_v26 }
 0x2a2   :  { %11413 = vmatprep.mubr.msk.f32.mxu1 %vm13603_vm0, %v17402_v3 }
 0x2a5   :  { %11414 = vmatmul.mubr.msk.f32.gmra.mrb[18].mxu1 %vm70_vm2, %v14168_v28 }
 0x2a6   :  { %11426 = vmatprep.mubr.msk.f32.mxu1 %vm13603_vm0, %v17402_v3 }
 0x2a9   :  { %11427 = vmatmul.mubr.msk.f32.vlgmr.msra.gmra.mrb[10].mxu1 %vm70_vm2, %v14173_v29 }
 0x2aa   :  { %12792 = vmatpush3.bf16.msra.mxu1 %v17455_v43  ;;  %11429 = vmatprep.mubr.msk.f32.mxu1 %vm13603_vm0, %v17402_v3 }
 0x2ab   :  { %12793 = vmatprep.subr.bf16.mxu1 %v17416_v37 }
 0x2ad   :  { %11430 = vmatmul.mubr.msk.f32.gmra.mrb[12].mxu1 %vm70_vm2, %v14176_v30 }
 0x2ae   :  { %12795 = vmatpush3.bf16.msra.mxu1 %v17456_v54  ;;  %11432 = vmatprep.mubr.msk.f32.mxu1 %vm13603_vm0, %v17402_v3  ;;  %v17483_v54 = vld [vmem:[#allocation33_spill] sm:$0xff] }
 0x2af   :  { %11449 = vmatprep.subr.mxu1 %v17402_v3 }
 0x2b1   :  { %11433 = vmatmul.mubr.msk.f32.gmra.mrb[14].mxu1 %vm70_vm2, %v14181_v31 }
 0x2b2   :  { %11450 = vmatpush3.msra.mxu1 %v14720_v45  ;;  %11435 = vmatprep.mubr.msk.f32.mxu1 %vm13603_vm0, %v17402_v3  ;;  %v17466_v45 = vpack.c.bf16 %v14740_v1, %v14728_v63 }
 0x2b3   :  { %12796 = vmatprep.subr.bf16.mxu1 %v17416_v37 }
 0x2b5   :  { %11436 = vmatmul.mubr.msk.f32.gmra.mrb[16].mxu1 %vm70_vm2, %v14184_v32 }
 0x2b6   :  { %11438 = vmatprep.mubr.msk.f32.mxu1 %vm13603_vm0, %v17402_v3 }
 0x2b9   :  { %11439 = vmatmul.mubr.msk.f32.gmra.mrb[18].mxu1 %vm70_vm2, %v17457_v56 }
 0x2ba   :  { %11451 = vmatprep.mubr.msk.f32.mxu1 %vm13603_vm0, %v17402_v3 }
 0x2bd   :  { %11452 = vmatmul.mubr.msk.f32.vlgmr.msra.gmra.mrb[10].mxu1 %vm70_vm2, %v17458_v57 }
 0x2be   :  { %12798 = vmatpush3.bf16.msra.mxu1 %v17459_v35  ;;  %11454 = vmatprep.mubr.msk.f32.mxu1 %vm13603_vm0, %v17402_v3  ;;  %v17484_v35 = vld [vmem:[#allocation45_spill] sm:$0xff] }
 0x2bf   :  { %12799 = vmatprep.subr.bf16.mxu1 %v17416_v37 }
 0x2c1   :  { %11455 = vmatmul.mubr.msk.f32.gmra.mrb[12].mxu1 %vm70_vm2, %v17460_v20  ;;  %v17537_v20 = vld [vmem:[#allocation9_spill] sm:$0xff] }
 0x2c2   :  { %12801 = vmatpush3.bf16.msra.mxu1 %v17461_v27  ;;  %11457 = vmatprep.mubr.msk.f32.mxu1 %vm13603_vm0, %v17402_v3  ;;  %v17485_v27 = vld [vmem:[#allocation44_spill] sm:$0xff] }
 0x2c3   :  { %11474 = vmatprep.subr.mxu1 %v17402_v3 }
 0x2c5   :  { %11458 = vmatmul.mubr.msk.f32.gmra.mrb[14].mxu1 %vm70_vm2, %v17462_v16 }
 0x2c6   :  { %11475 = vmatpush3.msra.mxu1 %v14724_v62  ;;  %11460 = vmatprep.mubr.msk.f32.mxu1 %vm13603_vm0, %v17402_v3 }
 0x2c7   :  { %12802 = vmatprep.subr.bf16.mxu1 %v17416_v37 }
 0x2c8   :  { %v14928_v53 = vpop.f32.mrb[10].mxu0 }
 0x2c9   :  { %v11178_v19 = vpop.f32.mrb[11].mxu0  ;;  %11461 = vmatmul.mubr.msk.f32.gmra.mrb[16].mxu1 %vm70_vm2, %v17463_v47  ;;  %v17531_v47 = vld [vmem:[#allocation6_spill] sm:$0xff] }
 0x2ca   :  { %11463 = vmatprep.mubr.msk.f32.mxu1 %vm13603_vm0, %v17402_v3  ;;  %v17486_v19 = vpack.c.bf16 %v17484_v35, %v17485_v27 }
 0x2cc   :  { %v14934_v46 = vpop.f32.mrb[12].mxu0 }
 0x2cd   :  { %v11181_v41 = vpop.f32.mrb[13].mxu0  ;;  %11464 = vmatmul.mubr.msk.f32.gmra.mrb[18].mxu1 %vm70_vm2, %v17464_v40 }
 0x2ce   :  { %11476 = vmatprep.mubr.msk.f32.mxu1 %vm13603_vm0, %v17402_v3  ;;  %v17487_v41 = vld [vmem:[#allocation34_spill] sm:$0xff] }
 0x2d0   :  { %v14940_v62 = vpop.f32.mrb[14].mxu0 }
 0x2d1   :  { %v11184_v0 = vpop.f32.mrb[15].mxu0  ;;  %11477 = vmatmul.mubr.msk.f32.vlgmr.msra.gmra.mrb[10].mxu1 %vm70_vm2, %v17465_v58 }
 0x2d2   :  { %12804 = vmatpush3.bf16.msra.mxu1 %v17466_v45  ;;  %11479 = vmatprep.mubr.msk.f32.mxu1 %vm13603_vm0, %v17402_v3  ;;  %v17488_v0 = vld [vmem:[#allocation46_spill] sm:$0xff]  ;;  %v17489_v45 = vld [vmem:[#allocation35_spill] sm:$0xff] }
 0x2d3   :  { %12805 = vmatprep.subr.bf16.mxu1 %v17416_v37 }
 0x2d4   :  { %v14950_v59 = vpop.f32.mrb[16].mxu0 }
 0x2d5   :  { %v11187_v44 = vpop.f32.mrb[17].mxu0  ;;  %11480 = vmatmul.mubr.msk.f32.gmra.mrb[12].mxu1 %vm70_vm2, %v17467_v33 }
 0x2d6   :  { %12807 = vmatpush3.bf16.msra.mxu1 %v17468_v15  ;;  %11482 = vmatprep.mubr.msk.f32.mxu1 %vm13603_vm0, %v17402_v3  ;;  %v17490_v44 = vld [vmem:[#allocation36_spill] sm:$0xff]  ;;  %v17491_v15 = vld [vmem:[#allocation37_spill] sm:$0xff] }
 0x2d7   :  { %11499 = vmatprep.subr.mxu1 %v17402_v3 }
 0x2d8   :  { %v14960_v63 = vpop.f32.mrb[18].mxu0 }
 0x2d9   :  { %v11190_v1 = vpop.f32.mrb[19].mxu0  ;;  %11483 = vmatmul.mubr.msk.f32.gmra.mrb[14].mxu1 %vm70_vm2, %v17469_v50 }
 0x2da   :  { %11500 = vmatpush3.msra.mxu1 %v14778_v36  ;;  %11485 = vmatprep.mubr.msk.f32.mxu1 %vm13603_vm0, %v17402_v3  ;;  %v17473_v36 = vpack.c.bf16 %v14749_v61, %v14735_v39  ;;  %v17477_v39 = vld [vmem:[#allocation30_spill] sm:$0xff]  ;;  %v17479_v61 = vld [vmem:[#allocation32_spill] sm:$0xff] }
 0x2db   :  { %12808 = vmatprep.subr.bf16.mxu1 %v17416_v37  ;;  %v17492_v1 = vld [vmem:[#allocation38_spill] sm:$0xff] }
 0x2dd   :  { %11486 = vmatmul.mubr.msk.f32.gmra.mrb[16].mxu1 %vm70_vm2, %v17470_v48  ;;  %v17523_v48 = vld [vmem:[#allocation66_spill] sm:$0xff] }
 0x2de   :  { %11488 = vmatprep.mubr.msk.f32.mxu1 %vm13603_vm0, %v17402_v3 }
 0x2e1   :  { %11489 = vmatmul.mubr.msk.f32.gmra.mrb[18].mxu1 %vm70_vm2, %v17471_v2 }
 0x2e2   :  { %11501 = vmatprep.mubr.msk.f32.mxu1 %vm13603_vm0, %v17402_v3 }
 0x2e5   :  { %11502 = vmatmul.mubr.msk.f32.vlgmr.msra.gmra.mrb[10].mxu1 %vm70_vm2, %v17472_v13  ;;  %v17521_v13 = vld [vmem:[#allocation64_spill] sm:$0xff] }
 0x2e6   :  { %12810 = vmatpush3.bf16.msra.mxu1 %v17473_v36  ;;  %11504 = vmatprep.mubr.msk.f32.mxu1 %vm13603_vm0, %v17402_v3  ;;  %v17493_v36 = vld [vmem:[#allocation39_spill] sm:$0xff] }
 0x2e7   :  { %12811 = vmatprep.subr.bf16.mxu1 %v17416_v37 }
 0x2e9   :  { %11505 = vmatmul.mubr.msk.f32.gmra.mrb[12].mxu1 %vm70_vm2, %v17474_v38 }
 0x2ea   :  { %12813 = vmatpush3.bf16.msra.mxu1 %v17475_v55  ;;  %11507 = vmatprep.mubr.msk.f32.mxu1 %vm13603_vm0, %v17402_v3  ;;  %v17494_v55 = vld [vmem:[#allocation40_spill] sm:$0xff] }
 0x2eb   :  { %11524 = vmatprep.subr.mxu1 %v17402_v3 }
 0x2ed   :  { %11508 = vmatmul.mubr.msk.f32.gmra.mrb[14].mxu1 %vm70_vm2, %v17476_v52 }
 0x2ee   :  { %11525 = vmatpush3.msra.mxu1 %v14782_v5  ;;  %11510 = vmatprep.mubr.msk.f32.mxu1 %vm13603_vm0, %v17402_v3  ;;  %v17480_v5 = vld [vmem:[#allocation43_spill] sm:$0xff] }
 0x2ef   :  { %12814 = vmatprep.subr.bf16.mxu1 %v17416_v37  ;;  %v17482_v43 = vpack.c.bf16 %v17480_v5, %v17481_v51  ;;  %v17495_v5 = vld [vmem:[#allocation41_spill] sm:$0xff]  ;;  %v17496_v51 = vld [vmem:[#allocation2_spill] sm:$0xff] }
 0x2f0   :  { %vm170_vm7 = vcmp.ge.s32.totalorder %v17496_v51, 16  ;;  %vm172_vm8 = vcmp.ge.s32.totalorder %v17496_v51, 24  ;;  %vm175_vm9 = vcmp.ge.s32.totalorder %v17496_v51, 32  ;;  %vm9961_vm12 = vcmp.eq.s32.totalorder %v17496_v51, 0 }
 0x2f1   :  { %11511 = vmatmul.mubr.msk.f32.gmra.mrb[16].mxu1 %vm70_vm2, %v17477_v39  ;;  %vm9963_vm15 = vcmp.eq.s32.totalorder %v17496_v51, 1  ;;  %vm9964_vm1 = vcmp.eq.s32.totalorder %v17496_v51, 2  ;;  %vm9965_vm4 = vcmp.eq.s32.totalorder %v17496_v51, 3 }
 0x2f2   :  { %11513 = vmatprep.mubr.msk.f32.mxu1 %vm13603_vm0, %v17402_v3 }
 0x2f5   :  { %11514 = vmatmul.mubr.msk.f32.gmra.mrb[18].mxu1 %vm70_vm2, %v17478_v60 }
 0x2f6   :  { %11526 = vmatprep.mubr.msk.f32.mxu1 %vm13603_vm0, %v17402_v3 }
 0x2f9   :  { %11527 = vmatmul.mubr.msk.f32.vlgmr.msra.gmra.mrb[10].mxu1 %vm70_vm2, %v17479_v61 }
 0x2fa   :  { %12816 = vmatpush3.bf16.msra.mxu1 %v17482_v43  ;;  %11529 = vmatprep.mubr.msk.f32.mxu1 %vm13603_vm0, %v17402_v3  ;;  %v13605_v43 = vmov 0  }
 0x2fb   :  { %12817 = vmatprep.subr.bf16.mxu1 %v17416_v37  ;;  %v171_v35 = vsel %vm170_vm7, 1, %v13605_v43  ;;  %v173_v27 = vsel %vm172_vm8, 1, %v13605_v43 }
 0x2fd   :  { %11530 = vmatmul.mubr.msk.f32.gmra.mrb[12].mxu1 %vm70_vm2, %v17483_v54 }
 0x2fe   :  { %12819 = vmatpush3.bf16.msra.mxu1 %v17486_v19  ;;  %11532 = vmatprep.mubr.msk.f32.mxu1 %vm13603_vm0, %v17402_v3  ;;  %v174_v19 = vadd.s32 %v173_v27, %v171_v35 }
 0x2ff   :  { %11549 = vmatprep.subr.mxu1 %v17402_v3 }
 0x301   :  { %11533 = vmatmul.mubr.msk.f32.gmra.mrb[14].mxu1 %vm70_vm2, %v17487_v41 }
 0x302   :  { %11550 = vmatpush3.msra.mxu1 %v17488_v0  ;;  %11535 = vmatprep.mubr.msk.f32.mxu1 %vm13603_vm0, %v17402_v3  ;;  %v176_v0 = vsel %vm175_vm9, 1, %v13605_v43 }
 0x303   :  { %12934 = vmatprep.subr.bf16.mxu1 %v17416_v37 }
 0x305   :  { %11536 = vmatmul.mubr.msk.f32.gmra.mrb[16].mxu1 %vm70_vm2, %v17489_v45 }
 0x306   :  { %11538 = vmatprep.mubr.msk.f32.mxu1 %vm13603_vm0, %v17402_v3 }
 0x309   :  { %11539 = vmatmul.mubr.msk.f32.gmra.mrb[18].mxu1 %vm70_vm2, %v17490_v44 }
 0x30a   :  { %11551 = vmatprep.mubr.msk.f32.mxu1 %vm13603_vm0, %v17402_v3 }
 0x30d   :  { %11552 = vmatmul.mubr.msk.f32.vlgmr.msra.gmra.mrb[10].mxu1 %vm70_vm2, %v17491_v15  ;;  %v9977_v15 = vld [vmem:[%s17203_s6] ss:$0 sm:$0xff] }
 0x30e   :  { %11554 = vmatprep.mubr.msk.f32.mxu1 %vm13603_vm0, %v17402_v3  ;;  %v13060_v44 = vadd.f32 %v9977_v15, %v14928_v53  ;;  %v13064_v45 = vadd.f32 %v9977_v15, %v14940_v62 }
 0x311   :  { %11555 = vmatmul.mubr.msk.f32.gmra.mrb[12].mxu1 %vm70_vm2, %v17492_v1 }
 0x312   :  { %11557 = vmatprep.mubr.msk.f32.mxu1 %vm13603_vm0, %v17402_v3 }
 0x315   :  { %11558 = vmatmul.mubr.msk.f32.gmra.mrb[14].mxu1 %vm70_vm2, %v17493_v36  ;;  %v17497_v36 = vld [vmem:[#allocation3_spill] sm:$0xff] }
 0x316   :  { %11560 = vmatprep.mubr.msk.f32.mxu1 %vm13603_vm0, %v17402_v3 }
 0x319   :  { %11561 = vmatmul.mubr.msk.f32.gmra.mrb[16].mxu1 %vm70_vm2, %v17494_v55  ;;  %v177_v55 = vadd.s32 %v176_v0, %v174_v19  ;;  %v13062_v19 = vadd.f32 %v9977_v15, %v14934_v46 }
 0x31a   :  { %11563 = vmatprep.mubr.msk.f32.mxu1 %vm13603_vm0, %v17402_v3 }
 0x31b   :  { %vm178_vm10 = vcmp.eq.s32.totalorder %v177_v55, %v17497_v36 }
 0x31c   :  { %v15061_v1 = vsel %vm178_vm10, 1.0, %v17402_v3 }
 0x31d   :  { %11564 = vmatmul.mubr.msk.f32.gmra.mrb[18].mxu1 %vm70_vm2, %v17495_v5  ;;  %17498 = vst [vmem:[#allocation16_spill] sm:$0xff] %v15061_v1  ;;  %v241_v5 = vsel %vm240_vm11, %v15061_v1, 0.0 }
 0x31e   :  { %12112 = vmatprep.mubr.msk.f32.mxu1 %vm13603_vm0, %v17402_v3  ;;  %242 = vadd.xlane.f32.xlu1 %v241_v5 }
 0x3e0   :  { %v3364_v35 = vpop.f32.mrb[10].mxu1 }
 0x3e1   :  { %v15068_v27 = vadd.f32 %v13060_v44, %v3364_v35  ;;  %v11553_v43 = vpop.f32.mrb[11].mxu1  ;;  %v13066_v44 = vadd.f32 %v9977_v15, %v14950_v59  ;;  %v243_v59 = vpop.xlane.xlu1 %242 }
 0x3e3   :  { %v3393_v5 = vmax.f32 %v15068_v27, 0.0 }
 0x3e4   :  { %v3369_v36 = vpop.f32.mrb[12].mxu1 }
 0x3e5   :  { %v15071_v55 = vadd.f32 %v13062_v19, %v3369_v36  ;;  %v11556_v0 = vpop.f32.mrb[13].mxu1  ;;  %v13068_v19 = vadd.f32 %v9977_v15, %v14960_v63  ;;  %v244_v63 = vmax.f32 %v243_v59, 1.0  ;;  %v15093_v15 = vsel %vm9961_vm12, 1.0, %v17402_v3 }
 0x3e6   :  { %17500 = vst [vmem:[#allocation42_spill] sm:$0xff] %v15093_v15 }
 0x3e7   :  { %v3394_v41 = vmax.f32 %v15071_v55, 0.0  ;;  %13594 = vrcp.f32 %v244_v63 }
 0x3e8   :  { %v3374_v54 = vpop.f32.mrb[14].mxu1 }
 0x3e9   :  { %v12821_v61 = vpack.c.bf16 %v3394_v41, %v3393_v5  ;;  %v15076_v60 = vadd.f32 %v13064_v45, %v3374_v54  ;;  %v11559_v53 = vpop.f32.mrb[15].mxu1 }
 0x3ea   :  { %v15107_v53 = vsel %vm9963_vm15, 1.0, %v17402_v3 }
 0x3eb   :  { %12822 = vmatpush3.bf16.msra.mxu0 %v12821_v61  ;;  %v3395_v62 = vmax.f32 %v15076_v60, 0.0  ;;  %17501 = vst [vmem:[#allocation45_spill] sm:$0xff] %v15107_v53 }
 0x3ec   :  { %v3379_v35 = vpop.f32.mrb[16].mxu1  ;;  %12823 = vmatprep.subr.bf16.mxu0 %v17416_v37 }
 0x3ed   :  { %v13067_v46 = vadd.f32 %v13066_v44, %v3379_v35  ;;  %v11562_v43 = vpop.f32.mrb[17].mxu1  ;;  %v15115_v44 = vsel %vm9964_vm1, 1.0, %v17402_v3  ;;  %v15123_v35 = vsel %vm9965_vm4, 1.0, %v17402_v3 }
 0x3ee   :  { %17502 = vst [vmem:[#allocation44_spill] sm:$0xff] %v15115_v44  ;;  %17503 = vst [vmem:[#allocation46_spill] sm:$0xff] %v15123_v35 }
 0x3ef   :  { %v3396_v27 = vmax.f32 %v13067_v46, 0.0 }
 0x3f0   :  { %v3384_v36 = vpop.f32.mrb[18].mxu1 }
 0x3f1   :  { %v12824_v55 = vpack.c.bf16 %v3396_v27, %v3395_v62  ;;  %v13069_v0 = vadd.f32 %v13068_v19, %v3384_v36  ;;  %v11565_v39 = vpop.f32.mrb[19].mxu1  ;;  %v15088_v60 = vpop.eup %13594 }
 0x3f2   :  { %17499 = vst [vmem:[#allocation43_spill] sm:$0xff] %v15088_v60 }
 0x3f3   :  { %12825 = vmatpush3.bf16.msra.mxu0 %v12824_v55  ;;  %v3397_v54 = vmax.f32 %v13069_v0, 0.0 }
 0x3f4   :  { %11574 = vmatprep.subr.mxu0 %v17402_v3 }
 0x3f7   :  { %11575 = vmatpush3.msra.mxu0 %v3397_v54 }
 0x3f8   :  { %11577 = vmatmul.mubr.msk.f32.vlgmr.msra.gmra.mrb[100].mxu0 %vm70_vm2, %v15061_v1  ;;  %11579 = vmatprep.subr.mxu0 %v17402_v3 }
 0x3f9   :  { %11581 = vmatprep.mubr.msk.f32.mxu0 %vm13603_vm0, %v17402_v3 }
 0x4cb   :  { %v3467_v39 = vpop.f32.mrb[100].mxu0 }
 0x4cc   :  { %v3471_v61 = vmul.f32 %v15088_v60, %v3467_v39  ;;  %v11578_v45 = vpop.f32.mrb[101].mxu0 }
 0x4ce   :  { %11580 = vmatpush3.msk.msra.mxu0 %vm3488_vm13, %v3471_v61 }
 0x4cf   :  { %11582 = vmatmul.mubr.msk.f32.vlgmr.msra.gmra.mrb[102].mxu0 %vm3472_vm14, %v15093_v15  ;;  %12826 = vmatprep.subr.bf16.mxu0 %v17416_v37 }
 0x4d0   :  { %11584 = vmatprep.mubr.msk.f32.mxu0 %vm13603_vm0, %v17402_v3 }
 0x4d3   :  { %11585 = vmatmul.mubr.msk.f32.gmra.mrb[104].mxu0 %vm3472_vm14, %v15093_v15 }
 0x4d4   :  { %11587 = vmatprep.mubr.msk.f32.mxu0 %vm13603_vm0, %v17402_v3 }
 0x4d7   :  { %11588 = vmatmul.mubr.msk.f32.gmra.mrb[106].mxu0 %vm3472_vm14, %v15107_v53 }
 0x4d8   :  { %11590 = vmatprep.mubr.msk.f32.mxu0 %vm13603_vm0, %v17402_v3 }
 0x4db   :  { %11591 = vmatmul.mubr.msk.f32.gmra.mrb[108].mxu0 %vm3472_vm14, %v15115_v44 }
 0x4dc   :  { %11593 = vmatprep.mubr.msk.f32.mxu0 %vm13603_vm0, %v17402_v3 }
 0x4df   :  { %11594 = vmatmul.mubr.msk.f32.gmra.mrb[110].mxu0 %vm3472_vm14, %v15123_v35 }
 0x4e0   :  { %11606 = vmatprep.mubr.msk.f32.mxu0 %vm13603_vm0, %v17402_v3 }
 0x5a2   :  { %v3558_v46 = vpop.f32.mrb[102].mxu0 }
 0x5a3   :  { %v11583_v43 = vpop.f32.mrb[103].mxu0  ;;  %v15129_v19 = vsub.f32 %v3393_v5, %v3558_v46 }
 0x5a5   :  { %v3587_v0 = vmul.f32 %v15129_v19, %v15129_v19 }
 0x5a6   :  { %v3563_v51 = vpop.f32.mrb[104].mxu0 }
 0x5a7   :  { %v15131_v36 = vsub.f32 %v3394_v41, %v3563_v51  ;;  %v11586_v55 = vpop.f32.mrb[105].mxu0 }
 0x5a9   :  { %v3588_v59 = vmul.f32 %v15131_v36, %v15131_v36 }
 0x5aa   :  { %v3568_v63 = vpop.f32.mrb[106].mxu0 }
 0x5ab   :  { %v12827_v39 = vpack.c.bf16 %v3588_v59, %v3587_v0  ;;  %v11589_v61 = vpop.f32.mrb[107].mxu0  ;;  %v15137_v45 = vsub.f32 %v3395_v62, %v3568_v63  ;;  %v3665_v63 = vld [vmem:[%s17204_s14] sm:$0xf] }
 0x5ad   :  { %12828 = vmatpush3.bf16.msra.mxu0 %v12827_v39  ;;  %v3589_v46 = vmul.f32 %v15137_v45, %v15137_v45 }
 0x5ae   :  { %v3573_v52 = vpop.f32.mrb[108].mxu0  ;;  %12829 = vmatprep.subr.bf16.mxu0 %v17416_v37 }
 0x5af   :  { %v15140_v5 = vsub.f32 %v3396_v27, %v3573_v52  ;;  %v11592_v41 = vpop.f32.mrb[109].mxu0 }
 0x5b0   :  { %v3760_v41 = vld [vmem:[%s17205_s15] sm:$0xf] }
 0x5b1   :  { %v3590_v43 = vmul.f32 %v15140_v5, %v15140_v5 }
 0x5b2   :  { %v3578_v51 = vpop.f32.mrb[110].mxu0 }
 0x5b3   :  { %v12830_v55 = vpack.c.bf16 %v3590_v43, %v3589_v46  ;;  %v15146_v38 = vsub.f32 %v3397_v54, %v3578_v51  ;;  %v11595_v0 = vpop.f32.mrb[111].mxu0  ;;  %v3864_v46 = vld [vmem:[%s17206_s8] sm:$0xff]  ;;  %v3978_v43 = vld [vmem:[%s17207_s10 + $0x8] sm:$0xff] }
 0x5b5   :  { %12831 = vmatpush3.bf16.msra.mxu0 %v12830_v55  ;;  %v3591_v62 = vmul.f32 %v15146_v38, %v15146_v38 }
 0x5b6   :  { %11604 = vmatprep.subr.mxu0 %v17402_v3 }
 0x5b9   :  { %11605 = vmatpush3.msra.mxu0 %v3591_v62 }
 0x5ba   :  { %11607 = vmatmul.mubr.msk.f32.vlgmr.msra.gmra.mrb[112].mxu0 %vm70_vm2, %v15061_v1  ;;  %11609 = vmatprep.subr.mxu0 %v17402_v3 }
 0x5bb   :  { %11611 = vmatprep.mubr.msk.f32.mxu0 %vm13603_vm0, %v17402_v3 }
 0x68d   :  { %v3658_v52 = vpop.f32.mrb[112].mxu0 }
 0x68e   :  { %v3662_v27 = vmul.f32 %v15088_v60, %v3658_v52  ;;  %v11608_v54 = vpop.f32.mrb[113].mxu0  ;;  %v17522_v60 = vld [vmem:[#allocation65_spill] sm:$0xff] }
 0x690   :  { %v3663_v59 = vadd.f32 1e-05, %v3662_v27 }
 0x692   :  { %13596 = vrsqrt.f32 %v3663_v59 }
 0x69c   :  { %v13597_v39 = vpop.eup %13596 }
 0x69d   :  { %v3666_v61 = vmul.f32 %v13597_v39, %v3665_v63 }
 0x69f   :  { %11610 = vmatpush3.msk.msra.mxu0 %vm3488_vm13, %v3666_v61 }
 0x6a0   :  { %11612 = vmatmul.mubr.msk.f32.vlgmr.msra.gmra.mrb[114].mxu0 %vm3472_vm14, %v15093_v15  ;;  %11626 = vmatprep.subr.mxu0 %v17402_v3 }
 0x6a1   :  { %11614 = vmatprep.mubr.msk.f32.mxu0 %vm13603_vm0, %v17402_v3  ;;  %11627 = vmatpush3.msk.msra.mxu0 %vm3488_vm13, %v3760_v41 }
 0x6a2   :  { %11643 = vmatprep.subr.mxu0 %v17402_v3 }
 0x6a4   :  { %11615 = vmatmul.mubr.msk.f32.gmra.mrb[116].mxu0 %vm3472_vm14, %v15093_v15 }
 0x6a5   :  { %11617 = vmatprep.mubr.msk.f32.mxu0 %vm13603_vm0, %v17402_v3 }
 0x6a8   :  { %11618 = vmatmul.mubr.msk.f32.gmra.mrb[118].mxu0 %vm3472_vm14, %v15107_v53 }
 0x6a9   :  { %11620 = vmatprep.mubr.msk.f32.mxu0 %vm13603_vm0, %v17402_v3 }
 0x6ac   :  { %11621 = vmatmul.mubr.msk.f32.gmra.mrb[120].mxu0 %vm3472_vm14, %v15115_v44 }
 0x6ad   :  { %11623 = vmatprep.mubr.msk.f32.mxu0 %vm13603_vm0, %v17402_v3 }
 0x6b0   :  { %11624 = vmatmul.mubr.msk.f32.gmra.mrb[122].mxu0 %vm3472_vm14, %v15123_v35 }
 0x6b1   :  { %11628 = vmatprep.mubr.msk.f32.mxu0 %vm13603_vm0, %v17402_v3 }
 0x6b4   :  { %11629 = vmatmul.mubr.msk.f32.vlgmr.msra.gmra.mrb[124].mxu0 %vm3472_vm14, %v15093_v15 }
 0x6b5   :  { %11631 = vmatprep.mubr.msk.f32.mxu0 %vm13603_vm0, %v17402_v3  ;;  %11644 = vmatpush3.msra.mxu0 %v3864_v46 }
 0x6b6   :  { %3994 = vmatprep.subr.mxu0 %v3978_v43  ;;  %v3977_v43 = vld [vmem:[%s17207_s10] sm:$0xff] }
 0x6b8   :  { %11632 = vmatmul.mubr.msk.f32.gmra.mrb[126].mxu0 %vm3472_vm14, %v15093_v15 }
 0x6b9   :  { %11634 = vmatprep.mubr.msk.f32.mxu0 %vm13603_vm0, %v17402_v3 }
 0x6bc   :  { %11635 = vmatmul.mubr.msk.f32.gmra.mrb[128].mxu0 %vm3472_vm14, %v15107_v53 }
 0x6bd   :  { %11637 = vmatprep.mubr.msk.f32.mxu0 %vm13603_vm0, %v17402_v3 }
 0x6c0   :  { %11638 = vmatmul.mubr.msk.f32.gmra.mrb[130].mxu0 %vm3472_vm14, %v15115_v44  ;;  %v17518_v44 = vld [vmem:[#allocation61_spill] sm:$0xff] }
 0x6c1   :  { %11640 = vmatprep.mubr.msk.f32.mxu0 %vm13603_vm0, %v17402_v3 }
 0x6c4   :  { %11641 = vmatmul.mubr.msk.f32.gmra.mrb[132].mxu0 %vm3472_vm14, %v15123_v35 }
 0x6c5   :  { %11645 = vmatprep.mubr.msk.f32.mxu0 %vm13603_vm0, %v17402_v3 }
 0x773   :  { %v3736_v51 = vpop.f32.mrb[114].mxu0 }
 0x774   :  { %v11613_v55 = vpop.f32.mrb[115].mxu0  ;;  %v3854_v61 = vmul.f32 %v3736_v51, %v15129_v19 }
 0x775   :  { %v3980_v55 = vld [vmem:[%s17207_s10 + $0x18] sm:$0xff] }
 0x777   :  { %v3741_v0 = vpop.f32.mrb[116].mxu0 }
 0x778   :  { %v11616_v62 = vpop.f32.mrb[117].mxu0 }
 0x779   :  { %v3855_v62 = vmul.f32 %v3741_v0, %v15131_v36 }
 0x77b   :  { %v3746_v52 = vpop.f32.mrb[118].mxu0 }
 0x77c   :  { %v11619_v27 = vpop.f32.mrb[119].mxu0 }
 0x77f   :  { %v3751_v54 = vpop.f32.mrb[120].mxu0 }
 0x780   :  { %v11622_v59 = vpop.f32.mrb[121].mxu0 }
 0x781   :  { %v3856_v59 = vmul.f32 %v3746_v52, %v15137_v45 }
 0x783   :  { %v3756_v63 = vpop.f32.mrb[122].mxu0 }
 0x784   :  { %v11625_v39 = vpop.f32.mrb[123].mxu0 }
 0x787   :  { %v3830_v41 = vpop.f32.mrb[124].mxu0 }
 0x788   :  { %v15214_v35 = vadd.f32 %v3854_v61, %v3830_v41  ;;  %v11630_v46 = vpop.f32.mrb[125].mxu0  ;;  %v3857_v61 = vmul.f32 %v3751_v54, %v15140_v5 }
 0x789   :  { %v3858_v46 = vmul.f32 %v3756_v63, %v15146_v38  ;;  %v3982_v38 = vld [vmem:[%s17207_s10 + $0x28] sm:$0xff]  ;;  %v3981_v63 = vld [vmem:[%s17207_s10 + $0x20] sm:$0xff] }
 0x78a   :  { %11646 = vmatmul.mubr.msk.f32.vlgmr.msra.gmra.mrb[134].mxu0 %vm380_vm3, %v15214_v35 }
 0x78b   :  { %v3835_v27 = vpop.f32.mrb[126].mxu0  ;;  %11648 = vmatprep.mubr.msk.f32.mxu0 %vm13603_vm0, %v17402_v3  ;;  %3995 = vmatpush1.msra.mxu0 %v3977_v43 }
 0x78c   :  { %v15227_v19 = vadd.f32 %v3855_v62, %v3835_v27  ;;  %v11633_v51 = vpop.f32.mrb[127].mxu0  ;;  %4089 = vmatprep.subr.mxu0 %v3980_v55  ;;  %v3979_v55 = vld [vmem:[%s17207_s10 + $0x10] sm:$0xff]  ;;  %v3984_v62 = vld [vmem:[%s17207_s10 + $0x38] sm:$0xff] }
 0x78d   :  { %v3983_v27 = vld [vmem:[%s17207_s10 + $0x30] sm:$0xff]  ;;  %v3986_v51 = vld [vmem:[%s17207_s10 + $0x48] sm:$0xff] }
 0x78e   :  { %11649 = vmatmul.mubr.msk.f32.gmra.mrb[136].mxu0 %vm380_vm3, %v15227_v19 }
 0x78f   :  { %v3840_v39 = vpop.f32.mrb[128].mxu0  ;;  %11651 = vmatprep.mubr.msk.f32.mxu0 %vm13603_vm0, %v17402_v3 }
 0x790   :  { %v15234_v36 = vadd.f32 %v3856_v59, %v3840_v39  ;;  %v11636_v0 = vpop.f32.mrb[129].mxu0  ;;  %v3985_v59 = vld [vmem:[%s17207_s10 + $0x40] sm:$0xff]  ;;  %v3988_v39 = vld [vmem:[%s17207_s10 + $0x58] sm:$0xff] }
 0x791   :  { %v3987_v0 = vld [vmem:[%s17207_s10 + $0x50] sm:$0xff] }
 0x792   :  { %11652 = vmatmul.mubr.msk.f32.gmra.mrb[138].mxu0 %vm380_vm3, %v15234_v36 }
 0x793   :  { %v3845_v41 = vpop.f32.mrb[130].mxu0  ;;  %11654 = vmatprep.mubr.msk.f32.mxu0 %vm13603_vm0, %v17402_v3 }
 0x794   :  { %v15241_v45 = vadd.f32 %v3857_v61, %v3845_v41  ;;  %v11639_v52 = vpop.f32.mrb[131].mxu0  ;;  %v3990_v61 = vld [vmem:[%s17207_s10 + $0x68] sm:$0xff]  ;;  %v3989_v41 = vld [vmem:[%s17207_s10 + $0x60] sm:$0xff] }
 0x795   :  { %v3992_v52 = vld [vmem:[%s17207_s10 + $0x78] sm:$0xff] }
 0x796   :  { %11655 = vmatmul.mubr.msk.f32.gmra.mrb[140].mxu0 %vm380_vm3, %v15241_v45 }
 0x797   :  { %v3850_v43 = vpop.f32.mrb[132].mxu0  ;;  %11657 = vmatprep.mubr.msk.f32.mxu0 %vm13603_vm0, %v17402_v3 }
 0x798   :  { %v15248_v5 = vadd.f32 %v3858_v46, %v3850_v43  ;;  %v11642_v54 = vpop.f32.mrb[133].mxu0  ;;  %v3991_v46 = vld [vmem:[%s17207_s10 + $0x70] sm:$0xff]  ;;  %v3993_v43 = vld [vmem:[%s17207_s10 + $0x80] sm:$0xff] }
 0x79a   :  { %11658 = vmatmul.mubr.msk.f32.gmra.mrb[142].mxu0 %vm380_vm3, %v15248_v5 }
 0x79b   :  { %4058 = vmatprep.mubr.f32.mxu0 %v17402_v3 }
 0x79e   :  { %10139 = vmatmul.mubr.msk.f32.vlgmr.msra.gmra.mrb[144].mxu0 %vm380_vm3, %v15214_v35 }
 0x79f   :  { %4064 = vmatprep.mubr.f32.mxu0 %v17402_v3  ;;  %4090 = vmatpush1.msra.mxu0 %v3979_v55 }
 0x7a0   :  { %4184 = vmatprep.subr.mxu0 %v3982_v38 }
 0x7a2   :  { %10140 = vmatmul.mubr.msk.f32.gmra.mrb[146].mxu0 %vm380_vm3, %v15227_v19 }
 0x7a3   :  { %4070 = vmatprep.mubr.f32.mxu0 %v17402_v3 }
 0x7a6   :  { %10141 = vmatmul.mubr.msk.f32.gmra.mrb[148].mxu0 %vm380_vm3, %v15234_v36 }
 0x7a7   :  { %4076 = vmatprep.mubr.f32.mxu0 %v17402_v3 }
 0x7aa   :  { %10142 = vmatmul.mubr.msk.f32.gmra.mrb[150].mxu0 %vm380_vm3, %v15241_v45 }
 0x7ab   :  { %4082 = vmatprep.mubr.f32.mxu0 %v17402_v3 }
 0x7ae   :  { %10143 = vmatmul.mubr.msk.f32.gmra.mrb[152].mxu0 %vm380_vm3, %v15248_v5 }
 0x7af   :  { %4153 = vmatprep.mubr.f32.mxu0 %v17402_v3 }
 0x7b2   :  { %10144 = vmatmul.mubr.msk.f32.vlgmr.msra.gmra.mrb[154].mxu0 %vm380_vm3, %v15214_v35 }
 0x7b3   :  { %4159 = vmatprep.mubr.f32.mxu0 %v17402_v3  ;;  %4185 = vmatpush1.msra.mxu0 %v3981_v63 }
 0x7b4   :  { %4279 = vmatprep.subr.mxu0 %v3984_v62 }
 0x7b6   :  { %10145 = vmatmul.mubr.msk.f32.gmra.mrb[156].mxu0 %vm380_vm3, %v15227_v19 }
 0x7b7   :  { %4165 = vmatprep.mubr.f32.mxu0 %v17402_v3 }
 0x7ba   :  { %10146 = vmatmul.mubr.msk.f32.gmra.mrb[158].mxu0 %vm380_vm3, %v15234_v36 }
 0x7bb   :  { %4171 = vmatprep.mubr.f32.mxu0 %v17402_v3 }
 0x7be   :  { %10147 = vmatmul.mubr.msk.f32.gmra.mrb[160].mxu0 %vm380_vm3, %v15241_v45 }
 0x7bf   :  { %4177 = vmatprep.mubr.f32.mxu0 %v17402_v3 }
 0x7c2   :  { %10148 = vmatmul.mubr.msk.f32.gmra.mrb[162].mxu0 %vm380_vm3, %v15248_v5 }
 0x7c3   :  { %4248 = vmatprep.mubr.f32.mxu0 %v17402_v3 }
 0x7c6   :  { %10149 = vmatmul.mubr.msk.f32.vlgmr.msra.gmra.mrb[164].mxu0 %vm380_vm3, %v15214_v35 }
 0x7c7   :  { %4254 = vmatprep.mubr.f32.mxu0 %v17402_v3  ;;  %4280 = vmatpush1.msra.mxu0 %v3983_v27 }
 0x7c8   :  { %4374 = vmatprep.subr.mxu0 %v3986_v51 }
 0x7ca   :  { %10150 = vmatmul.mubr.msk.f32.gmra.mrb[166].mxu0 %vm380_vm3, %v15227_v19 }
 0x7cb   :  { %4260 = vmatprep.mubr.f32.mxu0 %v17402_v3 }
 0x7ce   :  { %10151 = vmatmul.mubr.msk.f32.gmra.mrb[168].mxu0 %vm380_vm3, %v15234_v36 }
 0x7cf   :  { %4266 = vmatprep.mubr.f32.mxu0 %v17402_v3 }
 0x7d2   :  { %10152 = vmatmul.mubr.msk.f32.gmra.mrb[170].mxu0 %vm380_vm3, %v15241_v45 }
 0x7d3   :  { %4272 = vmatprep.mubr.f32.mxu0 %v17402_v3 }
 0x7d6   :  { %10153 = vmatmul.mubr.msk.f32.gmra.mrb[172].mxu0 %vm380_vm3, %v15248_v5 }
 0x7d7   :  { %4343 = vmatprep.mubr.f32.mxu0 %v17402_v3 }
 0x7da   :  { %10154 = vmatmul.mubr.msk.f32.vlgmr.msra.gmra.mrb[174].mxu0 %vm380_vm3, %v15214_v35 }
 0x7db   :  { %4349 = vmatprep.mubr.f32.mxu0 %v17402_v3  ;;  %4375 = vmatpush1.msra.mxu0 %v3985_v59 }
 0x7dc   :  { %4469 = vmatprep.subr.mxu0 %v3988_v39 }
 0x7de   :  { %10155 = vmatmul.mubr.msk.f32.gmra.mrb[176].mxu0 %vm380_vm3, %v15227_v19 }
 0x7df   :  { %4355 = vmatprep.mubr.f32.mxu0 %v17402_v3 }
 0x7e2   :  { %10156 = vmatmul.mubr.msk.f32.gmra.mrb[178].mxu0 %vm380_vm3, %v15234_v36 }
 0x7e3   :  { %4361 = vmatprep.mubr.f32.mxu0 %v17402_v3 }
 0x7e6   :  { %10157 = vmatmul.mubr.msk.f32.gmra.mrb[180].mxu0 %vm380_vm3, %v15241_v45 }
 0x7e7   :  { %4367 = vmatprep.mubr.f32.mxu0 %v17402_v3 }
 0x7ea   :  { %10158 = vmatmul.mubr.msk.f32.gmra.mrb[182].mxu0 %vm380_vm3, %v15248_v5 }
 0x7eb   :  { %4438 = vmatprep.mubr.f32.mxu0 %v17402_v3 }
 0x7ee   :  { %10159 = vmatmul.mubr.msk.f32.vlgmr.msra.gmra.mrb[184].mxu0 %vm380_vm3, %v15214_v35 }
 0x7ef   :  { %4444 = vmatprep.mubr.f32.mxu0 %v17402_v3  ;;  %4470 = vmatpush1.msra.mxu0 %v3987_v0 }
 0x7f0   :  { %4564 = vmatprep.subr.mxu0 %v3990_v61  ;;  %v17504_v61 = vld [vmem:[#allocation47_spill] sm:$0xff] }
 0x7f2   :  { %10160 = vmatmul.mubr.msk.f32.gmra.mrb[186].mxu0 %vm380_vm3, %v15227_v19 }
 0x7f3   :  { %4450 = vmatprep.mubr.f32.mxu0 %v17402_v3 }
 0x7f6   :  { %10161 = vmatmul.mubr.msk.f32.gmra.mrb[188].mxu0 %vm380_vm3, %v15234_v36 }
 0x7f7   :  { %4456 = vmatprep.mubr.f32.mxu0 %v17402_v3 }
 0x7fa   :  { %10162 = vmatmul.mubr.msk.f32.gmra.mrb[190].mxu0 %vm380_vm3, %v15241_v45 }
 0x7fb   :  { %4462 = vmatprep.mubr.f32.mxu0 %v17402_v3 }
 0x7fe   :  { %10163 = vmatmul.mubr.msk.f32.gmra.mrb[192].mxu0 %vm380_vm3, %v15248_v5 }
 0x7ff   :  { %4533 = vmatprep.mubr.f32.mxu0 %v17402_v3 }
 0x802   :  { %10164 = vmatmul.mubr.msk.f32.vlgmr.msra.gmra.mrb[194].mxu0 %vm380_vm3, %v15214_v35 }
 0x803   :  { %4539 = vmatprep.mubr.f32.mxu0 %v17402_v3  ;;  %4565 = vmatpush1.msra.mxu0 %v3989_v41 }
 0x804   :  { %4659 = vmatprep.subr.mxu0 %v3992_v52 }
 0x806   :  { %10165 = vmatmul.mubr.msk.f32.gmra.mrb[196].mxu0 %vm380_vm3, %v15227_v19 }
 0x807   :  { %4545 = vmatprep.mubr.f32.mxu0 %v17402_v3 }
 0x80a   :  { %10166 = vmatmul.mubr.msk.f32.gmra.mrb[198].mxu0 %vm380_vm3, %v15234_v36 }
 0x80b   :  { %4551 = vmatprep.mubr.f32.mxu0 %v17402_v3 }
 0x80e   :  { %10167 = vmatmul.mubr.msk.f32.gmra.mrb[200].mxu0 %vm380_vm3, %v15241_v45 }
 0x80f   :  { %4557 = vmatprep.mubr.f32.mxu0 %v17402_v3 }
 0x812   :  { %10168 = vmatmul.mubr.msk.f32.gmra.mrb[202].mxu0 %vm380_vm3, %v15248_v5 }
 0x813   :  { %4628 = vmatprep.mubr.f32.mxu0 %v17402_v3 }
 0x816   :  { %10169 = vmatmul.mubr.msk.f32.vlgmr.msra.gmra.mrb[204].mxu0 %vm380_vm3, %v15214_v35 }
 0x817   :  { %4634 = vmatprep.mubr.f32.mxu0 %v17402_v3  ;;  %4660 = vmatpush1.msra.mxu0 %v3991_v46  ;;  %v17505_v46 = vld [vmem:[#allocation48_spill] sm:$0xff] }
 0x818   :  { %11660 = vmatprep.subr.mxu0 %v17402_v3 }
 0x81a   :  { %10170 = vmatmul.mubr.msk.f32.gmra.mrb[206].mxu0 %vm380_vm3, %v15227_v19 }
 0x81b   :  { %4640 = vmatprep.mubr.f32.mxu0 %v17402_v3 }
 0x81e   :  { %10171 = vmatmul.mubr.msk.f32.gmra.mrb[208].mxu0 %vm380_vm3, %v15234_v36 }
 0x81f   :  { %4646 = vmatprep.mubr.f32.mxu0 %v17402_v3 }
 0x822   :  { %10172 = vmatmul.mubr.msk.f32.gmra.mrb[210].mxu0 %vm380_vm3, %v15241_v45 }
 0x823   :  { %4652 = vmatprep.mubr.f32.mxu0 %v17402_v3 }
 0x826   :  { %10173 = vmatmul.mubr.msk.f32.gmra.mrb[212].mxu0 %vm380_vm3, %v15248_v5 }
 0x827   :  { %4723 = vmatprep.mubr.f32.mxu0 %v17402_v3 }
 0x82a   :  { %10174 = vmatmul.mubr.msk.f32.vlgmr.msra.gmra.mrb[214].mxu0 %vm380_vm3, %v15214_v35 }
 0x82b   :  { %4729 = vmatprep.mubr.f32.mxu0 %v17402_v3  ;;  %11661 = vmatpush3.msra.mxu0 %v3993_v43 }
 0x82c   :  { %12832 = vmatprep.subr.bf16.mxu0 %v17416_v37 }
 0x82e   :  { %10175 = vmatmul.mubr.msk.f32.gmra.mrb[216].mxu0 %vm380_vm3, %v15227_v19 }
 0x82f   :  { %4735 = vmatprep.mubr.f32.mxu0 %v17402_v3 }
 0x832   :  { %10176 = vmatmul.mubr.msk.f32.gmra.mrb[218].mxu0 %vm380_vm3, %v15234_v36 }
 0x833   :  { %4741 = vmatprep.mubr.f32.mxu0 %v17402_v3 }
 0x836   :  { %10177 = vmatmul.mubr.msk.f32.gmra.mrb[220].mxu0 %vm380_vm3, %v15241_v45 }
 0x837   :  { %4747 = vmatprep.mubr.f32.mxu0 %v17402_v3 }
 0x83a   :  { %10178 = vmatmul.mubr.msk.f32.gmra.mrb[222].mxu0 %vm380_vm3, %v15248_v5 }
 0x83b   :  { %11662 = vmatprep.mubr.msk.f32.mxu0 %vm13603_vm0, %v17402_v3 }
 0x83e   :  { %11663 = vmatmul.mubr.msk.f32.vlgmr.msra.gmra.mrb[224].mxu0 %vm380_vm3, %v15214_v35 }
 0x83f   :  { %11665 = vmatprep.mubr.msk.f32.mxu0 %vm13603_vm0, %v17402_v3 }
 0x842   :  { %11666 = vmatmul.mubr.msk.f32.gmra.mrb[226].mxu0 %vm380_vm3, %v15227_v19 }
 0x843   :  { %11668 = vmatprep.mubr.msk.f32.mxu0 %vm13603_vm0, %v17402_v3 }
 0x846   :  { %11669 = vmatmul.mubr.msk.f32.gmra.mrb[228].mxu0 %vm380_vm3, %v15234_v36 }
 0x847   :  { %11671 = vmatprep.mubr.msk.f32.mxu0 %vm13603_vm0, %v17402_v3 }
 0x84a   :  { %11672 = vmatmul.mubr.msk.f32.gmra.mrb[230].mxu0 %vm380_vm3, %v15241_v45 }
 0x84b   :  { %11674 = vmatprep.mubr.msk.f32.mxu0 %vm13603_vm0, %v17402_v3 }
 0x84e   :  { %11675 = vmatmul.mubr.msk.f32.gmra.mrb[232].mxu0 %vm380_vm3, %v15248_v5 }
 0x84f   :  { %11687 = vmatprep.mubr.msk.f32.mxu0 %vm13603_vm0, %v17402_v3 }
 0x871   :  { %v4060_v35 = vpop.f32.mrb[144].mxu0 }
 0x872   :  { %v4062_v19 = vpop.f32.mrb[145].mxu0 }
 0x875   :  { %v4066_v54 = vpop.f32.mrb[146].mxu0 }
 0x876   :  { %v12833_v55 = vpack.c.bf16 %v4066_v54, %v4060_v35  ;;  %v4068_v36 = vpop.f32.mrb[147].mxu0 }
 0x877   :  { %v12839_v38 = vpack.c.bf16 %v4068_v36, %v4062_v19 }
 0x878   :  { %12834 = vmatpush3.bf16.msra.mxu0 %v12833_v55  ;;  %v17506_v55 = vld [vmem:[#allocation49_spill] sm:$0xff] }
 0x879   :  { %v4072_v63 = vpop.f32.mrb[148].mxu0  ;;  %12835 = vmatprep.subr.bf16.mxu0 %v17416_v37 }
 0x87a   :  { %v4074_v45 = vpop.f32.mrb[149].mxu0 }
 0x87d   :  { %v4078_v62 = vpop.f32.mrb[150].mxu0 }
 0x87e   :  { %v12836_v27 = vpack.c.bf16 %v4078_v62, %v4072_v63  ;;  %v4080_v51 = vpop.f32.mrb[151].mxu0  ;;  %v17507_v63 = vld [vmem:[#allocation50_spill] sm:$0xff] }
 0x87f   :  { %v12842_v59 = vpack.c.bf16 %v4080_v51, %v4074_v45 }
 0x880   :  { %12837 = vmatpush3.bf16.msra.mxu0 %v12836_v27 }
 0x881   :  { %v4084_v5 = vpop.f32.mrb[152].mxu0  ;;  %11685 = vmatprep.subr.mxu0 %v17402_v3 }
 0x882   :  { %v4086_v39 = vpop.f32.mrb[153].mxu0 }
 0x884   :  { %11686 = vmatpush3.msra.mxu0 %v4084_v5 }
 0x885   :  { %v4155_v0 = vpop.f32.mrb[154].mxu0  ;;  %11688 = vmatmul.mubr.msk.f32.vlgmr.msra.gmra.mrb[134].mxu0 %vm70_vm2, %v17504_v61  ;;  %12838 = vmatprep.subr.bf16.mxu0 %v17416_v37 }
 0x886   :  { %v4157_v41 = vpop.f32.mrb[155].mxu0  ;;  %12840 = vmatpush3.bf16.msra.mxu0 %v12839_v38  ;;  %11690 = vmatprep.mubr.msk.f32.mxu0 %vm13603_vm0, %v17402_v3 }
 0x887   :  { %12841 = vmatprep.subr.bf16.mxu0 %v17416_v37 }
 0x889   :  { %v4161_v52 = vpop.f32.mrb[156].mxu0  ;;  %11691 = vmatmul.mubr.msk.f32.gmra.mrb[136].mxu0 %vm70_vm2, %v17505_v46  ;;  %v17516_v46 = vld [vmem:[#allocation57_spill] sm:$0xff] }
 0x88a   :  { %v12845_v43 = vpack.c.bf16 %v4161_v52, %v4155_v0  ;;  %v4163_v35 = vpop.f32.mrb[157].mxu0  ;;  %12843 = vmatpush3.bf16.msra.mxu0 %v12842_v59  ;;  %11693 = vmatprep.mubr.msk.f32.mxu0 %vm13603_vm0, %v17402_v3  ;;  %v17508_v59 = vld [vmem:[#allocation51_spill] sm:$0xff]  ;;  %v17509_v0 = vld [vmem:[#allocation52_spill] sm:$0xff] }
 0x88b   :  { %v12851_v19 = vpack.c.bf16 %v4163_v35, %v4157_v41  ;;  %11710 = vmatprep.subr.mxu0 %v17402_v3  ;;  %v17510_v35 = vld [vmem:[#allocation54_spill] sm:$0xff] }
 0x88d   :  { %v4167_v54 = vpop.f32.mrb[158].mxu0  ;;  %11694 = vmatmul.mubr.msk.f32.gmra.mrb[138].mxu0 %vm70_vm2, %v17506_v55 }
 0x88e   :  { %v4169_v36 = vpop.f32.mrb[159].mxu0  ;;  %11711 = vmatpush3.msra.mxu0 %v4086_v39  ;;  %11696 = vmatprep.mubr.msk.f32.mxu0 %vm13603_vm0, %v17402_v3 }
 0x88f   :  { %12844 = vmatprep.subr.bf16.mxu0 %v17416_v37 }
 0x891   :  { %v4173_v38 = vpop.f32.mrb[160].mxu0  ;;  %11697 = vmatmul.mubr.msk.f32.gmra.mrb[140].mxu0 %vm70_vm2, %v17507_v63 }
 0x892   :  { %v12848_v45 = vpack.c.bf16 %v4173_v38, %v4167_v54  ;;  %v4175_v62 = vpop.f32.mrb[161].mxu0  ;;  %11699 = vmatprep.mubr.msk.f32.mxu0 %vm13603_vm0, %v17402_v3 }
 0x893   :  { %v12854_v27 = vpack.c.bf16 %v4175_v62, %v4169_v36  ;;  %v17511_v62 = vld [vmem:[#allocation56_spill] sm:$0xff] }
 0x895   :  { %v4179_v51 = vpop.f32.mrb[162].mxu0  ;;  %11700 = vmatmul.mubr.msk.f32.gmra.mrb[142].mxu0 %vm70_vm2, %v17508_v59 }
 0x896   :  { %v4181_v5 = vpop.f32.mrb[163].mxu0  ;;  %11712 = vmatprep.mubr.msk.f32.mxu0 %vm13603_vm0, %v17402_v3 }
 0x899   :  { %v4250_v39 = vpop.f32.mrb[164].mxu0  ;;  %11713 = vmatmul.mubr.msk.f32.vlgmr.msra.gmra.mrb[134].mxu0 %vm70_vm2, %v17509_v0 }
 0x89a   :  { %12846 = vmatpush3.bf16.msra.mxu0 %v12845_v43  ;;  %v15466_v41 = vpop.f32.mrb[165].mxu0  ;;  %11715 = vmatprep.mubr.msk.f32.mxu0 %vm13603_vm0, %v17402_v3 }
 0x89b   :  { %12847 = vmatprep.subr.bf16.mxu0 %v17416_v37 }
 0x89d   :  { %v4256_v52 = vpop.f32.mrb[166].mxu0  ;;  %11716 = vmatmul.mubr.msk.f32.gmra.mrb[136].mxu0 %vm70_vm2, %v17510_v35  ;;  %v17513_v35 = vld [vmem:[#allocation60_spill] sm:$0xff] }
 0x89e   :  { %v12857_v54 = vpack.c.bf16 %v4256_v52, %v4250_v39  ;;  %12849 = vmatpush3.bf16.msra.mxu0 %v12848_v45  ;;  %v15473_v36 = vpop.f32.mrb[167].mxu0  ;;  %11718 = vmatprep.mubr.msk.f32.mxu0 %vm13603_vm0, %v17402_v3  ;;  %v17512_v39 = vld [vmem:[#allocation58_spill] sm:$0xff] }
 0x89f   :  { %11735 = vmatprep.subr.mxu0 %v17402_v3 }
 0x8a1   :  { %v4262_v38 = vpop.f32.mrb[168].mxu0  ;;  %11719 = vmatmul.mubr.msk.f32.gmra.mrb[138].mxu0 %vm70_vm2, %v17511_v62 }
 0x8a2   :  { %11736 = vmatpush3.msra.mxu0 %v4179_v51  ;;  %v15482_v0 = vpop.f32.mrb[169].mxu0  ;;  %11721 = vmatprep.mubr.msk.f32.mxu0 %vm13603_vm0, %v17402_v3 }
 0x8a3   :  { %12850 = vmatprep.subr.bf16.mxu0 %v17416_v37 }
 0x8a5   :  { %v4268_v45 = vpop.f32.mrb[170].mxu0  ;;  %11722 = vmatmul.mubr.msk.f32.gmra.mrb[140].mxu0 %vm70_vm2, %v17512_v39  ;;  %v17517_v39 = vld [vmem:[#allocation59_spill] sm:$0xff] }
 0x8a6   :  { %v12860_v52 = vpack.c.bf16 %v4268_v45, %v4262_v38  ;;  %v15489_v43 = vpop.f32.mrb[171].mxu0  ;;  %11724 = vmatprep.mubr.msk.f32.mxu0 %vm13603_vm0, %v17402_v3  ;;  %v17514_v38 = vld [vmem:[#allocation53_spill] sm:$0xff] }
 0x8a9   :  { %v4274_v62 = vpop.f32.mrb[172].mxu0  ;;  %11725 = vmatmul.mubr.msk.f32.gmra.mrb[142].mxu0 %vm70_vm2, %v17513_v35  ;;  %v17515_v35 = vld [vmem:[#allocation55_spill] sm:$0xff] }
 0x8aa   :  { %v15497_v59 = vpop.f32.mrb[173].mxu0  ;;  %11737 = vmatprep.mubr.msk.f32.mxu0 %vm13603_vm0, %v17402_v3 }
 0x8ad   :  { %v15501_v63 = vpop.f32.mrb[174].mxu0  ;;  %11738 = vmatmul.mubr.msk.f32.vlgmr.msra.gmra.mrb[134].mxu0 %vm70_vm2, %v17514_v38 }
 0x8ae   :  { %12852 = vmatpush3.bf16.msra.mxu0 %v12851_v19  ;;  %v15505_v45 = vpop.f32.mrb[175].mxu0  ;;  %11740 = vmatprep.mubr.msk.f32.mxu0 %vm13603_vm0, %v17402_v3  ;;  %v17519_v19 = vld [vmem:[#allocation62_spill] sm:$0xff] }
 0x8af   :  { %12853 = vmatprep.subr.bf16.mxu0 %v17416_v37 }
 0x8b1   :  { %v15510_v51 = vpop.f32.mrb[176].mxu0  ;;  %11741 = vmatmul.mubr.msk.f32.gmra.mrb[136].mxu0 %vm70_vm2, %v17515_v35 }
 0x8b2   :  { %12855 = vmatpush3.bf16.msra.mxu0 %v12854_v27  ;;  %v15516_v55 = vpop.f32.mrb[177].mxu0  ;;  %11743 = vmatprep.mubr.msk.f32.mxu0 %vm13603_vm0, %v17402_v3  ;;  %v17529_v40 = vpack.c.bf16 %v15510_v51, %v15501_v63 }
 0x8b3   :  { %11760 = vmatprep.subr.mxu0 %v17402_v3 }
 0x8b5   :  { %v15523_v38 = vpop.f32.mrb[178].mxu0  ;;  %11744 = vmatmul.mubr.msk.f32.gmra.mrb[138].mxu0 %vm70_vm2, %v17516_v46 }
 0x8b6   :  { %11761 = vmatpush3.msra.mxu0 %v4181_v5  ;;  %v15527_v35 = vpop.f32.mrb[179].mxu0  ;;  %11746 = vmatprep.mubr.msk.f32.mxu0 %vm13603_vm0, %v17402_v3 }
 0x8b7   :  { %12856 = vmatprep.subr.bf16.mxu0 %v17416_v37 }
 0x8b9   :  { %v15532_v27 = vpop.f32.mrb[180].mxu0  ;;  %11747 = vmatmul.mubr.msk.f32.gmra.mrb[140].mxu0 %vm70_vm2, %v17517_v39 }
 0x8ba   :  { %v15538_v61 = vpop.f32.mrb[181].mxu0  ;;  %11749 = vmatprep.mubr.msk.f32.mxu0 %vm13603_vm0, %v17402_v3 }
 0x8bd   :  { %v15544_v46 = vpop.f32.mrb[182].mxu0  ;;  %11750 = vmatmul.mubr.msk.f32.gmra.mrb[142].mxu0 %vm70_vm2, %v17518_v44  ;;  %v17520_v44 = vld [vmem:[#allocation63_spill] sm:$0xff] }
 0x8be   :  { %v15548_v53 = vpop.f32.mrb[183].mxu0  ;;  %11762 = vmatprep.mubr.msk.f32.mxu0 %vm13603_vm0, %v17402_v3 }
 0x8c1   :  { %v15552_v39 = vpop.f32.mrb[184].mxu0  ;;  %11763 = vmatmul.mubr.msk.f32.vlgmr.msra.gmra.mrb[134].mxu0 %vm70_vm2, %v17519_v19 }
 0x8c2   :  { %12858 = vmatpush3.bf16.msra.mxu0 %v12857_v54  ;;  %v15556_v15 = vpop.f32.mrb[185].mxu0  ;;  %11765 = vmatprep.mubr.msk.f32.mxu0 %vm13603_vm0, %v17402_v3  ;;  %v17524_v54 = vpack.c.bf16 %v15473_v36, %v15466_v41 }
 0x8c3   :  { %12859 = vmatprep.subr.bf16.mxu0 %v17416_v37 }
 0x8c5   :  { %v15561_v5 = vpop.f32.mrb[186].mxu0  ;;  %11766 = vmatmul.mubr.msk.f32.gmra.mrb[136].mxu0 %vm70_vm2, %v17520_v44 }
 0x8c6   :  { %12861 = vmatpush3.bf16.msra.mxu0 %v12860_v52  ;;  %v15567_v1 = vpop.f32.mrb[187].mxu0  ;;  %11768 = vmatprep.mubr.msk.f32.mxu0 %vm13603_vm0, %v17402_v3 }
 0x8c7   :  { %11785 = vmatprep.subr.mxu0 %v17402_v3 }
 0x8c9   :  { %v15574_v19 = vpop.f32.mrb[188].mxu0  ;;  %11769 = vmatmul.mubr.msk.f32.gmra.mrb[138].mxu0 %vm70_vm2, %v17521_v13 }
 0x8ca   :  { %11786 = vmatpush3.msra.mxu0 %v4274_v62  ;;  %v15578_v44 = vpop.f32.mrb[189].mxu0  ;;  %11771 = vmatprep.mubr.msk.f32.mxu0 %vm13603_vm0, %v17402_v3 }
 0x8cb   :  { %12862 = vmatprep.subr.bf16.mxu0 %v17416_v37 }
 0x8cd   :  { %v15583_v52 = vpop.f32.mrb[190].mxu0  ;;  %11772 = vmatmul.mubr.msk.f32.gmra.mrb[140].mxu0 %vm70_vm2, %v17522_v60 }
 0x8ce   :  { %v15589_v2 = vpop.f32.mrb[191].mxu0  ;;  %11774 = vmatprep.mubr.msk.f32.mxu0 %vm13603_vm0, %v17402_v3 }
 0x8d1   :  { %v15595_v13 = vpop.f32.mrb[192].mxu0  ;;  %11775 = vmatmul.mubr.msk.f32.gmra.mrb[142].mxu0 %vm70_vm2, %v17523_v48 }
 0x8d2   :  { %v15599_v50 = vpop.f32.mrb[193].mxu0  ;;  %11787 = vmatprep.mubr.msk.f32.mxu0 %vm13603_vm0, %v17402_v3 }
 0x8d5   :  { %v15603_v60 = vpop.f32.mrb[194].mxu0  ;;  %11788 = vmatmul.mubr.msk.f32.vlgmr.msra.gmra.mrb[134].mxu0 %vm70_vm2, %v14540_v49  ;;  %v17525_v49 = vpack.c.bf16 %v15489_v43, %v15482_v0  ;;  %v17526_v0 = vld [vmem:[#allocation70_spill] sm:$0xff]  ;;  %v17528_v43 = vld [vmem:[#allocation4_spill] sm:$0xff] }
 0x8d6   :  { %12864 = vmatpush3.bf16.msra.mxu0 %v17524_v54  ;;  %v15610_v62 = vpop.f32.mrb[195].mxu0  ;;  %11790 = vmatprep.mubr.msk.f32.mxu0 %vm13603_vm0, %v17402_v3 }
 0x8d7   :  { %12865 = vmatprep.subr.bf16.mxu0 %v17416_v37 }
 0x8d9   :  { %v15615_v48 = vpop.f32.mrb[196].mxu0  ;;  %11791 = vmatmul.mubr.msk.f32.gmra.mrb[136].mxu0 %vm70_vm2, %v14556_v42  ;;  %v17527_v42 = vld [vmem:[#allocation71_spill] sm:$0xff] }
 0x8da   :  { %12867 = vmatpush3.bf16.msra.mxu0 %v17525_v49  ;;  %v15624_v41 = vpop.f32.mrb[197].mxu0  ;;  %11793 = vmatprep.mubr.msk.f32.mxu0 %vm13603_vm0, %v17402_v3 }
 0x8db   :  { %11810 = vmatprep.subr.mxu0 %v17402_v3 }
 0x8dd   :  { %v15631_v54 = vpop.f32.mrb[198].mxu0  ;;  %11794 = vmatmul.mubr.msk.f32.gmra.mrb[138].mxu0 %vm70_vm2, %v14576_v34 }
 0x8de   :  { %11811 = vmatpush3.msra.mxu0 %v15497_v59  ;;  %v15636_v33 = vpop.f32.mrb[199].mxu0  ;;  %11796 = vmatprep.mubr.msk.f32.mxu0 %vm13603_vm0, %v17402_v3 }
 0x8df   :  { %12868 = vmatprep.subr.bf16.mxu0 %v17416_v37 }
 0x8e1   :  { %v15641_v49 = vpop.f32.mrb[200].mxu0  ;;  %11797 = vmatmul.mubr.msk.f32.gmra.mrb[140].mxu0 %vm70_vm2, %v17526_v0 }
 0x8e2   :  { %v15647_v36 = vpop.f32.mrb[201].mxu0  ;;  %11799 = vmatprep.mubr.msk.f32.mxu0 %vm13603_vm0, %v17402_v3 }
 0x8e5   :  { %v15653_v34 = vpop.f32.mrb[202].mxu0  ;;  %11800 = vmatmul.mubr.msk.f32.gmra.mrb[142].mxu0 %vm70_vm2, %v17527_v42 }
 0x8e6   :  { %v15657_v58 = vpop.f32.mrb[203].mxu0  ;;  %11812 = vmatprep.mubr.msk.f32.mxu0 %vm13603_vm0, %v17402_v3 }
 0x8e9   :  { %v15661_v0 = vpop.f32.mrb[204].mxu0  ;;  %11813 = vmatmul.mubr.msk.f32.vlgmr.msra.gmra.mrb[134].mxu0 %vm70_vm2, %v17528_v43  ;;  %v17532_v43 = vpack.c.bf16 %v15532_v27, %v15523_v38  ;;  %v17536_v27 = vld [vmem:[#allocation8_spill] sm:$0xff] }
 0x8ea   :  { %12870 = vmatpush3.bf16.msra.mxu0 %v17529_v40  ;;  %v15668_v59 = vpop.f32.mrb[205].mxu0  ;;  %11815 = vmatprep.mubr.msk.f32.mxu0 %vm13603_vm0, %v17402_v3 }
 0x8eb   :  { %17530 = vst [vmem:[#allocation2_spill] sm:$0xff] %v15668_v59  ;;  %12871 = vmatprep.subr.bf16.mxu0 %v17416_v37 }
 0x8ed   :  { %v15673_v42 = vpop.f32.mrb[206].mxu0  ;;  %11816 = vmatmul.mubr.msk.f32.gmra.mrb[136].mxu0 %vm70_vm2, %v17531_v47  ;;  %v17534_v47 = vld [vmem:[#allocation7_spill] sm:$0xff] }
 0x8ee   :  { %12873 = vmatpush3.bf16.msra.mxu0 %v17532_v43  ;;  %v15682_v40 = vpop.f32.mrb[207].mxu0  ;;  %11818 = vmatprep.mubr.msk.f32.mxu0 %vm13603_vm0, %v17402_v3  ;;  %v17539_v43 = vld [vmem:[#allocation5_spill] sm:$0xff] }
 0x8ef   :  { %17533 = vst [vmem:[#allocation3_spill] sm:$0xff] %v15682_v40  ;;  %11835 = vmatprep.subr.mxu0 %v17402_v3  ;;  %v17540_v40 = vpack.c.bf16 %v15516_v55, %v15505_v45 }
 0x8f1   :  { %v15689_v51 = vpop.f32.mrb[208].mxu0  ;;  %11819 = vmatmul.mubr.msk.f32.gmra.mrb[138].mxu0 %vm70_vm2, %v17534_v47 }
 0x8f2   :  { %11836 = vmatpush3.msra.mxu0 %v15544_v46  ;;  %v15694_v16 = vpop.f32.mrb[209].mxu0  ;;  %11821 = vmatprep.mubr.msk.f32.mxu0 %vm13603_vm0, %v17402_v3 }
 0x8f3   :  { %17535 = vst [vmem:[#allocation72_spill] sm:$0xff] %v15694_v16  ;;  %12874 = vmatprep.subr.bf16.mxu0 %v17416_v37 }
 0x8f5   :  { %v15699_v38 = vpop.f32.mrb[210].mxu0  ;;  %11822 = vmatmul.mubr.msk.f32.gmra.mrb[140].mxu0 %vm70_vm2, %v17536_v27 }
 0x8f6   :  { %v15705_v63 = vpop.f32.mrb[211].mxu0  ;;  %11824 = vmatprep.mubr.msk.f32.mxu0 %vm13603_vm0, %v17402_v3 }
 0x8f9   :  { %v15711_v47 = vpop.f32.mrb[212].mxu0  ;;  %11825 = vmatmul.mubr.msk.f32.gmra.mrb[142].mxu0 %vm70_vm2, %v17537_v20 }
 0x8fa   :  { %v15715_v59 = vpop.f32.mrb[213].mxu0  ;;  %11837 = vmatprep.mubr.msk.f32.mxu0 %vm13603_vm0, %v17402_v3 }
 0x8fb   :  { %17538 = vst [vmem:[#allocation73_spill] sm:$0xff] %v15715_v59  ;;  %v17542_v59 = vld [vmem:[#allocation10_spill] sm:$0xff] }
 0x8fd   :  { %v15719_v27 = vpop.f32.mrb[214].mxu0  ;;  %11838 = vmatmul.mubr.msk.f32.vlgmr.msra.gmra.mrb[134].mxu0 %vm70_vm2, %v17539_v43  ;;  %v17543_v43 = vpack.c.bf16 %v15538_v61, %v15527_v35  ;;  %v17547_v35 = vld [vmem:[#allocation12_spill] sm:$0xff] }
 0x8fe   :  { %12876 = vmatpush3.bf16.msra.mxu0 %v17540_v40  ;;  %v15726_v46 = vpop.f32.mrb[215].mxu0  ;;  %11840 = vmatprep.mubr.msk.f32.mxu0 %vm13603_vm0, %v17402_v3 }
 0x8ff   :  { %17541 = vst [vmem:[#allocation74_spill] sm:$0xff] %v15726_v46  ;;  %12877 = vmatprep.subr.bf16.mxu0 %v17416_v37  ;;  %v17548_v46 = vld [vmem:[#allocation13_spill] sm:$0xff] }
 0x901   :  { %v15731_v20 = vpop.f32.mrb[216].mxu0  ;;  %11841 = vmatmul.mubr.msk.f32.gmra.mrb[136].mxu0 %vm70_vm2, %v17542_v59  ;;  %v17546_v59 = vld [vmem:[#allocation11_spill] sm:$0xff] }
 0x902   :  { %12879 = vmatpush3.bf16.msra.mxu0 %v17543_v43  ;;  %v15740_v55 = vpop.f32.mrb[217].mxu0  ;;  %11843 = vmatprep.mubr.msk.f32.mxu0 %vm13603_vm0, %v17402_v3  ;;  %v17550_v43 = vld [vmem:[#allocation14_spill] sm:$0xff] }
 0x903   :  { %17544 = vst [vmem:[#allocation75_spill] sm:$0xff] %v15740_v55  ;;  %11860 = vmatprep.subr.mxu0 %v17402_v3 }
 0x905   :  { %v15747_v40 = vpop.f32.mrb[218].mxu0  ;;  %11844 = vmatmul.mubr.msk.f32.gmra.mrb[138].mxu0 %vm70_vm2, %v17546_v59 }
 0x906   :  { %17545 = vst [vmem:[#allocation76_spill] sm:$0xff] %v15747_v40  ;;  %11861 = vmatpush3.msra.mxu0 %v15548_v53  ;;  %v15752_v16 = vpop.f32.mrb[219].mxu0  ;;  %11846 = vmatprep.mubr.msk.f32.mxu0 %vm13603_vm0, %v17402_v3  ;;  %v17551_v40 = vpack.c.bf16 %v15561_v5, %v15552_v39 }
 0x907   :  { %12880 = vmatprep.subr.bf16.mxu0 %v17416_v37 }
 0x909   :  { %v15757_v61 = vpop.f32.mrb[220].mxu0  ;;  %11847 = vmatmul.mubr.msk.f32.gmra.mrb[140].mxu0 %vm70_vm2, %v17547_v35 }
 0x90a   :  { %v15763_v45 = vpop.f32.mrb[221].mxu0  ;;  %11849 = vmatprep.mubr.msk.f32.mxu0 %vm13603_vm0, %v17402_v3 }
 0x90d   :  { %v15769_v59 = vpop.f32.mrb[222].mxu0  ;;  %11850 = vmatmul.mubr.msk.f32.gmra.mrb[142].mxu0 %vm70_vm2, %v17548_v46 }
 0x90e   :  { %v15773_v55 = vpop.f32.mrb[223].mxu0  ;;  %11862 = vmatprep.mubr.msk.f32.mxu0 %vm13603_vm0, %v17402_v3 }
 0x90f   :  { %17549 = vst [vmem:[#allocation77_spill] sm:$0xff] %v15773_v55 }
 0x911   :  { %v15777_v35 = vpop.f32.mrb[224].mxu0  ;;  %11863 = vmatmul.mubr.msk.f32.vlgmr.msra.gmra.mrb[134].mxu0 %vm70_vm2, %v17550_v43  ;;  %v17552_v43 = vpack.c.bf16 %v15583_v52, %v15574_v19 }
 0x912   :  { %12882 = vmatpush3.bf16.msra.mxu0 %v17551_v40  ;;  %v11664_v53 = vpop.f32.mrb[225].mxu0  ;;  %11865 = vmatprep.mubr.msk.f32.mxu0 %vm13603_vm0, %v17402_v3  ;;  %v17553_v40 = vld [vmem:[#allocation15_spill] sm:$0xff] }
 0x913   :  { %12883 = vmatprep.subr.bf16.mxu0 %v17416_v37 }
 0x915   :  { %v15787_v46 = vpop.f32.mrb[226].mxu0  ;;  %11866 = vmatmul.mubr.msk.f32.gmra.mrb[136].mxu0 %vm70_vm2, %v14088_v4 }
 0x916   :  { %v12929_v55 = vpack.c.bf16 %v15787_v46, %v15777_v35  ;;  %12885 = vmatpush3.bf16.msra.mxu0 %v17552_v43  ;;  %v11667_v39 = vpop.f32.mrb[227].mxu0  ;;  %11868 = vmatprep.mubr.msk.f32.mxu0 %vm13603_vm0, %v17402_v3  ;;  %v17593_v46 = vld [vmem:[#allocation35_spill] sm:$0xff]  ;;  %v17595_v35 = vld [vmem:[#allocation37_spill] sm:$0xff] }
 0x917   :  { %11885 = vmatprep.subr.mxu0 %v17402_v3 }
 0x919   :  { %v15799_v5 = vpop.f32.mrb[228].mxu0  ;;  %11869 = vmatmul.mubr.msk.f32.gmra.mrb[138].mxu0 %vm70_vm2, %v17553_v40 }
 0x91a   :  { %11886 = vmatpush3.msra.mxu0 %v15595_v13  ;;  %v11670_v53 = vpop.f32.mrb[229].mxu0  ;;  %11871 = vmatprep.mubr.msk.f32.mxu0 %vm13603_vm0, %v17402_v3 }
 0x91b   :  { %12886 = vmatprep.subr.bf16.mxu0 %v17416_v37  ;;  %v17554_v53 = vpack.c.bf16 %v15567_v1, %v15556_v15  ;;  %v17566_v15 = vld [vmem:[#allocation72_spill] sm:$0xff] }
 0x91d   :  { %v15807_v19 = vpop.f32.mrb[230].mxu0  ;;  %11872 = vmatmul.mubr.msk.f32.gmra.mrb[140].mxu0 %vm70_vm2, %v14097_v6 }
 0x91e   :  { %v12932_v52 = vpack.c.bf16 %v15807_v19, %v15799_v5  ;;  %v11673_v43 = vpop.f32.mrb[231].mxu0  ;;  %11874 = vmatprep.mubr.msk.f32.mxu0 %vm13603_vm0, %v17402_v3  ;;  %v17596_v5 = vld [vmem:[#allocation38_spill] sm:$0xff]  ;;  %v17597_v19 = vld [vmem:[#allocation39_spill] sm:$0xff] }
 0x91f   :  { %v17555_v43 = vpack.c.bf16 %v15589_v2, %v15578_v44  ;;  %v17557_v2 = vpack.c.bf16 %v15641_v49, %v15631_v54  ;;  %v17567_v44 = vpack.c.bf16 %v15705_v63, %v17566_v15  ;;  %v17571_v54 = vld [vmem:[#allocation21_spill] sm:$0xff]  ;;  %v17572_v49 = vld [vmem:[#allocation22_spill] sm:$0xff]  ;;  %v17574_v63 = vld [vmem:[#allocation23_spill] sm:$0xff] }
 0x921   :  { %v15815_v39 = vpop.f32.mrb[232].mxu0  ;;  %11875 = vmatmul.mubr.msk.f32.gmra.mrb[142].mxu0 %vm70_vm2, %v14103_v7 }
 0x922   :  { %v11676_v13 = vpop.f32.mrb[233].mxu0  ;;  %11887 = vmatprep.mubr.msk.f32.mxu0 %vm13603_vm0, %v17402_v3 }
 0x923   :  { %v17577_v13 = vld [vmem:[#allocation24_spill] sm:$0xff] }
 0x925   :  { %11888 = vmatmul.mubr.msk.f32.vlgmr.msra.gmra.mrb[134].mxu0 %vm70_vm2, %v14106_v8 }
 0x926   :  { %12888 = vmatpush3.bf16.msra.mxu0 %v17554_v53  ;;  %11890 = vmatprep.mubr.msk.f32.mxu0 %vm13603_vm0, %v17402_v3  ;;  %v17582_v53 = vld [vmem:[#allocation74_spill] sm:$0xff] }
 0x927   :  { %12889 = vmatprep.subr.bf16.mxu0 %v17416_v37 }
 0x929   :  { %11891 = vmatmul.mubr.msk.f32.gmra.mrb[136].mxu0 %vm70_vm2, %v14111_v9 }
 0x92a   :  { %12891 = vmatpush3.bf16.msra.mxu0 %v17555_v43  ;;  %11893 = vmatprep.mubr.msk.f32.mxu0 %vm13603_vm0, %v17402_v3 }
 0x92b   :  { %11910 = vmatprep.subr.mxu0 %v17402_v3 }
 0x92d   :  { %11894 = vmatmul.mubr.msk.f32.gmra.mrb[138].mxu0 %vm70_vm2, %v14114_v10 }
 0x92e   :  { %11911 = vmatpush3.msra.mxu0 %v15599_v50  ;;  %11896 = vmatprep.mubr.msk.f32.mxu0 %vm13603_vm0, %v17402_v3  ;;  %v17556_v50 = vpack.c.bf16 %v15615_v48, %v15603_v60  ;;  %v17559_v48 = vpack.c.bf16 %v15647_v36, %v15636_v33  ;;  %v17561_v33 = vpack.c.bf16 %v15699_v38, %v15689_v51  ;;  %v17565_v60 = vld [vmem:[#allocation18_spill] sm:$0xff]  ;;  %v17570_v36 = vld [vmem:[#allocation20_spill] sm:$0xff] }
 0x92f   :  { %12892 = vmatprep.subr.bf16.mxu0 %v17416_v37  ;;  %v17575_v51 = vld [vmem:[#allocation76_spill] sm:$0xff] }
 0x930   :  { %v17576_v38 = vpack.c.bf16 %v15757_v61, %v17575_v51  ;;  %v17580_v61 = vld [vmem:[#allocation27_spill] sm:$0xff] }
 0x931   :  { %11897 = vmatmul.mubr.msk.f32.gmra.mrb[140].mxu0 %vm70_vm2, %v14121_v11 }
 0x932   :  { %11899 = vmatprep.mubr.msk.f32.mxu0 %vm13603_vm0, %v17402_v3 }
 0x935   :  { %11900 = vmatmul.mubr.msk.f32.gmra.mrb[142].mxu0 %vm70_vm2, %v14124_v12 }
 0x936   :  { %11912 = vmatprep.mubr.msk.f32.mxu0 %vm13603_vm0, %v17402_v3 }
 0x939   :  { %11913 = vmatmul.mubr.msk.f32.vlgmr.msra.gmra.mrb[134].mxu0 %vm70_vm2, %v14130_v14 }
 0x93a   :  { %12894 = vmatpush3.bf16.msra.mxu0 %v17556_v50  ;;  %11915 = vmatprep.mubr.msk.f32.mxu0 %vm13603_vm0, %v17402_v3  ;;  %v17584_v50 = vld [vmem:[#allocation28_spill] sm:$0xff] }
 0x93b   :  { %12895 = vmatprep.subr.bf16.mxu0 %v17416_v37 }
 0x93d   :  { %11916 = vmatmul.mubr.msk.f32.gmra.mrb[136].mxu0 %vm70_vm2, %v14133_v17 }
 0x93e   :  { %12897 = vmatpush3.bf16.msra.mxu0 %v17557_v2  ;;  %11918 = vmatprep.mubr.msk.f32.mxu0 %vm13603_vm0, %v17402_v3  ;;  %v17585_v2 = vpack.c.bf16 %v15763_v45, %v15752_v16  ;;  %v17589_v16 = vld [vmem:[#allocation31_spill] sm:$0xff]  ;;  %v17590_v45 = vld [vmem:[#allocation32_spill] sm:$0xff] }
 0x93f   :  { %11935 = vmatprep.subr.mxu0 %v17402_v3 }
 0x941   :  { %11919 = vmatmul.mubr.msk.f32.gmra.mrb[138].mxu0 %vm70_vm2, %v14138_v18 }
 0x942   :  { %11936 = vmatpush3.msra.mxu0 %v15653_v34  ;;  %11921 = vmatprep.mubr.msk.f32.mxu0 %vm13603_vm0, %v17402_v3  ;;  %v17558_v34 = vpack.c.bf16 %v15624_v41, %v15610_v62  ;;  %v17568_v62 = vld [vmem:[#allocation19_spill] sm:$0xff]  ;;  %v17569_v41 = vld [vmem:[#allocation73_spill] sm:$0xff] }
 0x943   :  { %12898 = vmatprep.subr.bf16.mxu0 %v17416_v37 }
 0x945   :  { %11922 = vmatmul.mubr.msk.f32.gmra.mrb[140].mxu0 %vm70_vm2, %v14141_v21 }
 0x946   :  { %11924 = vmatprep.mubr.msk.f32.mxu0 %vm13603_vm0, %v17402_v3 }
 0x949   :  { %11925 = vmatmul.mubr.msk.f32.gmra.mrb[142].mxu0 %vm70_vm2, %v14146_v22 }
 0x94a   :  { %11937 = vmatprep.mubr.msk.f32.mxu0 %vm13603_vm0, %v17402_v3 }
 0x94d   :  { %11938 = vmatmul.mubr.msk.f32.vlgmr.msra.gmra.mrb[134].mxu0 %vm70_vm2, %v14149_v23 }
 0x94e   :  { %12900 = vmatpush3.bf16.msra.mxu0 %v17558_v34  ;;  %11940 = vmatprep.mubr.msk.f32.mxu0 %vm13603_vm0, %v17402_v3  ;;  %v17586_v34 = vld [vmem:[#allocation29_spill] sm:$0xff] }
 0x94f   :  { %12901 = vmatprep.subr.bf16.mxu0 %v17416_v37 }
 0x951   :  { %11941 = vmatmul.mubr.msk.f32.gmra.mrb[136].mxu0 %vm70_vm2, %v14156_v24 }
 0x952   :  { %12903 = vmatpush3.bf16.msra.mxu0 %v17559_v48  ;;  %11943 = vmatprep.mubr.msk.f32.mxu0 %vm13603_vm0, %v17402_v3  ;;  %v17587_v48 = vld [vmem:[#allocation77_spill] sm:$0xff] }
 0x953   :  { %11960 = vmatprep.subr.mxu0 %v17402_v3 }
 0x955   :  { %11944 = vmatmul.mubr.msk.f32.gmra.mrb[138].mxu0 %vm70_vm2, %v14159_v25 }
 0x956   :  { %11961 = vmatpush3.msra.mxu0 %v15657_v58  ;;  %11946 = vmatprep.mubr.msk.f32.mxu0 %vm13603_vm0, %v17402_v3  ;;  %v17560_v58 = vpack.c.bf16 %v15673_v42, %v15661_v0  ;;  %v17562_v42 = vld [vmem:[#allocation3_spill] sm:$0xff]  ;;  %v17573_v0 = vpack.c.bf16 %v15731_v20, %v15719_v27  ;;  %v17578_v20 = vld [vmem:[#allocation25_spill] sm:$0xff]  ;;  %v17579_v27 = vld [vmem:[#allocation26_spill] sm:$0xff] }
 0x957   :  { %12904 = vmatprep.subr.bf16.mxu0 %v17416_v37 }
 0x959   :  { %11947 = vmatmul.mubr.msk.f32.gmra.mrb[140].mxu0 %vm70_vm2, %v14165_v26 }
 0x95a   :  { %11949 = vmatprep.mubr.msk.f32.mxu0 %vm13603_vm0, %v17402_v3 }
 0x95d   :  { %11950 = vmatmul.mubr.msk.f32.gmra.mrb[142].mxu0 %vm70_vm2, %v14168_v28 }
 0x95e   :  { %11962 = vmatprep.mubr.msk.f32.mxu0 %vm13603_vm0, %v17402_v3 }
 0x961   :  { %11963 = vmatmul.mubr.msk.f32.vlgmr.msra.gmra.mrb[134].mxu0 %vm70_vm2, %v14173_v29 }
 0x962   :  { %12906 = vmatpush3.bf16.msra.mxu0 %v17560_v58  ;;  %11965 = vmatprep.mubr.msk.f32.mxu0 %vm13603_vm0, %v17402_v3  ;;  %v17588_v58 = vld [vmem:[#allocation30_spill] sm:$0xff] }
 0x963   :  { %12907 = vmatprep.subr.bf16.mxu0 %v17416_v37 }
 0x965   :  { %11966 = vmatmul.mubr.msk.f32.gmra.mrb[136].mxu0 %vm70_vm2, %v14176_v30 }
 0x966   :  { %12909 = vmatpush3.bf16.msra.mxu0 %v17561_v33  ;;  %11968 = vmatprep.mubr.msk.f32.mxu0 %vm13603_vm0, %v17402_v3  ;;  %v17591_v33 = vld [vmem:[#allocation33_spill] sm:$0xff] }
 0x967   :  { %11985 = vmatprep.subr.mxu0 %v17402_v3 }
 0x969   :  { %11969 = vmatmul.mubr.msk.f32.gmra.mrb[138].mxu0 %vm70_vm2, %v14181_v31 }
 0x96a   :  { %11986 = vmatpush3.msra.mxu0 %v15711_v47  ;;  %11971 = vmatprep.mubr.msk.f32.mxu0 %vm13603_vm0, %v17402_v3  ;;  %v17563_v47 = vld [vmem:[#allocation2_spill] sm:$0xff] }
 0x96b   :  { %12910 = vmatprep.subr.bf16.mxu0 %v17416_v37  ;;  %v17564_v1 = vpack.c.bf16 %v17562_v42, %v17563_v47  ;;  %v17592_v42 = vld [vmem:[#allocation34_spill] sm:$0xff] }
 0x96c   :  { %v10133_v47 = vld [vmem:[%s17208_s9] ss:$0 sm:$0xff] }
 0x96d   :  { %11972 = vmatmul.mubr.msk.f32.gmra.mrb[140].mxu0 %vm70_vm2, %v14184_v32 }
 0x96e   :  { %11974 = vmatprep.mubr.msk.f32.mxu0 %vm13603_vm0, %v17402_v3 }
 0x971   :  { %11975 = vmatmul.mubr.msk.f32.gmra.mrb[142].mxu0 %vm70_vm2, %v17457_v56 }
 0x972   :  { %11987 = vmatprep.mubr.msk.f32.mxu0 %vm13603_vm0, %v17402_v3 }
 0x975   :  { %11988 = vmatmul.mubr.msk.f32.vlgmr.msra.gmra.mrb[134].mxu0 %vm70_vm2, %v17458_v57 }
 0x976   :  { %12912 = vmatpush3.bf16.msra.mxu0 %v17564_v1  ;;  %11990 = vmatprep.mubr.msk.f32.mxu0 %vm13603_vm0, %v17402_v3 }
 0x977   :  { %12913 = vmatprep.subr.bf16.mxu0 %v17416_v37 }
 0x979   :  { %11991 = vmatmul.mubr.msk.f32.gmra.mrb[136].mxu0 %vm70_vm2, %v17565_v60 }
 0x97a   :  { %12915 = vmatpush3.bf16.msra.mxu0 %v17567_v44  ;;  %11993 = vmatprep.mubr.msk.f32.mxu0 %vm13603_vm0, %v17402_v3 }
 0x97b   :  { %12010 = vmatprep.subr.mxu0 %v17402_v3 }
 0x97d   :  { %11994 = vmatmul.mubr.msk.f32.gmra.mrb[138].mxu0 %vm70_vm2, %v17568_v62  ;;  %v17636_v62 = vld [vmem:[#allocation6_spill] sm:$0xff] }
 0x97e   :  { %12011 = vmatpush3.msra.mxu0 %v17569_v41  ;;  %11996 = vmatprep.mubr.msk.f32.mxu0 %vm13603_vm0, %v17402_v3 }
 0x97f   :  { %12916 = vmatprep.subr.bf16.mxu0 %v17416_v37 }
 0x981   :  { %11997 = vmatmul.mubr.msk.f32.gmra.mrb[140].mxu0 %vm70_vm2, %v17570_v36 }
 0x982   :  { %11999 = vmatprep.mubr.msk.f32.mxu0 %vm13603_vm0, %v17402_v3 }
 0x985   :  { %12000 = vmatmul.mubr.msk.f32.gmra.mrb[142].mxu0 %vm70_vm2, %v17571_v54 }
 0x986   :  { %12012 = vmatprep.mubr.msk.f32.mxu0 %vm13603_vm0, %v17402_v3 }
 0x989   :  { %12013 = vmatmul.mubr.msk.f32.vlgmr.msra.gmra.mrb[134].mxu0 %vm70_vm2, %v17572_v49  ;;  %v17632_v49 = vld [vmem:[#allocation71_spill] sm:$0xff] }
 0x98a   :  { %12918 = vmatpush3.bf16.msra.mxu0 %v17573_v0  ;;  %12015 = vmatprep.mubr.msk.f32.mxu0 %vm13603_vm0, %v17402_v3 }
 0x98b   :  { %12919 = vmatprep.subr.bf16.mxu0 %v17416_v37 }
 0x98d   :  { %12016 = vmatmul.mubr.msk.f32.gmra.mrb[136].mxu0 %vm70_vm2, %v17574_v63 }
 0x98e   :  { %12921 = vmatpush3.bf16.msra.mxu0 %v17576_v38  ;;  %12018 = vmatprep.mubr.msk.f32.mxu0 %vm13603_vm0, %v17402_v3 }
 0x98f   :  { %12035 = vmatprep.subr.mxu0 %v17402_v3 }
 0x991   :  { %12019 = vmatmul.mubr.msk.f32.gmra.mrb[138].mxu0 %vm70_vm2, %v17577_v13  ;;  %v17628_v13 = vld [vmem:[#allocation68_spill] sm:$0xff] }
 0x992   :  { %12036 = vmatpush3.msra.mxu0 %v15769_v59  ;;  %12021 = vmatprep.mubr.msk.f32.mxu0 %vm13603_vm0, %v17402_v3  ;;  %v17581_v59 = vld [vmem:[#allocation75_spill] sm:$0xff] }
 0x993   :  { %12922 = vmatprep.subr.bf16.mxu0 %v17416_v37  ;;  %v17583_v43 = vpack.c.bf16 %v17581_v59, %v17582_v53 }
 0x995   :  { %12022 = vmatmul.mubr.msk.f32.gmra.mrb[140].mxu0 %vm70_vm2, %v17578_v20 }
 0x996   :  { %12024 = vmatprep.mubr.msk.f32.mxu0 %vm13603_vm0, %v17402_v3 }
 0x999   :  { %12025 = vmatmul.mubr.msk.f32.gmra.mrb[142].mxu0 %vm70_vm2, %v17579_v27 }
 0x99a   :  { %12037 = vmatprep.mubr.msk.f32.mxu0 %vm13603_vm0, %v17402_v3 }
 0x99d   :  { %12038 = vmatmul.mubr.msk.f32.vlgmr.msra.gmra.mrb[134].mxu0 %vm70_vm2, %v17580_v61  ;;  %v17625_v61 = vld [vmem:[#allocation66_spill] sm:$0xff] }
 0x99e   :  { %12924 = vmatpush3.bf16.msra.mxu0 %v17583_v43  ;;  %12040 = vmatprep.mubr.msk.f32.mxu0 %vm13603_vm0, %v17402_v3 }
 0x99f   :  { %12925 = vmatprep.subr.bf16.mxu0 %v17416_v37 }
 0x9a1   :  { %12041 = vmatmul.mubr.msk.f32.gmra.mrb[136].mxu0 %vm70_vm2, %v17584_v50 }
 0x9a2   :  { %12927 = vmatpush3.bf16.msra.mxu0 %v17585_v2  ;;  %12043 = vmatprep.mubr.msk.f32.mxu0 %vm13603_vm0, %v17402_v3 }
 0x9a3   :  { %12060 = vmatprep.subr.mxu0 %v17402_v3 }
 0x9a5   :  { %12044 = vmatmul.mubr.msk.f32.gmra.mrb[138].mxu0 %vm70_vm2, %v17586_v34  ;;  %v17623_v34 = vld [vmem:[#allocation64_spill] sm:$0xff] }
 0x9a6   :  { %12061 = vmatpush3.msra.mxu0 %v17587_v48  ;;  %12046 = vmatprep.mubr.msk.f32.mxu0 %vm13603_vm0, %v17402_v3 }
 0x9a7   :  { %12928 = vmatprep.subr.bf16.mxu0 %v17416_v37 }
 0x9a9   :  { %12047 = vmatmul.mubr.msk.f32.gmra.mrb[140].mxu0 %vm70_vm2, %v17588_v58 }
 0x9aa   :  { %12049 = vmatprep.mubr.msk.f32.mxu0 %vm13603_vm0, %v17402_v3 }
 0x9ad   :  { %12050 = vmatmul.mubr.msk.f32.gmra.mrb[142].mxu0 %vm70_vm2, %v17589_v16 }
 0x9ae   :  { %12062 = vmatprep.mubr.msk.f32.mxu0 %vm13603_vm0, %v17402_v3 }
 0x9b1   :  { %12063 = vmatmul.mubr.msk.f32.vlgmr.msra.gmra.mrb[134].mxu0 %vm70_vm2, %v17590_v45 }
 0x9b2   :  { %12930 = vmatpush3.bf16.msra.mxu0 %v12929_v55  ;;  %12065 = vmatprep.mubr.msk.f32.mxu0 %vm13603_vm0, %v17402_v3  ;;  %v17594_v55 = vld [vmem:[#allocation36_spill] sm:$0xff] }
 0x9b3   :  { %12931 = vmatprep.subr.bf16.mxu0 %v17416_v37 }
 0x9b5   :  { %12066 = vmatmul.mubr.msk.f32.gmra.mrb[136].mxu0 %vm70_vm2, %v17591_v33 }
 0x9b6   :  { %12933 = vmatpush3.bf16.msra.mxu0 %v12932_v52  ;;  %12068 = vmatprep.mubr.msk.f32.mxu0 %vm13603_vm0, %v17402_v3  ;;  %v17598_v52 = vld [vmem:[#allocation40_spill] sm:$0xff] }
 0x9b7   :  { %12085 = vmatprep.subr.mxu0 %v17402_v3 }
 0x9b9   :  { %12069 = vmatmul.mubr.msk.f32.gmra.mrb[138].mxu0 %vm70_vm2, %v17592_v42 }
 0x9ba   :  { %12086 = vmatpush3.msra.mxu0 %v15815_v39  ;;  %12071 = vmatprep.mubr.msk.f32.mxu0 %vm13603_vm0, %v17402_v3  ;;  %v17599_v39 = vld [vmem:[#allocation41_spill] sm:$0xff] }
 0x9bb   :  { %13048 = vmatprep.subr.bf16.mxu0 %v17416_v37 }
 0x9bd   :  { %12072 = vmatmul.mubr.msk.f32.gmra.mrb[140].mxu0 %vm70_vm2, %v17593_v46 }
 0x9be   :  { %12074 = vmatprep.mubr.msk.f32.mxu0 %vm13603_vm0, %v17402_v3 }
 0x9c1   :  { %12075 = vmatmul.mubr.msk.f32.gmra.mrb[142].mxu0 %vm70_vm2, %v17594_v55 }
 0x9c2   :  { %12087 = vmatprep.mubr.msk.f32.mxu0 %vm13603_vm0, %v17402_v3 }
 0x9c5   :  { %12088 = vmatmul.mubr.msk.f32.vlgmr.msra.gmra.mrb[134].mxu0 %vm70_vm2, %v17595_v35 }
 0x9c6   :  { %12090 = vmatprep.mubr.msk.f32.mxu0 %vm13603_vm0, %v17402_v3 }
 0x9c9   :  { %12091 = vmatmul.mubr.msk.f32.gmra.mrb[136].mxu0 %vm70_vm2, %v17596_v5 }
 0x9ca   :  { %12093 = vmatprep.mubr.msk.f32.mxu0 %vm13603_vm0, %v17402_v3 }
 0x9cd   :  { %12094 = vmatmul.mubr.msk.f32.gmra.mrb[138].mxu0 %vm70_vm2, %v17597_v19 }
 0x9ce   :  { %12096 = vmatprep.mubr.msk.f32.mxu0 %vm13603_vm0, %v17402_v3 }
 0x9d1   :  { %12097 = vmatmul.mubr.msk.f32.gmra.mrb[140].mxu0 %vm70_vm2, %v17598_v52 }
 0x9d2   :  { %12099 = vmatprep.mubr.msk.f32.mxu0 %vm13603_vm0, %v17402_v3 }
 0x9d5   :  { %12100 = vmatmul.mubr.msk.f32.gmra.mrb[142].mxu0 %vm70_vm2, %v17599_v39 }
 0x9d6   :  { %12648 = vmatprep.mubr.msk.f32.mxu0 %vm13603_vm0, %v17402_v3 }
 0xa98   :  { %v6430_v1 = vpop.f32.mrb[134].mxu0 }
 0xa99   :  { %v12089_v15 = vpop.f32.mrb[135].mxu0  ;;  %v13070_v44 = vadd.f32 %v10133_v47, %v6430_v1 }
 0xa9b   :  { %v6459_v38 = vmax.f32 %v13070_v44, 0.0 }
 0xa9c   :  { %v6435_v41 = vpop.f32.mrb[136].mxu0 }
 0xa9d   :  { %v13071_v0 = vadd.f32 %v10133_v47, %v6435_v41  ;;  %v12092_v51 = vpop.f32.mrb[137].mxu0  ;;  %v17600_v41 = vld [vmem:[#allocation16_spill] sm:$0xff] }
 0xa9e   :  { %v17605_v51 = vld [vmem:[#allocation46_spill] sm:$0xff] }
 0xa9f   :  { %v6460_v59 = vmax.f32 %v13071_v0, 0.0 }
 0xaa0   :  { %v6440_v53 = vpop.f32.mrb[138].mxu0 }
 0xaa1   :  { %v12935_v43 = vpack.c.bf16 %v6460_v59, %v6459_v38  ;;  %v12095_v2 = vpop.f32.mrb[139].mxu0  ;;  %v13072_v48 = vadd.f32 %v10133_v47, %v6440_v53 }
 0xaa3   :  { %12936 = vmatpush3.bf16.msra.mxu1 %v12935_v43  ;;  %v6461_v5 = vmax.f32 %v13072_v48, 0.0 }
 0xaa4   :  { %v6445_v39 = vpop.f32.mrb[140].mxu0  ;;  %12937 = vmatprep.subr.bf16.mxu1 %v17416_v37 }
 0xaa5   :  { %v13073_v52 = vadd.f32 %v10133_v47, %v6445_v39  ;;  %v12098_v19 = vpop.f32.mrb[141].mxu0  ;;  %v17601_v39 = vld [vmem:[#allocation43_spill] sm:$0xff] }
 0xaa7   :  { %v6462_v35 = vmax.f32 %v13073_v52, 0.0 }
 0xaa8   :  { %v6450_v55 = vpop.f32.mrb[142].mxu0 }
 0xaa9   :  { %v12938_v15 = vpack.c.bf16 %v6462_v35, %v6461_v5  ;;  %v13074_v1 = vadd.f32 %v10133_v47, %v6450_v55  ;;  %v12101_v46 = vpop.f32.mrb[143].mxu0  ;;  %v17603_v55 = vld [vmem:[#allocation45_spill] sm:$0xff]  ;;  %v17604_v47 = vld [vmem:[#allocation44_spill] sm:$0xff] }
 0xaaa   :  { %v17602_v46 = vld [vmem:[#allocation42_spill] sm:$0xff] }
 0xaab   :  { %12939 = vmatpush3.bf16.msra.mxu1 %v12938_v15  ;;  %v6463_v44 = vmax.f32 %v13074_v1, 0.0 }
 0xaac   :  { %12110 = vmatprep.subr.mxu1 %v17402_v3 }
 0xaaf   :  { %12111 = vmatpush3.msra.mxu1 %v6463_v44 }
 0xab0   :  { %12113 = vmatmul.mubr.msk.f32.vlgmr.msra.gmra.mrb[20].mxu1 %vm70_vm2, %v17600_v41  ;;  %12115 = vmatprep.subr.mxu1 %v17402_v3 }
 0xab1   :  { %12117 = vmatprep.mubr.msk.f32.mxu1 %vm13603_vm0, %v17402_v3 }
 0xb83   :  { %v6530_v19 = vpop.f32.mrb[20].mxu1 }
 0xb84   :  { %v6534_v52 = vmul.f32 %v17601_v39, %v6530_v19  ;;  %v12114_v0 = vpop.f32.mrb[21].mxu1 }
 0xb86   :  { %12116 = vmatpush3.msk.msra.mxu1 %vm3488_vm13, %v6534_v52 }
 0xb87   :  { %12118 = vmatmul.mubr.msk.f32.vlgmr.msra.gmra.mrb[22].mxu1 %vm3472_vm14, %v17602_v46  ;;  %12940 = vmatprep.subr.bf16.mxu1 %v17416_v37 }
 0xb88   :  { %12120 = vmatprep.mubr.msk.f32.mxu1 %vm13603_vm0, %v17402_v3 }
 0xb8b   :  { %12121 = vmatmul.mubr.msk.f32.gmra.mrb[24].mxu1 %vm3472_vm14, %v17602_v46 }
 0xb8c   :  { %12123 = vmatprep.mubr.msk.f32.mxu1 %vm13603_vm0, %v17402_v3 }
 0xb8f   :  { %12124 = vmatmul.mubr.msk.f32.gmra.mrb[26].mxu1 %vm3472_vm14, %v17603_v55 }
 0xb90   :  { %12126 = vmatprep.mubr.msk.f32.mxu1 %vm13603_vm0, %v17402_v3 }
 0xb93   :  { %12127 = vmatmul.mubr.msk.f32.gmra.mrb[28].mxu1 %vm3472_vm14, %v17604_v47 }
 0xb94   :  { %12129 = vmatprep.mubr.msk.f32.mxu1 %vm13603_vm0, %v17402_v3 }
 0xb97   :  { %12130 = vmatmul.mubr.msk.f32.gmra.mrb[30].mxu1 %vm3472_vm14, %v17605_v51 }
 0xb98   :  { %12142 = vmatprep.mubr.msk.f32.mxu1 %vm13603_vm0, %v17402_v3 }
 0xc5a   :  { %v6604_v53 = vpop.f32.mrb[22].mxu1 }
 0xc5b   :  { %v12119_v43 = vpop.f32.mrb[23].mxu1  ;;  %v16114_v2 = vsub.f32 %v6459_v38, %v6604_v53 }
 0xc5d   :  { %v6633_v19 = vmul.f32 %v16114_v2, %v16114_v2 }
 0xc5e   :  { %v6609_v48 = vpop.f32.mrb[24].mxu1 }
 0xc5f   :  { %v16116_v15 = vsub.f32 %v6460_v59, %v6609_v48  ;;  %v12122_v1 = vpop.f32.mrb[25].mxu1 }
 0xc61   :  { %v6634_v52 = vmul.f32 %v16116_v15, %v16116_v15 }
 0xc62   :  { %v6614_v0 = vpop.f32.mrb[26].mxu1 }
 0xc63   :  { %v12941_v42 = vpack.c.bf16 %v6634_v52, %v6633_v19  ;;  %v12125_v33 = vpop.f32.mrb[27].mxu1  ;;  %v16122_v45 = vsub.f32 %v6461_v5, %v6614_v0  ;;  %v6711_v19 = vld [vmem:[%s17209_s16] sm:$0xf] }
 0xc65   :  { %12942 = vmatpush3.bf16.msra.mxu1 %v12941_v42  ;;  %v6635_v53 = vmul.f32 %v16122_v45, %v16122_v45 }
 0xc66   :  { %v6619_v16 = vpop.f32.mrb[28].mxu1  ;;  %12943 = vmatprep.subr.bf16.mxu1 %v17416_v37 }
 0xc67   :  { %v16125_v38 = vsub.f32 %v6462_v35, %v6619_v16  ;;  %v12128_v59 = vpop.f32.mrb[29].mxu1 }
 0xc68   :  { %v6806_v59 = vld [vmem:[%s17210_s17] sm:$0xf] }
 0xc69   :  { %v6636_v43 = vmul.f32 %v16125_v38, %v16125_v38 }
 0xc6a   :  { %v6624_v48 = vpop.f32.mrb[30].mxu1 }
 0xc6b   :  { %v12944_v1 = vpack.c.bf16 %v6636_v43, %v6635_v53  ;;  %v16131_v58 = vsub.f32 %v6463_v44, %v6624_v48  ;;  %v12131_v33 = vpop.f32.mrb[31].mxu1  ;;  %v6910_v53 = vld [vmem:[%s17211_s11] sm:$0xff]  ;;  %v7024_v43 = vld [vmem:[%s17212_s13 + $0x8] sm:$0xff] }
 0xc6d   :  { %12945 = vmatpush3.bf16.msra.mxu1 %v12944_v1  ;;  %v6637_v42 = vmul.f32 %v16131_v58, %v16131_v58 }
 0xc6e   :  { %12140 = vmatprep.subr.mxu1 %v17402_v3 }
 0xc71   :  { %12141 = vmatpush3.msra.mxu1 %v6637_v42 }
 0xc72   :  { %12143 = vmatmul.mubr.msk.f32.vlgmr.msra.gmra.mrb[32].mxu1 %vm70_vm2, %v17600_v41  ;;  %12145 = vmatprep.subr.mxu1 %v17402_v3 }
 0xc73   :  { %12147 = vmatprep.mubr.msk.f32.mxu1 %vm13603_vm0, %v17402_v3 }
 0xd45   :  { %v6704_v16 = vpop.f32.mrb[32].mxu1 }
 0xd46   :  { %v6708_v35 = vmul.f32 %v17601_v39, %v6704_v16  ;;  %v12144_v5 = vpop.f32.mrb[33].mxu1  ;;  %v17624_v39 = vld [vmem:[#allocation65_spill] sm:$0xff] }
 0xd48   :  { %v6709_v44 = vadd.f32 1e-05, %v6708_v35 }
 0xd4a   :  { %13598 = vrsqrt.f32 %v6709_v44 }
 0xd54   :  { %v13599_v52 = vpop.eup %13598 }
 0xd55   :  { %v6712_v0 = vmul.f32 %v13599_v52, %v6711_v19 }
 0xd57   :  { %12146 = vmatpush3.msk.msra.mxu1 %vm3488_vm13, %v6712_v0 }
 0xd58   :  { %12148 = vmatmul.mubr.msk.f32.vlgmr.msra.gmra.mrb[34].mxu1 %vm3472_vm14, %v17602_v46  ;;  %12162 = vmatprep.subr.mxu1 %v17402_v3 }
 0xd59   :  { %12150 = vmatprep.mubr.msk.f32.mxu1 %vm13603_vm0, %v17402_v3  ;;  %12163 = vmatpush3.msk.msra.mxu1 %vm3488_vm13, %v6806_v59 }
 0xd5a   :  { %12179 = vmatprep.subr.mxu1 %v17402_v3 }
 0xd5c   :  { %12151 = vmatmul.mubr.msk.f32.gmra.mrb[36].mxu1 %vm3472_vm14, %v17602_v46 }
 0xd5d   :  { %12153 = vmatprep.mubr.msk.f32.mxu1 %vm13603_vm0, %v17402_v3 }
 0xd60   :  { %12154 = vmatmul.mubr.msk.f32.gmra.mrb[38].mxu1 %vm3472_vm14, %v17603_v55 }
 0xd61   :  { %12156 = vmatprep.mubr.msk.f32.mxu1 %vm13603_vm0, %v17402_v3 }
 0xd64   :  { %12157 = vmatmul.mubr.msk.f32.gmra.mrb[40].mxu1 %vm3472_vm14, %v17604_v47 }
 0xd65   :  { %12159 = vmatprep.mubr.msk.f32.mxu1 %vm13603_vm0, %v17402_v3 }
 0xd68   :  { %12160 = vmatmul.mubr.msk.f32.gmra.mrb[42].mxu1 %vm3472_vm14, %v17605_v51 }
 0xd69   :  { %12164 = vmatprep.mubr.msk.f32.mxu1 %vm13603_vm0, %v17402_v3 }
 0xd6c   :  { %12165 = vmatmul.mubr.msk.f32.vlgmr.msra.gmra.mrb[44].mxu1 %vm3472_vm14, %v17602_v46 }
 0xd6d   :  { %12167 = vmatprep.mubr.msk.f32.mxu1 %vm13603_vm0, %v17402_v3  ;;  %12180 = vmatpush3.msra.mxu1 %v6910_v53 }
 0xd6e   :  { %7040 = vmatprep.subr.mxu1 %v7024_v43  ;;  %v7023_v43 = vld [vmem:[%s17212_s13] sm:$0xff] }
 0xd70   :  { %12168 = vmatmul.mubr.msk.f32.gmra.mrb[46].mxu1 %vm3472_vm14, %v17602_v46 }
 0xd71   :  { %12170 = vmatprep.mubr.msk.f32.mxu1 %vm13603_vm0, %v17402_v3 }
 0xd74   :  { %12171 = vmatmul.mubr.msk.f32.gmra.mrb[48].mxu1 %vm3472_vm14, %v17603_v55 }
 0xd75   :  { %12173 = vmatprep.mubr.msk.f32.mxu1 %vm13603_vm0, %v17402_v3 }
 0xd78   :  { %12174 = vmatmul.mubr.msk.f32.gmra.mrb[50].mxu1 %vm3472_vm14, %v17604_v47  ;;  %v17620_v47 = vld [vmem:[#allocation61_spill] sm:$0xff] }
 0xd79   :  { %12176 = vmatprep.mubr.msk.f32.mxu1 %vm13603_vm0, %v17402_v3 }
 0xd7c   :  { %12177 = vmatmul.mubr.msk.f32.gmra.mrb[52].mxu1 %vm3472_vm14, %v17605_v51 }
 0xd7d   :  { %12181 = vmatprep.mubr.msk.f32.mxu1 %vm13603_vm0, %v17402_v3 }
 0xe2b   :  { %v6782_v48 = vpop.f32.mrb[34].mxu1 }
 0xe2c   :  { %v12149_v1 = vpop.f32.mrb[35].mxu1  ;;  %v6900_v0 = vmul.f32 %v6782_v48, %v16114_v2 }
 0xe2d   :  { %v7026_v1 = vld [vmem:[%s17212_s13 + $0x18] sm:$0xff] }
 0xe2f   :  { %v6787_v33 = vpop.f32.mrb[36].mxu1 }
 0xe30   :  { %v12152_v42 = vpop.f32.mrb[37].mxu1 }
 0xe31   :  { %v6901_v42 = vmul.f32 %v6787_v33, %v16116_v15 }
 0xe33   :  { %v6792_v16 = vpop.f32.mrb[38].mxu1 }
 0xe34   :  { %v12155_v35 = vpop.f32.mrb[39].mxu1 }
 0xe37   :  { %v6797_v5 = vpop.f32.mrb[40].mxu1 }
 0xe38   :  { %v12158_v44 = vpop.f32.mrb[41].mxu1 }
 0xe39   :  { %v6902_v44 = vmul.f32 %v6792_v16, %v16122_v45 }
 0xe3b   :  { %v6802_v19 = vpop.f32.mrb[42].mxu1 }
 0xe3c   :  { %v12161_v52 = vpop.f32.mrb[43].mxu1 }
 0xe3f   :  { %v6876_v59 = vpop.f32.mrb[44].mxu1 }
 0xe40   :  { %v16199_v51 = vadd.f32 %v6900_v0, %v6876_v59  ;;  %v12166_v53 = vpop.f32.mrb[45].mxu1  ;;  %v6903_v0 = vmul.f32 %v6797_v5, %v16125_v38 }
 0xe41   :  { %v6904_v53 = vmul.f32 %v6802_v19, %v16131_v58  ;;  %v7028_v58 = vld [vmem:[%s17212_s13 + $0x28] sm:$0xff]  ;;  %v7027_v19 = vld [vmem:[%s17212_s13 + $0x20] sm:$0xff] }
 0xe42   :  { %12182 = vmatmul.mubr.msk.f32.vlgmr.msra.gmra.mrb[54].mxu1 %vm380_vm3, %v16199_v51 }
 0xe43   :  { %v6881_v35 = vpop.f32.mrb[46].mxu1  ;;  %12184 = vmatprep.mubr.msk.f32.mxu1 %vm13603_vm0, %v17402_v3  ;;  %7041 = vmatpush1.msra.mxu1 %v7023_v43 }
 0xe44   :  { %v16212_v2 = vadd.f32 %v6901_v42, %v6881_v35  ;;  %v12169_v48 = vpop.f32.mrb[47].mxu1  ;;  %7135 = vmatprep.subr.mxu1 %v7026_v1  ;;  %v7025_v1 = vld [vmem:[%s17212_s13 + $0x10] sm:$0xff]  ;;  %v7030_v42 = vld [vmem:[%s17212_s13 + $0x38] sm:$0xff] }
 0xe45   :  { %v7029_v35 = vld [vmem:[%s17212_s13 + $0x30] sm:$0xff]  ;;  %v7032_v48 = vld [vmem:[%s17212_s13 + $0x48] sm:$0xff] }
 0xe46   :  { %12185 = vmatmul.mubr.msk.f32.gmra.mrb[56].mxu1 %vm380_vm3, %v16212_v2 }
 0xe47   :  { %v6886_v52 = vpop.f32.mrb[48].mxu1  ;;  %12187 = vmatprep.mubr.msk.f32.mxu1 %vm13603_vm0, %v17402_v3 }
 0xe48   :  { %v16219_v15 = vadd.f32 %v6902_v44, %v6886_v52  ;;  %v12172_v33 = vpop.f32.mrb[49].mxu1  ;;  %v7031_v44 = vld [vmem:[%s17212_s13 + $0x40] sm:$0xff]  ;;  %v7034_v52 = vld [vmem:[%s17212_s13 + $0x58] sm:$0xff] }
 0xe49   :  { %v7033_v33 = vld [vmem:[%s17212_s13 + $0x50] sm:$0xff] }
 0xe4a   :  { %12188 = vmatmul.mubr.msk.f32.gmra.mrb[58].mxu1 %vm380_vm3, %v16219_v15 }
 0xe4b   :  { %v6891_v59 = vpop.f32.mrb[50].mxu1  ;;  %12190 = vmatprep.mubr.msk.f32.mxu1 %vm13603_vm0, %v17402_v3 }
 0xe4c   :  { %v16226_v45 = vadd.f32 %v6903_v0, %v6891_v59  ;;  %v12175_v16 = vpop.f32.mrb[51].mxu1  ;;  %v7036_v0 = vld [vmem:[%s17212_s13 + $0x68] sm:$0xff]  ;;  %v7035_v59 = vld [vmem:[%s17212_s13 + $0x60] sm:$0xff] }
 0xe4d   :  { %v7038_v16 = vld [vmem:[%s17212_s13 + $0x78] sm:$0xff] }
 0xe4e   :  { %12191 = vmatmul.mubr.msk.f32.gmra.mrb[60].mxu1 %vm380_vm3, %v16226_v45 }
 0xe4f   :  { %v6896_v43 = vpop.f32.mrb[52].mxu1  ;;  %12193 = vmatprep.mubr.msk.f32.mxu1 %vm13603_vm0, %v17402_v3 }
 0xe50   :  { %v16233_v38 = vadd.f32 %v6904_v53, %v6896_v43  ;;  %v12178_v5 = vpop.f32.mrb[53].mxu1  ;;  %v7037_v53 = vld [vmem:[%s17212_s13 + $0x70] sm:$0xff]  ;;  %v7039_v43 = vld [vmem:[%s17212_s13 + $0x80] sm:$0xff] }
 0xe52   :  { %12194 = vmatmul.mubr.msk.f32.gmra.mrb[62].mxu1 %vm380_vm3, %v16233_v38 }
 0xe53   :  { %7104 = vmatprep.mubr.f32.mxu1 %v17402_v3 }
 0xe56   :  { %10295 = vmatmul.mubr.msk.f32.vlgmr.msra.gmra.mrb[64].mxu1 %vm380_vm3, %v16199_v51 }
 0xe57   :  { %7110 = vmatprep.mubr.f32.mxu1 %v17402_v3  ;;  %7136 = vmatpush1.msra.mxu1 %v7025_v1 }
 0xe58   :  { %7230 = vmatprep.subr.mxu1 %v7028_v58 }
 0xe5a   :  { %10296 = vmatmul.mubr.msk.f32.gmra.mrb[66].mxu1 %vm380_vm3, %v16212_v2 }
 0xe5b   :  { %7116 = vmatprep.mubr.f32.mxu1 %v17402_v3 }
 0xe5e   :  { %10297 = vmatmul.mubr.msk.f32.gmra.mrb[68].mxu1 %vm380_vm3, %v16219_v15 }
 0xe5f   :  { %7122 = vmatprep.mubr.f32.mxu1 %v17402_v3 }
 0xe62   :  { %10298 = vmatmul.mubr.msk.f32.gmra.mrb[70].mxu1 %vm380_vm3, %v16226_v45 }
 0xe63   :  { %7128 = vmatprep.mubr.f32.mxu1 %v17402_v3 }
 0xe66   :  { %10299 = vmatmul.mubr.msk.f32.gmra.mrb[72].mxu1 %vm380_vm3, %v16233_v38 }
 0xe67   :  { %7199 = vmatprep.mubr.f32.mxu1 %v17402_v3 }
 0xe6a   :  { %10300 = vmatmul.mubr.msk.f32.vlgmr.msra.gmra.mrb[74].mxu1 %vm380_vm3, %v16199_v51 }
 0xe6b   :  { %7205 = vmatprep.mubr.f32.mxu1 %v17402_v3  ;;  %7231 = vmatpush1.msra.mxu1 %v7027_v19 }
 0xe6c   :  { %7325 = vmatprep.subr.mxu1 %v7030_v42 }
 0xe6e   :  { %10301 = vmatmul.mubr.msk.f32.gmra.mrb[76].mxu1 %vm380_vm3, %v16212_v2 }
 0xe6f   :  { %7211 = vmatprep.mubr.f32.mxu1 %v17402_v3 }
 0xe72   :  { %10302 = vmatmul.mubr.msk.f32.gmra.mrb[78].mxu1 %vm380_vm3, %v16219_v15 }
 0xe73   :  { %7217 = vmatprep.mubr.f32.mxu1 %v17402_v3 }
 0xe76   :  { %10303 = vmatmul.mubr.msk.f32.gmra.mrb[80].mxu1 %vm380_vm3, %v16226_v45 }
 0xe77   :  { %7223 = vmatprep.mubr.f32.mxu1 %v17402_v3 }
 0xe7a   :  { %10304 = vmatmul.mubr.msk.f32.gmra.mrb[82].mxu1 %vm380_vm3, %v16233_v38 }
 0xe7b   :  { %7294 = vmatprep.mubr.f32.mxu1 %v17402_v3 }
 0xe7e   :  { %10305 = vmatmul.mubr.msk.f32.vlgmr.msra.gmra.mrb[84].mxu1 %vm380_vm3, %v16199_v51 }
 0xe7f   :  { %7300 = vmatprep.mubr.f32.mxu1 %v17402_v3  ;;  %7326 = vmatpush1.msra.mxu1 %v7029_v35 }
 0xe80   :  { %7420 = vmatprep.subr.mxu1 %v7032_v48 }
 0xe82   :  { %10306 = vmatmul.mubr.msk.f32.gmra.mrb[86].mxu1 %vm380_vm3, %v16212_v2 }
 0xe83   :  { %7306 = vmatprep.mubr.f32.mxu1 %v17402_v3 }
 0xe86   :  { %10307 = vmatmul.mubr.msk.f32.gmra.mrb[88].mxu1 %vm380_vm3, %v16219_v15 }
 0xe87   :  { %7312 = vmatprep.mubr.f32.mxu1 %v17402_v3 }
 0xe8a   :  { %10308 = vmatmul.mubr.msk.f32.gmra.mrb[90].mxu1 %vm380_vm3, %v16226_v45 }
 0xe8b   :  { %7318 = vmatprep.mubr.f32.mxu1 %v17402_v3 }
 0xe8e   :  { %10309 = vmatmul.mubr.msk.f32.gmra.mrb[92].mxu1 %vm380_vm3, %v16233_v38 }
 0xe8f   :  { %7389 = vmatprep.mubr.f32.mxu1 %v17402_v3 }
 0xe92   :  { %10310 = vmatmul.mubr.msk.f32.vlgmr.msra.gmra.mrb[94].mxu1 %vm380_vm3, %v16199_v51 }
 0xe93   :  { %7395 = vmatprep.mubr.f32.mxu1 %v17402_v3  ;;  %7421 = vmatpush1.msra.mxu1 %v7031_v44 }
 0xe94   :  { %7515 = vmatprep.subr.mxu1 %v7034_v52 }
 0xe96   :  { %10311 = vmatmul.mubr.msk.f32.gmra.mrb[96].mxu1 %vm380_vm3, %v16212_v2 }
 0xe97   :  { %7401 = vmatprep.mubr.f32.mxu1 %v17402_v3 }
 0xe9a   :  { %10312 = vmatmul.mubr.msk.f32.gmra.mrb[98].mxu1 %vm380_vm3, %v16219_v15 }
 0xe9b   :  { %7407 = vmatprep.mubr.f32.mxu1 %v17402_v3 }
 0xe9e   :  { %10313 = vmatmul.mubr.msk.f32.gmra.mrb[100].mxu1 %vm380_vm3, %v16226_v45 }
 0xe9f   :  { %7413 = vmatprep.mubr.f32.mxu1 %v17402_v3 }
 0xea2   :  { %10314 = vmatmul.mubr.msk.f32.gmra.mrb[102].mxu1 %vm380_vm3, %v16233_v38 }
 0xea3   :  { %7484 = vmatprep.mubr.f32.mxu1 %v17402_v3 }
 0xea6   :  { %10315 = vmatmul.mubr.msk.f32.vlgmr.msra.gmra.mrb[104].mxu1 %vm380_vm3, %v16199_v51 }
 0xea7   :  { %7490 = vmatprep.mubr.f32.mxu1 %v17402_v3  ;;  %7516 = vmatpush1.msra.mxu1 %v7033_v33 }
 0xea8   :  { %7610 = vmatprep.subr.mxu1 %v7036_v0  ;;  %v17606_v0 = vld [vmem:[#allocation47_spill] sm:$0xff] }
 0xeaa   :  { %10316 = vmatmul.mubr.msk.f32.gmra.mrb[106].mxu1 %vm380_vm3, %v16212_v2 }
 0xeab   :  { %7496 = vmatprep.mubr.f32.mxu1 %v17402_v3 }
 0xeae   :  { %10317 = vmatmul.mubr.msk.f32.gmra.mrb[108].mxu1 %vm380_vm3, %v16219_v15 }
 0xeaf   :  { %7502 = vmatprep.mubr.f32.mxu1 %v17402_v3 }
 0xeb2   :  { %10318 = vmatmul.mubr.msk.f32.gmra.mrb[110].mxu1 %vm380_vm3, %v16226_v45 }
 0xeb3   :  { %7508 = vmatprep.mubr.f32.mxu1 %v17402_v3 }
 0xeb6   :  { %10319 = vmatmul.mubr.msk.f32.gmra.mrb[112].mxu1 %vm380_vm3, %v16233_v38 }
 0xeb7   :  { %7579 = vmatprep.mubr.f32.mxu1 %v17402_v3 }
 0xeba   :  { %10320 = vmatmul.mubr.msk.f32.vlgmr.msra.gmra.mrb[114].mxu1 %vm380_vm3, %v16199_v51 }
 0xebb   :  { %7585 = vmatprep.mubr.f32.mxu1 %v17402_v3  ;;  %7611 = vmatpush1.msra.mxu1 %v7035_v59 }
 0xebc   :  { %7705 = vmatprep.subr.mxu1 %v7038_v16 }
 0xebe   :  { %10321 = vmatmul.mubr.msk.f32.gmra.mrb[116].mxu1 %vm380_vm3, %v16212_v2 }
 0xebf   :  { %7591 = vmatprep.mubr.f32.mxu1 %v17402_v3 }
 0xec2   :  { %10322 = vmatmul.mubr.msk.f32.gmra.mrb[118].mxu1 %vm380_vm3, %v16219_v15 }
 0xec3   :  { %7597 = vmatprep.mubr.f32.mxu1 %v17402_v3 }
 0xec6   :  { %10323 = vmatmul.mubr.msk.f32.gmra.mrb[120].mxu1 %vm380_vm3, %v16226_v45 }
 0xec7   :  { %7603 = vmatprep.mubr.f32.mxu1 %v17402_v3 }
 0xeca   :  { %10324 = vmatmul.mubr.msk.f32.gmra.mrb[122].mxu1 %vm380_vm3, %v16233_v38 }
 0xecb   :  { %7674 = vmatprep.mubr.f32.mxu1 %v17402_v3 }
 0xece   :  { %10325 = vmatmul.mubr.msk.f32.vlgmr.msra.gmra.mrb[124].mxu1 %vm380_vm3, %v16199_v51 }
 0xecf   :  { %7680 = vmatprep.mubr.f32.mxu1 %v17402_v3  ;;  %7706 = vmatpush1.msra.mxu1 %v7037_v53  ;;  %v17607_v53 = vld [vmem:[#allocation48_spill] sm:$0xff] }
 0xed0   :  { %12196 = vmatprep.subr.mxu1 %v17402_v3 }
 0xed2   :  { %10326 = vmatmul.mubr.msk.f32.gmra.mrb[126].mxu1 %vm380_vm3, %v16212_v2 }
 0xed3   :  { %7686 = vmatprep.mubr.f32.mxu1 %v17402_v3 }
 0xed6   :  { %10327 = vmatmul.mubr.msk.f32.gmra.mrb[128].mxu1 %vm380_vm3, %v16219_v15 }
 0xed7   :  { %7692 = vmatprep.mubr.f32.mxu1 %v17402_v3 }
 0xeda   :  { %10328 = vmatmul.mubr.msk.f32.gmra.mrb[130].mxu1 %vm380_vm3, %v16226_v45 }
 0xedb   :  { %7698 = vmatprep.mubr.f32.mxu1 %v17402_v3 }
 0xede   :  { %10329 = vmatmul.mubr.msk.f32.gmra.mrb[132].mxu1 %vm380_vm3, %v16233_v38 }
 0xedf   :  { %7769 = vmatprep.mubr.f32.mxu1 %v17402_v3 }
 0xee2   :  { %10330 = vmatmul.mubr.msk.f32.vlgmr.msra.gmra.mrb[134].mxu1 %vm380_vm3, %v16199_v51 }
 0xee3   :  { %7775 = vmatprep.mubr.f32.mxu1 %v17402_v3  ;;  %12197 = vmatpush3.msra.mxu1 %v7039_v43 }
 0xee4   :  { %12946 = vmatprep.subr.bf16.mxu1 %v17416_v37 }
 0xee6   :  { %10331 = vmatmul.mubr.msk.f32.gmra.mrb[136].mxu1 %vm380_vm3, %v16212_v2 }
 0xee7   :  { %7781 = vmatprep.mubr.f32.mxu1 %v17402_v3 }
 0xeea   :  { %10332 = vmatmul.mubr.msk.f32.gmra.mrb[138].mxu1 %vm380_vm3, %v16219_v15 }
 0xeeb   :  { %7787 = vmatprep.mubr.f32.mxu1 %v17402_v3 }
 0xeee   :  { %10333 = vmatmul.mubr.msk.f32.gmra.mrb[140].mxu1 %vm380_vm3, %v16226_v45 }
 0xeef   :  { %7793 = vmatprep.mubr.f32.mxu1 %v17402_v3 }
 0xef2   :  { %10334 = vmatmul.mubr.msk.f32.gmra.mrb[142].mxu1 %vm380_vm3, %v16233_v38 }
 0xef3   :  { %12198 = vmatprep.mubr.msk.f32.mxu1 %vm13603_vm0, %v17402_v3 }
 0xef6   :  { %12199 = vmatmul.mubr.msk.f32.vlgmr.msra.gmra.mrb[144].mxu1 %vm380_vm3, %v16199_v51 }
 0xef7   :  { %12201 = vmatprep.mubr.msk.f32.mxu1 %vm13603_vm0, %v17402_v3 }
 0xefa   :  { %12202 = vmatmul.mubr.msk.f32.gmra.mrb[146].mxu1 %vm380_vm3, %v16212_v2 }
 0xefb   :  { %12204 = vmatprep.mubr.msk.f32.mxu1 %vm13603_vm0, %v17402_v3 }
 0xefe   :  { %12205 = vmatmul.mubr.msk.f32.gmra.mrb[148].mxu1 %vm380_vm3, %v16219_v15 }
 0xeff   :  { %12207 = vmatprep.mubr.msk.f32.mxu1 %vm13603_vm0, %v17402_v3 }
 0xf02   :  { %12208 = vmatmul.mubr.msk.f32.gmra.mrb[150].mxu1 %vm380_vm3, %v16226_v45 }
 0xf03   :  { %12210 = vmatprep.mubr.msk.f32.mxu1 %vm13603_vm0, %v17402_v3 }
 0xf06   :  { %12211 = vmatmul.mubr.msk.f32.gmra.mrb[152].mxu1 %vm380_vm3, %v16233_v38 }
 0xf07   :  { %12223 = vmatprep.mubr.msk.f32.mxu1 %vm13603_vm0, %v17402_v3 }
 0xf29   :  { %v7106_v51 = vpop.f32.mrb[64].mxu1 }
 0xf2a   :  { %v7108_v2 = vpop.f32.mrb[65].mxu1 }
 0xf2d   :  { %v7112_v5 = vpop.f32.mrb[66].mxu1 }
 0xf2e   :  { %v12947_v1 = vpack.c.bf16 %v7112_v5, %v7106_v51  ;;  %v7114_v15 = vpop.f32.mrb[67].mxu1 }
 0xf2f   :  { %v12953_v58 = vpack.c.bf16 %v7114_v15, %v7108_v2 }
 0xf30   :  { %12948 = vmatpush3.bf16.msra.mxu1 %v12947_v1  ;;  %v17608_v1 = vld [vmem:[#allocation49_spill] sm:$0xff] }
 0xf31   :  { %v7118_v19 = vpop.f32.mrb[68].mxu1  ;;  %12949 = vmatprep.subr.bf16.mxu1 %v17416_v37 }
 0xf32   :  { %v7120_v45 = vpop.f32.mrb[69].mxu1 }
 0xf35   :  { %v7124_v42 = vpop.f32.mrb[70].mxu1 }
 0xf36   :  { %v12950_v35 = vpack.c.bf16 %v7124_v42, %v7118_v19  ;;  %v7126_v48 = vpop.f32.mrb[71].mxu1  ;;  %v17609_v19 = vld [vmem:[#allocation50_spill] sm:$0xff] }
 0xf37   :  { %v12956_v44 = vpack.c.bf16 %v7126_v48, %v7120_v45 }
 0xf38   :  { %12951 = vmatpush3.bf16.msra.mxu1 %v12950_v35 }
 0xf39   :  { %v7130_v38 = vpop.f32.mrb[72].mxu1  ;;  %12221 = vmatprep.subr.mxu1 %v17402_v3 }
 0xf3a   :  { %v7132_v52 = vpop.f32.mrb[73].mxu1 }
 0xf3c   :  { %12222 = vmatpush3.msra.mxu1 %v7130_v38 }
 0xf3d   :  { %v7201_v33 = vpop.f32.mrb[74].mxu1  ;;  %12224 = vmatmul.mubr.msk.f32.vlgmr.msra.gmra.mrb[54].mxu1 %vm70_vm2, %v17606_v0  ;;  %12952 = vmatprep.subr.bf16.mxu1 %v17416_v37 }
 0xf3e   :  { %v7203_v59 = vpop.f32.mrb[75].mxu1  ;;  %12954 = vmatpush3.bf16.msra.mxu1 %v12953_v58  ;;  %12226 = vmatprep.mubr.msk.f32.mxu1 %vm13603_vm0, %v17402_v3 }
 0xf3f   :  { %12955 = vmatprep.subr.bf16.mxu1 %v17416_v37 }
 0xf41   :  { %v7207_v16 = vpop.f32.mrb[76].mxu1  ;;  %12227 = vmatmul.mubr.msk.f32.gmra.mrb[56].mxu1 %vm70_vm2, %v17607_v53 }
 0xf42   :  { %v12959_v43 = vpack.c.bf16 %v7207_v16, %v7201_v33  ;;  %v7209_v51 = vpop.f32.mrb[77].mxu1  ;;  %12957 = vmatpush3.bf16.msra.mxu1 %v12956_v44  ;;  %12229 = vmatprep.mubr.msk.f32.mxu1 %vm13603_vm0, %v17402_v3  ;;  %v17610_v44 = vld [vmem:[#allocation51_spill] sm:$0xff]  ;;  %v17611_v33 = vld [vmem:[#allocation52_spill] sm:$0xff]  ;;  %v17612_v16 = vld [vmem:[#allocation54_spill] sm:$0xff] }
 0xf43   :  { %v12965_v2 = vpack.c.bf16 %v7209_v51, %v7203_v59  ;;  %12246 = vmatprep.subr.mxu1 %v17402_v3 }
 0xf45   :  { %v7213_v5 = vpop.f32.mrb[78].mxu1  ;;  %12230 = vmatmul.mubr.msk.f32.gmra.mrb[58].mxu1 %vm70_vm2, %v17608_v1  ;;  %v17613_v1 = vld [vmem:[#allocation56_spill] sm:$0xff] }
 0xf46   :  { %v7215_v15 = vpop.f32.mrb[79].mxu1  ;;  %12247 = vmatpush3.msra.mxu1 %v7132_v52  ;;  %12232 = vmatprep.mubr.msk.f32.mxu1 %vm13603_vm0, %v17402_v3 }
 0xf47   :  { %12958 = vmatprep.subr.bf16.mxu1 %v17416_v37 }
 0xf49   :  { %v7219_v58 = vpop.f32.mrb[80].mxu1  ;;  %12233 = vmatmul.mubr.msk.f32.gmra.mrb[60].mxu1 %vm70_vm2, %v17609_v19  ;;  %v17614_v19 = vld [vmem:[#allocation58_spill] sm:$0xff] }
 0xf4a   :  { %v12962_v45 = vpack.c.bf16 %v7219_v58, %v7213_v5  ;;  %v7221_v42 = vpop.f32.mrb[81].mxu1  ;;  %12235 = vmatprep.mubr.msk.f32.mxu1 %vm13603_vm0, %v17402_v3 }
 0xf4b   :  { %v12968_v35 = vpack.c.bf16 %v7221_v42, %v7215_v15 }
 0xf4d   :  { %v7225_v48 = vpop.f32.mrb[82].mxu1  ;;  %12236 = vmatmul.mubr.msk.f32.gmra.mrb[62].mxu1 %vm70_vm2, %v17610_v44 }
 0xf4e   :  { %v7227_v38 = vpop.f32.mrb[83].mxu1  ;;  %12248 = vmatprep.mubr.msk.f32.mxu1 %vm13603_vm0, %v17402_v3 }
 0xf51   :  { %v7296_v52 = vpop.f32.mrb[84].mxu1  ;;  %12249 = vmatmul.mubr.msk.f32.vlgmr.msra.gmra.mrb[54].mxu1 %vm70_vm2, %v17611_v33 }
 0xf52   :  { %12960 = vmatpush3.bf16.msra.mxu1 %v12959_v43  ;;  %v16451_v0 = vpop.f32.mrb[85].mxu1  ;;  %12251 = vmatprep.mubr.msk.f32.mxu1 %vm13603_vm0, %v17402_v3 }
 0xf53   :  { %12961 = vmatprep.subr.bf16.mxu1 %v17416_v37 }
 0xf55   :  { %v7302_v59 = vpop.f32.mrb[86].mxu1  ;;  %12252 = vmatmul.mubr.msk.f32.gmra.mrb[56].mxu1 %vm70_vm2, %v17612_v16  ;;  %v17616_v16 = vld [vmem:[#allocation53_spill] sm:$0xff] }
 0xf56   :  { %v12971_v53 = vpack.c.bf16 %v7302_v59, %v7296_v52  ;;  %12963 = vmatpush3.bf16.msra.mxu1 %v12962_v45  ;;  %v16458_v51 = vpop.f32.mrb[87].mxu1  ;;  %12254 = vmatprep.mubr.msk.f32.mxu1 %vm13603_vm0, %v17402_v3  ;;  %v17615_v52 = vld [vmem:[#allocation60_spill] sm:$0xff] }
 0xf57   :  { %12271 = vmatprep.subr.mxu1 %v17402_v3  ;;  %v17627_v20 = vpack.c.bf16 %v16458_v51, %v16451_v0 }
 0xf59   :  { %v7308_v5 = vpop.f32.mrb[88].mxu1  ;;  %12255 = vmatmul.mubr.msk.f32.gmra.mrb[58].mxu1 %vm70_vm2, %v17613_v1 }
 0xf5a   :  { %12272 = vmatpush3.msra.mxu1 %v7225_v48  ;;  %v16467_v15 = vpop.f32.mrb[89].mxu1  ;;  %12257 = vmatprep.mubr.msk.f32.mxu1 %vm13603_vm0, %v17402_v3  ;;  %v17618_v48 = vld [vmem:[#allocation57_spill] sm:$0xff] }
 0xf5b   :  { %12964 = vmatprep.subr.bf16.mxu1 %v17416_v37 }
 0xf5d   :  { %v7314_v58 = vpop.f32.mrb[90].mxu1  ;;  %12258 = vmatmul.mubr.msk.f32.gmra.mrb[60].mxu1 %vm70_vm2, %v17614_v19  ;;  %v17619_v19 = vld [vmem:[#allocation59_spill] sm:$0xff] }
 0xf5e   :  { %v12974_v45 = vpack.c.bf16 %v7314_v58, %v7308_v5  ;;  %v16474_v42 = vpop.f32.mrb[91].mxu1  ;;  %12260 = vmatprep.mubr.msk.f32.mxu1 %vm13603_vm0, %v17402_v3  ;;  %v17617_v58 = vld [vmem:[#allocation55_spill] sm:$0xff] }
 0xf61   :  { %v7320_v44 = vpop.f32.mrb[92].mxu1  ;;  %12261 = vmatmul.mubr.msk.f32.gmra.mrb[62].mxu1 %vm70_vm2, %v17615_v52 }
 0xf62   :  { %v16482_v33 = vpop.f32.mrb[93].mxu1  ;;  %12273 = vmatprep.mubr.msk.f32.mxu1 %vm13603_vm0, %v17402_v3 }
 0xf65   :  { %v16486_v59 = vpop.f32.mrb[94].mxu1  ;;  %12274 = vmatmul.mubr.msk.f32.vlgmr.msra.gmra.mrb[54].mxu1 %vm70_vm2, %v17616_v16 }
 0xf66   :  { %12966 = vmatpush3.bf16.msra.mxu1 %v12965_v2  ;;  %v16490_v5 = vpop.f32.mrb[95].mxu1  ;;  %12276 = vmatprep.mubr.msk.f32.mxu1 %vm13603_vm0, %v17402_v3  ;;  %v17621_v2 = vld [vmem:[#allocation62_spill] sm:$0xff] }
 0xf67   :  { %12967 = vmatprep.subr.bf16.mxu1 %v17416_v37 }
 0xf69   :  { %v16495_v1 = vpop.f32.mrb[96].mxu1  ;;  %12277 = vmatmul.mubr.msk.f32.gmra.mrb[56].mxu1 %vm70_vm2, %v17617_v58 }
 0xf6a   :  { %12969 = vmatpush3.bf16.msra.mxu1 %v12968_v35  ;;  %v16501_v52 = vpop.f32.mrb[97].mxu1  ;;  %12279 = vmatprep.mubr.msk.f32.mxu1 %vm13603_vm0, %v17402_v3  ;;  %v17634_v36 = vpack.c.bf16 %v16495_v1, %v16486_v59 }
 0xf6b   :  { %12296 = vmatprep.subr.mxu1 %v17402_v3  ;;  %v17645_v57 = vpack.c.bf16 %v16501_v52, %v16490_v5 }
 0xf6d   :  { %v16508_v16 = vpop.f32.mrb[98].mxu1  ;;  %12280 = vmatmul.mubr.msk.f32.gmra.mrb[58].mxu1 %vm70_vm2, %v17618_v48 }
 0xf6e   :  { %12297 = vmatpush3.msra.mxu1 %v7227_v38  ;;  %v16512_v58 = vpop.f32.mrb[99].mxu1  ;;  %12282 = vmatprep.mubr.msk.f32.mxu1 %vm13603_vm0, %v17402_v3 }
 0xf6f   :  { %12970 = vmatprep.subr.bf16.mxu1 %v17416_v37 }
 0xf71   :  { %v16517_v35 = vpop.f32.mrb[100].mxu1  ;;  %12283 = vmatmul.mubr.msk.f32.gmra.mrb[60].mxu1 %vm70_vm2, %v17619_v19 }
 0xf72   :  { %v16523_v43 = vpop.f32.mrb[101].mxu1  ;;  %12285 = vmatprep.mubr.msk.f32.mxu1 %vm13603_vm0, %v17402_v3 }
 0xf75   :  { %v16529_v48 = vpop.f32.mrb[102].mxu1  ;;  %12286 = vmatmul.mubr.msk.f32.gmra.mrb[62].mxu1 %vm70_vm2, %v17620_v47  ;;  %v17622_v47 = vld [vmem:[#allocation63_spill] sm:$0xff] }
 0xf76   :  { %v16533_v55 = vpop.f32.mrb[103].mxu1  ;;  %12298 = vmatprep.mubr.msk.f32.mxu1 %vm13603_vm0, %v17402_v3 }
 0xf79   :  { %v16537_v19 = vpop.f32.mrb[104].mxu1  ;;  %12299 = vmatmul.mubr.msk.f32.vlgmr.msra.gmra.mrb[54].mxu1 %vm70_vm2, %v17621_v2 }
 0xf7a   :  { %12972 = vmatpush3.bf16.msra.mxu1 %v12971_v53  ;;  %v16541_v46 = vpop.f32.mrb[105].mxu1  ;;  %12301 = vmatprep.mubr.msk.f32.mxu1 %vm13603_vm0, %v17402_v3  ;;  %v17626_v53 = vld [vmem:[#allocation67_spill] sm:$0xff] }
 0xf7b   :  { %12973 = vmatprep.subr.bf16.mxu1 %v17416_v37 }
 0xf7d   :  { %v16546_v38 = vpop.f32.mrb[106].mxu1  ;;  %12302 = vmatmul.mubr.msk.f32.gmra.mrb[56].mxu1 %vm70_vm2, %v17622_v47 }
 0xf7e   :  { %12975 = vmatpush3.bf16.msra.mxu1 %v12974_v45  ;;  %v16552_v41 = vpop.f32.mrb[107].mxu1  ;;  %12304 = vmatprep.mubr.msk.f32.mxu1 %vm13603_vm0, %v17402_v3 }
 0xf7f   :  { %12321 = vmatprep.subr.mxu1 %v17402_v3 }
 0xf81   :  { %v16559_v2 = vpop.f32.mrb[108].mxu1  ;;  %12305 = vmatmul.mubr.msk.f32.gmra.mrb[58].mxu1 %vm70_vm2, %v17623_v34 }
 0xf82   :  { %12322 = vmatpush3.msra.mxu1 %v7320_v44  ;;  %v16563_v47 = vpop.f32.mrb[109].mxu1  ;;  %12307 = vmatprep.mubr.msk.f32.mxu1 %vm13603_vm0, %v17402_v3 }
 0xf83   :  { %12976 = vmatprep.subr.bf16.mxu1 %v17416_v37 }
 0xf85   :  { %v16568_v45 = vpop.f32.mrb[110].mxu1  ;;  %12308 = vmatmul.mubr.msk.f32.gmra.mrb[60].mxu1 %vm70_vm2, %v17624_v39 }
 0xf86   :  { %v16574_v50 = vpop.f32.mrb[111].mxu1  ;;  %12310 = vmatprep.mubr.msk.f32.mxu1 %vm13603_vm0, %v17402_v3 }
 0xf89   :  { %v16580_v44 = vpop.f32.mrb[112].mxu1  ;;  %12311 = vmatmul.mubr.msk.f32.gmra.mrb[62].mxu1 %vm70_vm2, %v17625_v61 }
 0xf8a   :  { %v16584_v27 = vpop.f32.mrb[113].mxu1  ;;  %12323 = vmatprep.mubr.msk.f32.mxu1 %vm13603_vm0, %v17402_v3 }
 0xf8d   :  { %v16588_v39 = vpop.f32.mrb[114].mxu1  ;;  %12324 = vmatmul.mubr.msk.f32.vlgmr.msra.gmra.mrb[54].mxu1 %vm70_vm2, %v17626_v53  ;;  %v17629_v53 = vpack.c.bf16 %v16474_v42, %v16467_v15  ;;  %v17631_v42 = vld [vmem:[#allocation70_spill] sm:$0xff] }
 0xf8e   :  { %12978 = vmatpush3.bf16.msra.mxu1 %v17627_v20  ;;  %v16595_v34 = vpop.f32.mrb[115].mxu1  ;;  %12326 = vmatprep.mubr.msk.f32.mxu1 %vm13603_vm0, %v17402_v3 }
 0xf8f   :  { %12979 = vmatprep.subr.bf16.mxu1 %v17416_v37 }
 0xf91   :  { %v16600_v61 = vpop.f32.mrb[116].mxu1  ;;  %12327 = vmatmul.mubr.msk.f32.gmra.mrb[56].mxu1 %vm70_vm2, %v17628_v13  ;;  %v17630_v13 = vld [vmem:[#allocation69_spill] sm:$0xff] }
 0xf92   :  { %12981 = vmatpush3.bf16.msra.mxu1 %v17629_v53  ;;  %v16609_v20 = vpop.f32.mrb[117].mxu1  ;;  %12329 = vmatprep.mubr.msk.f32.mxu1 %vm13603_vm0, %v17402_v3  ;;  %v17633_v53 = vld [vmem:[#allocation4_spill] sm:$0xff] }
 0xf93   :  { %12346 = vmatprep.subr.mxu1 %v17402_v3 }
 0xf95   :  { %v16616_v51 = vpop.f32.mrb[118].mxu1  ;;  %12330 = vmatmul.mubr.msk.f32.gmra.mrb[58].mxu1 %vm70_vm2, %v17630_v13 }
 0xf96   :  { %12347 = vmatpush3.msra.mxu1 %v16482_v33  ;;  %v16621_v63 = vpop.f32.mrb[119].mxu1  ;;  %12332 = vmatprep.mubr.msk.f32.mxu1 %vm13603_vm0, %v17402_v3 }
 0xf97   :  { %12982 = vmatprep.subr.bf16.mxu1 %v17416_v37 }
 0xf99   :  { %v16626_v15 = vpop.f32.mrb[120].mxu1  ;;  %12333 = vmatmul.mubr.msk.f32.gmra.mrb[60].mxu1 %vm70_vm2, %v17631_v42 }
 0xf9a   :  { %v16632_v0 = vpop.f32.mrb[121].mxu1  ;;  %12335 = vmatprep.mubr.msk.f32.mxu1 %vm13603_vm0, %v17402_v3 }
 0xf9d   :  { %v16638_v13 = vpop.f32.mrb[122].mxu1  ;;  %12336 = vmatmul.mubr.msk.f32.gmra.mrb[62].mxu1 %vm70_vm2, %v17632_v49 }
 0xf9e   :  { %v16642_v54 = vpop.f32.mrb[123].mxu1  ;;  %12348 = vmatprep.mubr.msk.f32.mxu1 %vm13603_vm0, %v17402_v3 }
 0xfa1   :  { %v16646_v42 = vpop.f32.mrb[124].mxu1  ;;  %12349 = vmatmul.mubr.msk.f32.vlgmr.msra.gmra.mrb[54].mxu1 %vm70_vm2, %v17633_v53  ;;  %v17637_v53 = vpack.c.bf16 %v16517_v35, %v16508_v16  ;;  %v17641_v35 = vld [vmem:[#allocation8_spill] sm:$0xff] }
 0xfa2   :  { %12984 = vmatpush3.bf16.msra.mxu1 %v17634_v36  ;;  %v16653_v33 = vpop.f32.mrb[125].mxu1  ;;  %12351 = vmatprep.mubr.msk.f32.mxu1 %vm13603_vm0, %v17402_v3 }
 0xfa3   :  { %17635 = vst [vmem:[#allocation15_spill] sm:$0xff] %v16653_v33  ;;  %12985 = vmatprep.subr.bf16.mxu1 %v17416_v37  ;;  %v17642_v33 = vld [vmem:[#allocation9_spill] sm:$0xff] }
 0xfa5   :  { %v16658_v49 = vpop.f32.mrb[126].mxu1  ;;  %12352 = vmatmul.mubr.msk.f32.gmra.mrb[56].mxu1 %vm70_vm2, %v17636_v62  ;;  %v17639_v62 = vld [vmem:[#allocation7_spill] sm:$0xff] }
 0xfa6   :  { %12987 = vmatpush3.bf16.msra.mxu1 %v17637_v53  ;;  %v16667_v36 = vpop.f32.mrb[127].mxu1  ;;  %12354 = vmatprep.mubr.msk.f32.mxu1 %vm13603_vm0, %v17402_v3  ;;  %v17644_v53 = vld [vmem:[#allocation5_spill] sm:$0xff] }
 0xfa7   :  { %17638 = vst [vmem:[#allocation3_spill] sm:$0xff] %v16667_v36  ;;  %12371 = vmatprep.subr.mxu1 %v17402_v3 }
 0xfa9   :  { %v16674_v1 = vpop.f32.mrb[128].mxu1  ;;  %12355 = vmatmul.mubr.msk.f32.gmra.mrb[58].mxu1 %vm70_vm2, %v17639_v62 }
 0xfaa   :  { %12372 = vmatpush3.msra.mxu1 %v16529_v48  ;;  %v16679_v60 = vpop.f32.mrb[129].mxu1  ;;  %12357 = vmatprep.mubr.msk.f32.mxu1 %vm13603_vm0, %v17402_v3 }
 0xfab   :  { %17640 = vst [vmem:[#allocation2_spill] sm:$0xff] %v16679_v60  ;;  %12988 = vmatprep.subr.bf16.mxu1 %v17416_v37 }
 0xfad   :  { %v16684_v16 = vpop.f32.mrb[130].mxu1  ;;  %12358 = vmatmul.mubr.msk.f32.gmra.mrb[60].mxu1 %vm70_vm2, %v17641_v35 }
 0xfae   :  { %v16690_v59 = vpop.f32.mrb[131].mxu1  ;;  %12360 = vmatprep.mubr.msk.f32.mxu1 %vm13603_vm0, %v17402_v3 }
 0xfb1   :  { %v16696_v62 = vpop.f32.mrb[132].mxu1  ;;  %12361 = vmatmul.mubr.msk.f32.gmra.mrb[62].mxu1 %vm70_vm2, %v17642_v33 }
 0xfb2   :  { %v16700_v36 = vpop.f32.mrb[133].mxu1  ;;  %12373 = vmatprep.mubr.msk.f32.mxu1 %vm13603_vm0, %v17402_v3 }
 0xfb3   :  { %17643 = vst [vmem:[#allocation72_spill] sm:$0xff] %v16700_v36  ;;  %v17647_v36 = vld [vmem:[#allocation10_spill] sm:$0xff] }
 0xfb5   :  { %v16704_v35 = vpop.f32.mrb[134].mxu1  ;;  %12374 = vmatmul.mubr.msk.f32.vlgmr.msra.gmra.mrb[54].mxu1 %vm70_vm2, %v17644_v53  ;;  %v17648_v53 = vpack.c.bf16 %v16523_v43, %v16512_v58  ;;  %v17652_v58 = vld [vmem:[#allocation12_spill] sm:$0xff] }
 0xfb6   :  { %12990 = vmatpush3.bf16.msra.mxu1 %v17645_v57  ;;  %v16711_v48 = vpop.f32.mrb[135].mxu1  ;;  %12376 = vmatprep.mubr.msk.f32.mxu1 %vm13603_vm0, %v17402_v3 }
 0xfb7   :  { %17646 = vst [vmem:[#allocation73_spill] sm:$0xff] %v16711_v48  ;;  %12991 = vmatprep.subr.bf16.mxu1 %v17416_v37  ;;  %v17653_v48 = vld [vmem:[#allocation13_spill] sm:$0xff] }
 0xfb9   :  { %v16716_v33 = vpop.f32.mrb[136].mxu1  ;;  %12377 = vmatmul.mubr.msk.f32.gmra.mrb[56].mxu1 %vm70_vm2, %v17647_v36  ;;  %v17651_v36 = vld [vmem:[#allocation11_spill] sm:$0xff] }
 0xfba   :  { %12993 = vmatpush3.bf16.msra.mxu1 %v17648_v53  ;;  %v16725_v57 = vpop.f32.mrb[137].mxu1  ;;  %12379 = vmatprep.mubr.msk.f32.mxu1 %vm13603_vm0, %v17402_v3  ;;  %v17655_v53 = vld [vmem:[#allocation14_spill] sm:$0xff] }
 0xfbb   :  { %17649 = vst [vmem:[#allocation76_spill] sm:$0xff] %v16725_v57  ;;  %12396 = vmatprep.subr.mxu1 %v17402_v3 }
 0xfbd   :  { %v16732_v52 = vpop.f32.mrb[138].mxu1  ;;  %12380 = vmatmul.mubr.msk.f32.gmra.mrb[58].mxu1 %vm70_vm2, %v17651_v36 }
 0xfbe   :  { %17650 = vst [vmem:[#allocation75_spill] sm:$0xff] %v16732_v52  ;;  %12397 = vmatpush3.msra.mxu1 %v16533_v55  ;;  %v16737_v60 = vpop.f32.mrb[139].mxu1  ;;  %12382 = vmatprep.mubr.msk.f32.mxu1 %vm13603_vm0, %v17402_v3  ;;  %v17656_v52 = vpack.c.bf16 %v16546_v38, %v16537_v19 }
 0xfbf   :  { %12994 = vmatprep.subr.bf16.mxu1 %v17416_v37 }
 0xfc1   :  { %v16742_v43 = vpop.f32.mrb[140].mxu1  ;;  %12383 = vmatmul.mubr.msk.f32.gmra.mrb[60].mxu1 %vm70_vm2, %v17652_v58 }
 0xfc2   :  { %v16748_v5 = vpop.f32.mrb[141].mxu1  ;;  %12385 = vmatprep.mubr.msk.f32.mxu1 %vm13603_vm0, %v17402_v3 }
 0xfc5   :  { %v16754_v36 = vpop.f32.mrb[142].mxu1  ;;  %12386 = vmatmul.mubr.msk.f32.gmra.mrb[62].mxu1 %vm70_vm2, %v17653_v48 }
 0xfc6   :  { %v16758_v57 = vpop.f32.mrb[143].mxu1  ;;  %12398 = vmatprep.mubr.msk.f32.mxu1 %vm13603_vm0, %v17402_v3 }
 0xfc7   :  { %17654 = vst [vmem:[#allocation74_spill] sm:$0xff] %v16758_v57 }
 0xfc9   :  { %v16762_v58 = vpop.f32.mrb[144].mxu1  ;;  %12399 = vmatmul.mubr.msk.f32.vlgmr.msra.gmra.mrb[54].mxu1 %vm70_vm2, %v17655_v53  ;;  %v17657_v53 = vpack.c.bf16 %v16568_v45, %v16559_v2 }
 0xfca   :  { %12996 = vmatpush3.bf16.msra.mxu1 %v17656_v52  ;;  %v12200_v55 = vpop.f32.mrb[145].mxu1  ;;  %12401 = vmatprep.mubr.msk.f32.mxu1 %vm13603_vm0, %v17402_v3 }
 0xfcb   :  { %12997 = vmatprep.subr.bf16.mxu1 %v17416_v37  ;;  %v10289_v55 = vld [vmem:[%s17213_s12] ss:$0 sm:$0xff] }
 0xfcd   :  { %v16772_v48 = vpop.f32.mrb[146].mxu1  ;;  %12402 = vmatmul.mubr.msk.f32.gmra.mrb[56].mxu1 %vm70_vm2, %v14088_v4 }
 0xfce   :  { %v13043_v57 = vpack.c.bf16 %v16772_v48, %v16762_v58  ;;  %12999 = vmatpush3.bf16.msra.mxu1 %v17657_v53  ;;  %v12203_v38 = vpop.f32.mrb[147].mxu1  ;;  %12404 = vmatprep.mubr.msk.f32.mxu1 %vm13603_vm0, %v17402_v3 }
 0xfcf   :  { %12421 = vmatprep.subr.mxu1 %v17402_v3 }
 0xfd1   :  { %v16784_v19 = vpop.f32.mrb[148].mxu1  ;;  %12405 = vmatmul.mubr.msk.f32.gmra.mrb[58].mxu1 %vm70_vm2, %v17553_v40 }
 0xfd2   :  { %12422 = vmatpush3.msra.mxu1 %v16580_v44  ;;  %v12206_v4 = vpop.f32.mrb[149].mxu1  ;;  %12407 = vmatprep.mubr.msk.f32.mxu1 %vm13603_vm0, %v17402_v3 }
 0xfd3   :  { %13000 = vmatprep.subr.bf16.mxu1 %v17416_v37 }
 0xfd5   :  { %v16792_v2 = vpop.f32.mrb[150].mxu1  ;;  %12408 = vmatmul.mubr.msk.f32.gmra.mrb[60].mxu1 %vm70_vm2, %v14097_v6  ;;  %v17658_v6 = vpack.c.bf16 %v16552_v41, %v16541_v46  ;;  %v17684_v41 = vld [vmem:[#allocation26_spill] sm:$0xff]  ;;  %v17685_v46 = vld [vmem:[#allocation27_spill] sm:$0xff] }
 0xfd6   :  { %v13046_v45 = vpack.c.bf16 %v16792_v2, %v16784_v19  ;;  %v12209_v52 = vpop.f32.mrb[151].mxu1  ;;  %12410 = vmatprep.mubr.msk.f32.mxu1 %vm13603_vm0, %v17402_v3 }
 0xfd9   :  { %v16800_v40 = vpop.f32.mrb[152].mxu1  ;;  %12411 = vmatmul.mubr.msk.f32.gmra.mrb[62].mxu1 %vm70_vm2, %v14103_v7  ;;  %v17659_v7 = vpack.c.bf16 %v16574_v50, %v16563_v47  ;;  %v17683_v50 = vld [vmem:[#allocation25_spill] sm:$0xff]  ;;  %v17686_v47 = vld [vmem:[#allocation76_spill] sm:$0xff] }
 0xfda   :  { %v12212_v44 = vpop.f32.mrb[153].mxu1  ;;  %12423 = vmatprep.mubr.msk.f32.mxu1 %vm13603_vm0, %v17402_v3 }
 0xfdd   :  { %12424 = vmatmul.mubr.msk.f32.vlgmr.msra.gmra.mrb[54].mxu1 %vm70_vm2, %v14106_v8  ;;  %v17660_v8 = vpack.c.bf16 %v16600_v61, %v16588_v39  ;;  %v17689_v61 = vld [vmem:[#allocation28_spill] sm:$0xff] }
 0xfde   :  { %13002 = vmatpush3.bf16.msra.mxu1 %v17658_v6  ;;  %12426 = vmatprep.mubr.msk.f32.mxu1 %vm13603_vm0, %v17402_v3 }
 0xfdf   :  { %13003 = vmatprep.subr.bf16.mxu1 %v17416_v37 }
 0xfe1   :  { %12427 = vmatmul.mubr.msk.f32.gmra.mrb[56].mxu1 %vm70_vm2, %v14111_v9  ;;  %v17661_v9 = vpack.c.bf16 %v16626_v15, %v16616_v51  ;;  %v17692_v51 = vld [vmem:[#allocation74_spill] sm:$0xff] }
 0xfe2   :  { %13005 = vmatpush3.bf16.msra.mxu1 %v17659_v7  ;;  %12429 = vmatprep.mubr.msk.f32.mxu1 %vm13603_vm0, %v17402_v3  ;;  %v17693_v15 = vld [vmem:[#allocation30_spill] sm:$0xff] }
 0xfe3   :  { %12446 = vmatprep.subr.mxu1 %v17402_v3 }
 0xfe5   :  { %12430 = vmatmul.mubr.msk.f32.gmra.mrb[58].mxu1 %vm70_vm2, %v14114_v10  ;;  %v17662_v10 = vpack.c.bf16 %v16609_v20, %v16595_v34  ;;  %v17687_v34 = vld [vmem:[#allocation73_spill] sm:$0xff]  ;;  %v17690_v20 = vpack.c.bf16 %v16748_v5, %v16737_v60  ;;  %v17694_v60 = vld [vmem:[#allocation31_spill] sm:$0xff] }
 0xfe6   :  { %12447 = vmatpush3.msra.mxu1 %v16584_v27  ;;  %12432 = vmatprep.mubr.msk.f32.mxu1 %vm13603_vm0, %v17402_v3  ;;  %v17682_v27 = vld [vmem:[#allocation24_spill] sm:$0xff]  ;;  %v17688_v39 = vpack.c.bf16 %v17686_v47, %v17687_v34 }
 0xfe7   :  { %13006 = vmatprep.subr.bf16.mxu1 %v17416_v37 }
 0xfe9   :  { %12433 = vmatmul.mubr.msk.f32.gmra.mrb[60].mxu1 %vm70_vm2, %v14121_v11  ;;  %v17663_v11 = vpack.c.bf16 %v16632_v0, %v16621_v63  ;;  %v17691_v0 = vld [vmem:[#allocation29_spill] sm:$0xff] }
 0xfea   :  { %12435 = vmatprep.mubr.msk.f32.mxu1 %vm13603_vm0, %v17402_v3 }
 0xfed   :  { %12436 = vmatmul.mubr.msk.f32.gmra.mrb[62].mxu1 %vm70_vm2, %v14124_v12  ;;  %v17664_v12 = vpack.c.bf16 %v16658_v49, %v16646_v42  ;;  %v17696_v42 = vld [vmem:[#allocation33_spill] sm:$0xff]  ;;  %v17697_v49 = vld [vmem:[#allocation34_spill] sm:$0xff] }
 0xfee   :  { %12448 = vmatprep.mubr.msk.f32.mxu1 %vm13603_vm0, %v17402_v3 }
 0xff1   :  { %12449 = vmatmul.mubr.msk.f32.vlgmr.msra.gmra.mrb[54].mxu1 %vm70_vm2, %v14130_v14  ;;  %v17665_v14 = vpack.c.bf16 %v16684_v16, %v16674_v1  ;;  %v17699_v1 = vld [vmem:[#allocation36_spill] sm:$0xff]  ;;  %v17700_v16 = vld [vmem:[#allocation37_spill] sm:$0xff] }
 0xff2   :  { %13008 = vmatpush3.bf16.msra.mxu1 %v17660_v8  ;;  %12451 = vmatprep.mubr.msk.f32.mxu1 %vm13603_vm0, %v17402_v3 }
 0xff3   :  { %13009 = vmatprep.subr.bf16.mxu1 %v17416_v37 }
 0xff5   :  { %12452 = vmatmul.mubr.msk.f32.gmra.mrb[56].mxu1 %vm70_vm2, %v14133_v17  ;;  %v17666_v17 = vld [vmem:[#allocation17_spill] sm:$0xff] }
 0xff6   :  { %13011 = vmatpush3.bf16.msra.mxu1 %v17661_v9  ;;  %12454 = vmatprep.mubr.msk.f32.mxu1 %vm13603_vm0, %v17402_v3  ;;  %v17705_v9 = vld [vmem:[#allocation16_spill] sm:$0xff] }
 0xff7   :  { %12471 = vmatprep.subr.mxu1 %v17402_v3 }
 0xff9   :  { %12455 = vmatmul.mubr.msk.f32.gmra.mrb[58].mxu1 %vm70_vm2, %v14138_v18  ;;  %v17667_v18 = vld [vmem:[#allocation3_spill] sm:$0xff] }
 0xffa   :  { %12472 = vmatpush3.msra.mxu1 %v16638_v13  ;;  %12457 = vmatprep.mubr.msk.f32.mxu1 %vm13603_vm0, %v17402_v3  ;;  %v17695_v13 = vld [vmem:[#allocation32_spill] sm:$0xff] }
 0xffb   :  { %13012 = vmatprep.subr.bf16.mxu1 %v17416_v37 }
 0xffd   :  { %12458 = vmatmul.mubr.msk.f32.gmra.mrb[60].mxu1 %vm70_vm2, %v14141_v21  ;;  %v17668_v21 = vld [vmem:[#allocation15_spill] sm:$0xff] }
 0xffe   :  { %12460 = vmatprep.mubr.msk.f32.mxu1 %vm13603_vm0, %v17402_v3 }
0x1001   :  { %12461 = vmatmul.mubr.msk.f32.gmra.mrb[62].mxu1 %vm70_vm2, %v14146_v22  ;;  %v17669_v22 = vpack.c.bf16 %v17667_v18, %v17668_v21  ;;  %v17708_v18 = vld [vmem:[#allocation45_spill] sm:$0xff]  ;;  %v17709_v21 = vld [vmem:[#allocation44_spill] sm:$0xff] }
0x1002   :  { %12473 = vmatprep.mubr.msk.f32.mxu1 %vm13603_vm0, %v17402_v3 }
0x1005   :  { %12474 = vmatmul.mubr.msk.f32.vlgmr.msra.gmra.mrb[54].mxu1 %vm70_vm2, %v14149_v23  ;;  %v17670_v23 = vld [vmem:[#allocation18_spill] sm:$0xff] }
0x1006   :  { %13014 = vmatpush3.bf16.msra.mxu1 %v17662_v10  ;;  %12476 = vmatprep.mubr.msk.f32.mxu1 %vm13603_vm0, %v17402_v3 }
0x1007   :  { %13015 = vmatprep.subr.bf16.mxu1 %v17416_v37 }
0x1009   :  { %12477 = vmatmul.mubr.msk.f32.gmra.mrb[56].mxu1 %vm70_vm2, %v14156_v24  ;;  %v17671_v24 = vld [vmem:[#allocation2_spill] sm:$0xff] }
0x100a   :  { %13017 = vmatpush3.bf16.msra.mxu1 %v17663_v11  ;;  %12479 = vmatprep.mubr.msk.f32.mxu1 %vm13603_vm0, %v17402_v3  ;;  %v17706_v11 = vld [vmem:[#allocation43_spill] sm:$0xff] }
0x100b   :  { %12496 = vmatprep.subr.mxu1 %v17402_v3 }
0x100d   :  { %12480 = vmatmul.mubr.msk.f32.gmra.mrb[58].mxu1 %vm70_vm2, %v14159_v25  ;;  %v17672_v25 = vpack.c.bf16 %v16690_v59, %v17671_v24  ;;  %v17698_v59 = vld [vmem:[#allocation35_spill] sm:$0xff] }
0x100e   :  { %12497 = vmatpush3.msra.mxu1 %v16642_v54  ;;  %12482 = vmatprep.mubr.msk.f32.mxu1 %vm13603_vm0, %v17402_v3  ;;  %v17680_v54 = vld [vmem:[#allocation75_spill] sm:$0xff] }
0x100f   :  { %13018 = vmatprep.subr.bf16.mxu1 %v17416_v37  ;;  %v17681_v63 = vpack.c.bf16 %v16742_v43, %v17680_v54 }
0x1011   :  { %12483 = vmatmul.mubr.msk.f32.gmra.mrb[60].mxu1 %vm70_vm2, %v14165_v26  ;;  %v17673_v26 = vld [vmem:[#allocation19_spill] sm:$0xff] }
0x1012   :  { %12485 = vmatprep.mubr.msk.f32.mxu1 %vm13603_vm0, %v17402_v3 }
0x1015   :  { %12486 = vmatmul.mubr.msk.f32.gmra.mrb[62].mxu1 %vm70_vm2, %v14168_v28  ;;  %v17674_v28 = vld [vmem:[#allocation72_spill] sm:$0xff] }
0x1016   :  { %12498 = vmatprep.mubr.msk.f32.mxu1 %vm13603_vm0, %v17402_v3 }
0x1019   :  { %12499 = vmatmul.mubr.msk.f32.vlgmr.msra.gmra.mrb[54].mxu1 %vm70_vm2, %v14173_v29  ;;  %v17675_v29 = vld [vmem:[#allocation20_spill] sm:$0xff] }
0x101a   :  { %13020 = vmatpush3.bf16.msra.mxu1 %v17664_v12  ;;  %12501 = vmatprep.mubr.msk.f32.mxu1 %vm13603_vm0, %v17402_v3 }
0x101b   :  { %13021 = vmatprep.subr.bf16.mxu1 %v17416_v37 }
0x101d   :  { %12502 = vmatmul.mubr.msk.f32.gmra.mrb[56].mxu1 %vm70_vm2, %v14176_v30  ;;  %v17676_v30 = vld [vmem:[#allocation21_spill] sm:$0xff] }
0x101e   :  { %13023 = vmatpush3.bf16.msra.mxu1 %v17665_v14  ;;  %12504 = vmatprep.mubr.msk.f32.mxu1 %vm13603_vm0, %v17402_v3 }
0x101f   :  { %12521 = vmatprep.subr.mxu1 %v17402_v3 }
0x1021   :  { %12505 = vmatmul.mubr.msk.f32.gmra.mrb[58].mxu1 %vm70_vm2, %v14181_v31  ;;  %v17677_v31 = vld [vmem:[#allocation22_spill] sm:$0xff] }
0x1022   :  { %12522 = vmatpush3.msra.mxu1 %v16696_v62  ;;  %12507 = vmatprep.mubr.msk.f32.mxu1 %vm13603_vm0, %v17402_v3  ;;  %v17701_v62 = vld [vmem:[#allocation38_spill] sm:$0xff] }
0x1023   :  { %13024 = vmatprep.subr.bf16.mxu1 %v17416_v37 }
0x1025   :  { %12508 = vmatmul.mubr.msk.f32.gmra.mrb[60].mxu1 %vm70_vm2, %v14184_v32  ;;  %v17678_v32 = vpack.c.bf16 %v16716_v33, %v16704_v35  ;;  %v17702_v35 = vld [vmem:[#allocation39_spill] sm:$0xff]  ;;  %v17703_v33 = vld [vmem:[#allocation40_spill] sm:$0xff] }
0x1026   :  { %12510 = vmatprep.mubr.msk.f32.mxu1 %vm13603_vm0, %v17402_v3 }
0x1029   :  { %12511 = vmatmul.mubr.msk.f32.gmra.mrb[62].mxu1 %vm70_vm2, %v17457_v56  ;;  %v17679_v56 = vld [vmem:[#allocation23_spill] sm:$0xff] }
0x102a   :  { %12523 = vmatprep.mubr.msk.f32.mxu1 %vm13603_vm0, %v17402_v3 }
0x102d   :  { %12524 = vmatmul.mubr.msk.f32.vlgmr.msra.gmra.mrb[54].mxu1 %vm70_vm2, %v17666_v17  ;;  %v17707_v17 = vld [vmem:[#allocation42_spill] sm:$0xff] }
0x102e   :  { %13026 = vmatpush3.bf16.msra.mxu1 %v17669_v22  ;;  %12526 = vmatprep.mubr.msk.f32.mxu1 %vm13603_vm0, %v17402_v3  ;;  %v17710_v22 = vld [vmem:[#allocation46_spill] sm:$0xff] }
0x102f   :  { %13027 = vmatprep.subr.bf16.mxu1 %v17416_v37 }
0x1031   :  { %12527 = vmatmul.mubr.msk.f32.gmra.mrb[56].mxu1 %vm70_vm2, %v17670_v23 }
0x1032   :  { %13029 = vmatpush3.bf16.msra.mxu1 %v17672_v25  ;;  %12529 = vmatprep.mubr.msk.f32.mxu1 %vm13603_vm0, %v17402_v3 }
0x1033   :  { %12546 = vmatprep.subr.mxu1 %v17402_v3 }
0x1035   :  { %12530 = vmatmul.mubr.msk.f32.gmra.mrb[58].mxu1 %vm70_vm2, %v17673_v26 }
0x1036   :  { %12547 = vmatpush3.msra.mxu1 %v17674_v28  ;;  %12532 = vmatprep.mubr.msk.f32.mxu1 %vm13603_vm0, %v17402_v3 }
0x1037   :  { %13030 = vmatprep.subr.bf16.mxu1 %v17416_v37 }
0x1039   :  { %12533 = vmatmul.mubr.msk.f32.gmra.mrb[60].mxu1 %vm70_vm2, %v17675_v29 }
0x103a   :  { %12535 = vmatprep.mubr.msk.f32.mxu1 %vm13603_vm0, %v17402_v3 }
0x103d   :  { %12536 = vmatmul.mubr.msk.f32.gmra.mrb[62].mxu1 %vm70_vm2, %v17676_v30 }
0x103e   :  { %12548 = vmatprep.mubr.msk.f32.mxu1 %vm13603_vm0, %v17402_v3 }
0x1041   :  { %12549 = vmatmul.mubr.msk.f32.vlgmr.msra.gmra.mrb[54].mxu1 %vm70_vm2, %v17677_v31 }
0x1042   :  { %13032 = vmatpush3.bf16.msra.mxu1 %v17678_v32  ;;  %12551 = vmatprep.mubr.msk.f32.mxu1 %vm13603_vm0, %v17402_v3 }
0x1043   :  { %13033 = vmatprep.subr.bf16.mxu1 %v17416_v37 }
0x1045   :  { %12552 = vmatmul.mubr.msk.f32.gmra.mrb[56].mxu1 %vm70_vm2, %v17679_v56 }
0x1046   :  { %13035 = vmatpush3.bf16.msra.mxu1 %v17681_v63  ;;  %12554 = vmatprep.mubr.msk.f32.mxu1 %vm13603_vm0, %v17402_v3 }
0x1047   :  { %12571 = vmatprep.subr.mxu1 %v17402_v3 }
0x1049   :  { %12555 = vmatmul.mubr.msk.f32.gmra.mrb[58].mxu1 %vm70_vm2, %v17682_v27 }
0x104a   :  { %12572 = vmatpush3.msra.mxu1 %v16754_v36  ;;  %12557 = vmatprep.mubr.msk.f32.mxu1 %vm13603_vm0, %v17402_v3 }
0x104b   :  { %13036 = vmatprep.subr.bf16.mxu1 %v17416_v37 }
0x104d   :  { %12558 = vmatmul.mubr.msk.f32.gmra.mrb[60].mxu1 %vm70_vm2, %v17683_v50 }
0x104e   :  { %12560 = vmatprep.mubr.msk.f32.mxu1 %vm13603_vm0, %v17402_v3 }
0x1051   :  { %12561 = vmatmul.mubr.msk.f32.gmra.mrb[62].mxu1 %vm70_vm2, %v17684_v41 }
0x1052   :  { %12573 = vmatprep.mubr.msk.f32.mxu1 %vm13603_vm0, %v17402_v3 }
0x1055   :  { %12574 = vmatmul.mubr.msk.f32.vlgmr.msra.gmra.mrb[54].mxu1 %vm70_vm2, %v17685_v46 }
0x1056   :  { %13038 = vmatpush3.bf16.msra.mxu1 %v17688_v39  ;;  %12576 = vmatprep.mubr.msk.f32.mxu1 %vm13603_vm0, %v17402_v3 }
0x1057   :  { %13039 = vmatprep.subr.bf16.mxu1 %v17416_v37 }
0x1059   :  { %12577 = vmatmul.mubr.msk.f32.gmra.mrb[56].mxu1 %vm70_vm2, %v17689_v61 }
0x105a   :  { %13041 = vmatpush3.bf16.msra.mxu1 %v17690_v20  ;;  %12579 = vmatprep.mubr.msk.f32.mxu1 %vm13603_vm0, %v17402_v3 }
0x105b   :  { %12596 = vmatprep.subr.mxu1 %v17402_v3 }
0x105d   :  { %12580 = vmatmul.mubr.msk.f32.gmra.mrb[58].mxu1 %vm70_vm2, %v17691_v0 }
0x105e   :  { %12597 = vmatpush3.msra.mxu1 %v17692_v51  ;;  %12582 = vmatprep.mubr.msk.f32.mxu1 %vm13603_vm0, %v17402_v3 }
0x105f   :  { %13042 = vmatprep.subr.bf16.mxu1 %v17416_v37 }
0x1061   :  { %12583 = vmatmul.mubr.msk.f32.gmra.mrb[60].mxu1 %vm70_vm2, %v17693_v15 }
0x1062   :  { %12585 = vmatprep.mubr.msk.f32.mxu1 %vm13603_vm0, %v17402_v3 }
0x1065   :  { %12586 = vmatmul.mubr.msk.f32.gmra.mrb[62].mxu1 %vm70_vm2, %v17694_v60 }
0x1066   :  { %12598 = vmatprep.mubr.msk.f32.mxu1 %vm13603_vm0, %v17402_v3 }
0x1069   :  { %12599 = vmatmul.mubr.msk.f32.vlgmr.msra.gmra.mrb[54].mxu1 %vm70_vm2, %v17695_v13  ;;  %v9752_v13 = vld [vmem:[%s17214_s18] sm:$0xf] }
0x106a   :  { %13044 = vmatpush3.bf16.msra.mxu1 %v13043_v57  ;;  %12601 = vmatprep.mubr.msk.f32.mxu1 %vm13603_vm0, %v17402_v3  ;;  %v17704_v57 = vld [vmem:[#allocation41_spill] sm:$0xff] }
0x106b   :  { %13045 = vmatprep.subr.bf16.mxu1 %v17416_v37 }
0x106d   :  { %12602 = vmatmul.mubr.msk.f32.gmra.mrb[56].mxu1 %vm70_vm2, %v17696_v42 }
0x106e   :  { %13047 = vmatpush3.bf16.msra.mxu1 %v13046_v45  ;;  %12604 = vmatprep.mubr.msk.f32.mxu1 %vm13603_vm0, %v17402_v3 }
0x106f   :  { %12621 = vmatprep.subr.mxu1 %v17402_v3 }
0x1071   :  { %12605 = vmatmul.mubr.msk.f32.gmra.mrb[58].mxu1 %vm70_vm2, %v17697_v49 }
0x1072   :  { %12622 = vmatpush3.msra.mxu1 %v16800_v40  ;;  %12607 = vmatprep.mubr.msk.f32.mxu1 %vm13603_vm0, %v17402_v3 }
0x1075   :  { %12608 = vmatmul.mubr.msk.f32.gmra.mrb[60].mxu1 %vm70_vm2, %v17698_v59  ;;  %v9847_v59 = vld [vmem:[%s17215_s19] sm:$0xf] }
0x1076   :  { %12610 = vmatprep.mubr.msk.f32.mxu1 %vm13603_vm0, %v17402_v3 }
0x1079   :  { %12611 = vmatmul.mubr.msk.f32.gmra.mrb[62].mxu1 %vm70_vm2, %v17699_v1 }
0x107a   :  { %12623 = vmatprep.mubr.msk.f32.mxu1 %vm13603_vm0, %v17402_v3 }
0x107d   :  { %12624 = vmatmul.mubr.msk.f32.vlgmr.msra.gmra.mrb[54].mxu1 %vm70_vm2, %v17700_v16 }
0x107e   :  { %12626 = vmatprep.mubr.msk.f32.mxu1 %vm13603_vm0, %v17402_v3 }
0x1081   :  { %12627 = vmatmul.mubr.msk.f32.gmra.mrb[56].mxu1 %vm70_vm2, %v17701_v62 }
0x1082   :  { %12629 = vmatprep.mubr.msk.f32.mxu1 %vm13603_vm0, %v17402_v3 }
0x1085   :  { %12630 = vmatmul.mubr.msk.f32.gmra.mrb[58].mxu1 %vm70_vm2, %v17702_v35 }
0x1086   :  { %12632 = vmatprep.mubr.msk.f32.mxu1 %vm13603_vm0, %v17402_v3 }
0x1089   :  { %12633 = vmatmul.mubr.msk.f32.gmra.mrb[60].mxu1 %vm70_vm2, %v17703_v33 }
0x108a   :  { %12635 = vmatprep.mubr.msk.f32.mxu1 %vm13603_vm0, %v17402_v3 }
0x108d   :  { %12636 = vmatmul.mubr.msk.f32.gmra.mrb[62].mxu1 %vm70_vm2, %v17704_v57 }
0x1150   :  { %v9476_v5 = vpop.f32.mrb[54].mxu1 }
0x1151   :  { %v12625_v43 = vpop.f32.mrb[55].mxu1  ;;  %v13075_v58 = vadd.f32 %v10289_v55, %v9476_v5 }
0x1154   :  { %v9481_v36 = vpop.f32.mrb[56].mxu1 }
0x1155   :  { %v13076_v48 = vadd.f32 %v10289_v55, %v9481_v36  ;;  %v12628_v53 = vpop.f32.mrb[57].mxu1 }
0x1157   :  { %v13049_v38 = vpack.c.bf16 %v13076_v48, %v13075_v58 }
0x1158   :  { %v9486_v19 = vpop.f32.mrb[58].mxu1 }
0x1159   :  { %v12631_v4 = vpop.f32.mrb[59].mxu1  ;;  %13050 = vmatpush3.bf16.msra.mxu0 %v13049_v38  ;;  %v13077_v45 = vadd.f32 %v10289_v55, %v9486_v19 }
0x115a   :  { %13051 = vmatprep.subr.bf16.mxu0 %v17416_v37 }
0x115c   :  { %v9491_v2 = vpop.f32.mrb[60].mxu1 }
0x115d   :  { %v13078_v52 = vadd.f32 %v10289_v55, %v9491_v2  ;;  %v12634_v40 = vpop.f32.mrb[61].mxu1 }
0x115f   :  { %v13052_v44 = vpack.c.bf16 %v13078_v52, %v13077_v45 }
0x1160   :  { %v9496_v6 = vpop.f32.mrb[62].mxu1 }
0x1161   :  { %v12637_v7 = vpop.f32.mrb[63].mxu1  ;;  %13053 = vmatpush3.bf16.msra.mxu0 %v13052_v44  ;;  %v13079_v8 = vadd.f32 %v10289_v55, %v9496_v6 }
0x1162   :  { %12646 = vmatprep.subr.mxu0 %v17402_v3 }
0x1165   :  { %12647 = vmatpush3.msra.mxu0 %v13079_v8 }
0x1166   :  { %12649 = vmatmul.mubr.msk.f32.vlgmr.msra.gmra.mrb[234].mxu0 %vm70_vm2, %v17705_v9  ;;  %12651 = vmatprep.subr.mxu0 %v17402_v3 }
0x1167   :  { %12653 = vmatprep.mubr.msk.f32.mxu0 %vm13603_vm0, %v17402_v3 }
0x1239   :  { %v9571_v10 = vpop.f32.mrb[234].mxu0 }
0x123a   :  { %v9575_v12 = vmul.f32 %v17706_v11, %v9571_v10  ;;  %v12650_v14 = vpop.f32.mrb[235].mxu0 }
0x123c   :  { %12652 = vmatpush3.msk.msra.mxu0 %vm3488_vm13, %v9575_v12 }
0x123d   :  { %12654 = vmatmul.mubr.msk.f32.vlgmr.msra.gmra.mrb[236].mxu0 %vm3472_vm14, %v17707_v17  ;;  %13054 = vmatprep.subr.bf16.mxu0 %v17416_v37 }
0x123e   :  { %12656 = vmatprep.mubr.msk.f32.mxu0 %vm13603_vm0, %v17402_v3 }
0x1241   :  { %12657 = vmatmul.mubr.msk.f32.gmra.mrb[238].mxu0 %vm3472_vm14, %v17707_v17 }
0x1242   :  { %12659 = vmatprep.mubr.msk.f32.mxu0 %vm13603_vm0, %v17402_v3 }
0x1245   :  { %12660 = vmatmul.mubr.msk.f32.gmra.mrb[240].mxu0 %vm3472_vm14, %v17708_v18 }
0x1246   :  { %12662 = vmatprep.mubr.msk.f32.mxu0 %vm13603_vm0, %v17402_v3 }
0x1249   :  { %12663 = vmatmul.mubr.msk.f32.gmra.mrb[242].mxu0 %vm3472_vm14, %v17709_v21 }
0x124a   :  { %12665 = vmatprep.mubr.msk.f32.mxu0 %vm13603_vm0, %v17402_v3 }
0x124d   :  { %12666 = vmatmul.mubr.msk.f32.gmra.mrb[244].mxu0 %vm3472_vm14, %v17710_v22 }
0x124e   :  { %12678 = vmatprep.mubr.msk.f32.mxu0 %vm13603_vm0, %v17402_v3 }
0x1310   :  { %v9645_v23 = vpop.f32.mrb[236].mxu0 }
0x1311   :  { %v12655_v24 = vpop.f32.mrb[237].mxu0  ;;  %v17096_v25 = vsub.f32 %v13075_v58, %v9645_v23 }
0x1313   :  { %v9674_v30 = vmul.f32 %v17096_v25, %v17096_v25 }
0x1314   :  { %v9650_v26 = vpop.f32.mrb[238].mxu0 }
0x1315   :  { %v17098_v28 = vsub.f32 %v13076_v48, %v9650_v26  ;;  %v12658_v29 = vpop.f32.mrb[239].mxu0 }
0x1317   :  { %v9675_v31 = vmul.f32 %v17098_v28, %v17098_v28 }
0x1318   :  { %v9655_v32 = vpop.f32.mrb[240].mxu0 }
0x1319   :  { %v13055_v56 = vpack.c.bf16 %v9675_v31, %v9674_v30  ;;  %v12661_v54 = vpop.f32.mrb[241].mxu0  ;;  %v17104_v63 = vsub.f32 %v13077_v45, %v9655_v32 }
0x131b   :  { %13056 = vmatpush3.bf16.msra.mxu0 %v13055_v56  ;;  %v9676_v46 = vmul.f32 %v17104_v63, %v17104_v63 }
0x131c   :  { %v9660_v27 = vpop.f32.mrb[242].mxu0  ;;  %13057 = vmatprep.subr.bf16.mxu0 %v17416_v37 }
0x131d   :  { %v17107_v50 = vsub.f32 %v13078_v52, %v9660_v27  ;;  %v12664_v41 = vpop.f32.mrb[243].mxu0 }
0x131f   :  { %v9677_v47 = vmul.f32 %v17107_v50, %v17107_v50 }
0x1320   :  { %v9665_v34 = vpop.f32.mrb[244].mxu0 }
0x1321   :  { %v13058_v39 = vpack.c.bf16 %v9677_v47, %v9676_v46  ;;  %v17113_v61 = vsub.f32 %v13079_v8, %v9665_v34  ;;  %v12667_v20 = vpop.f32.mrb[245].mxu0 }
0x1323   :  { %13059 = vmatpush3.bf16.msra.mxu0 %v13058_v39  ;;  %v9678_v37 = vmul.f32 %v17113_v61, %v17113_v61 }
0x1324   :  { %12676 = vmatprep.subr.mxu0 %v17402_v3 }
0x1327   :  { %12677 = vmatpush3.msra.mxu0 %v9678_v37 }
0x1328   :  { %12679 = vmatmul.mubr.msk.f32.vlgmr.msra.gmra.mrb[246].mxu0 %vm70_vm2, %v17705_v9  ;;  %12681 = vmatprep.subr.mxu0 %v17402_v3 }
0x1329   :  { %12683 = vmatprep.mubr.msk.f32.mxu0 %vm13603_vm0, %v17402_v3 }
0x13fb   :  { %v9745_v0 = vpop.f32.mrb[246].mxu0 }
0x13fc   :  { %v9749_v51 = vmul.f32 %v17706_v11, %v9745_v0  ;;  %v12680_v15 = vpop.f32.mrb[247].mxu0 }
0x13fe   :  { %v9750_v60 = vadd.f32 1e-05, %v9749_v51 }
0x1400   :  { %13600 = vrsqrt.f32 %v9750_v60 }
0x140a   :  { %v13601_v42 = vpop.eup %13600 }
0x140b   :  { %v9753_v49 = vmul.f32 %v13601_v42, %v9752_v13 }
0x140d   :  { %12682 = vmatpush3.msk.msra.mxu0 %vm3488_vm13, %v9753_v49 }
0x140e   :  { %12684 = vmatmul.mubr.msk.f32.vlgmr.msra.gmra.mrb[248].mxu0 %vm3472_vm14, %v17707_v17  ;;  %12698 = vmatprep.subr.mxu0 %v17402_v3 }
0x140f   :  { %12686 = vmatprep.mubr.msk.f32.mxu0 %vm13603_vm0, %v17402_v3  ;;  %12699 = vmatpush3.msk.msra.mxu0 %vm3488_vm13, %v9847_v59 }
0x1412   :  { %12687 = vmatmul.mubr.msk.f32.gmra.mrb[250].mxu0 %vm3472_vm14, %v17707_v17 }
0x1413   :  { %12689 = vmatprep.mubr.msk.f32.mxu0 %vm13603_vm0, %v17402_v3 }
0x1416   :  { %12690 = vmatmul.mubr.msk.f32.gmra.mrb[252].mxu0 %vm3472_vm14, %v17708_v18 }
0x1417   :  { %12692 = vmatprep.mubr.msk.f32.mxu0 %vm13603_vm0, %v17402_v3 }
0x141a   :  { %12693 = vmatmul.mubr.msk.f32.gmra.mrb[254].mxu0 %vm3472_vm14, %v17709_v21 }
0x141b   :  { %12695 = vmatprep.mubr.msk.f32.mxu0 %vm13603_vm0, %v17402_v3 }
0x141e   :  { %12696 = vmatmul.mubr.msk.f32.gmra.mrb[0].mxu0 %vm3472_vm14, %v17710_v22 }
0x141f   :  { %12700 = vmatprep.mubr.msk.f32.mxu0 %vm13603_vm0, %v17402_v3 }
0x1422   :  { %12701 = vmatmul.mubr.msk.f32.vlgmr.msra.gmra.mrb[2].mxu0 %vm3472_vm14, %v17707_v17 }
0x1423   :  { %12703 = vmatprep.mubr.msk.f32.mxu0 %vm13603_vm0, %v17402_v3 }
0x1426   :  { %12704 = vmatmul.mubr.msk.f32.gmra.mrb[4].mxu0 %vm3472_vm14, %v17707_v17 }
0x1427   :  { %12706 = vmatprep.mubr.msk.f32.mxu0 %vm13603_vm0, %v17402_v3 }
0x142a   :  { %12707 = vmatmul.mubr.msk.f32.gmra.mrb[6].mxu0 %vm3472_vm14, %v17708_v18 }
0x142b   :  { %12709 = vmatprep.mubr.msk.f32.mxu0 %vm13603_vm0, %v17402_v3 }
0x142e   :  { %12710 = vmatmul.mubr.msk.f32.gmra.mrb[8].mxu0 %vm3472_vm14, %v17709_v21 }
0x142f   :  { %12712 = vmatprep.mubr.msk.f32.mxu0 %vm13603_vm0, %v17402_v3 }
0x1432   :  { %12713 = vmatmul.mubr.msk.f32.gmra.mrb[20].mxu0 %vm3472_vm14, %v17710_v22 }
0x14e1   :  { %v9823_v1 = vpop.f32.mrb[248].mxu0 }
0x14e2   :  { %v12685_v16 = vpop.f32.mrb[249].mxu0  ;;  %v9941_v58 = vmul.f32 %v9823_v1, %v17096_v25 }
0x14e5   :  { %v9828_v62 = vpop.f32.mrb[250].mxu0 }
0x14e6   :  { %v12688_v35 = vpop.f32.mrb[251].mxu0  ;;  %v9942_v3 = vmul.f32 %v9828_v62, %v17098_v28 }
0x14e9   :  { %v9833_v33 = vpop.f32.mrb[252].mxu0 }
0x14ea   :  { %v12691_v57 = vpop.f32.mrb[253].mxu0  ;;  %v9943_v45 = vmul.f32 %v9833_v33, %v17104_v63 }
0x14ed   :  { %v9838_v5 = vpop.f32.mrb[254].mxu0 }
0x14ee   :  { %v12694_v43 = vpop.f32.mrb[255].mxu0  ;;  %v9944_v6 = vmul.f32 %v9838_v5, %v17107_v50 }
0x14f1   :  { %v9843_v55 = vpop.f32.mrb[0].mxu0 }
0x14f2   :  { %v12697_v36 = vpop.f32.mrb[1].mxu0  ;;  %v9945_v10 = vmul.f32 %v9843_v55, %v17113_v61 }
0x14f5   :  { %v9917_v48 = vpop.f32.mrb[2].mxu0 }
0x14f6   :  { %v9946_v53 = vadd.f32 %v9941_v58, %v9917_v48  ;;  %v12702_v38 = vpop.f32.mrb[3].mxu0 }
0x14f8   :  { %9951 = vst.msk [vmem:[%s17216_s20] sm:$0xff] %vm380_vm3, %v9946_v53 }
0x14f9   :  { %v9922_v19 = vpop.f32.mrb[4].mxu0 }
0x14fa   :  { %v9947_v4 = vadd.f32 %v9942_v3, %v9922_v19  ;;  %v12705_v2 = vpop.f32.mrb[5].mxu0 }
0x14fc   :  { %9952 = vst.msk [vmem:[%s17216_s20 + $0x8] sm:$0xff] %vm380_vm3, %v9947_v4 }
0x14fd   :  { %v9927_v52 = vpop.f32.mrb[6].mxu0 }
0x14fe   :  { %v9948_v40 = vadd.f32 %v9943_v45, %v9927_v52  ;;  %v12708_v44 = vpop.f32.mrb[7].mxu0 }
0x1500   :  { %9953 = vst.msk [vmem:[%s17216_s20 + $0x10] sm:$0xff] %vm380_vm3, %v9948_v40 }
0x1501   :  { %v9932_v7 = vpop.f32.mrb[8].mxu0 }
0x1502   :  { %v9949_v8 = vadd.f32 %v9944_v6, %v9932_v7  ;;  %v12711_v9 = vpop.f32.mrb[9].mxu0 }
0x1504   :  { %9954 = vst.msk [vmem:[%s17216_s20 + $0x18] sm:$0xff] %vm380_vm3, %v9949_v8 }
0x1505   :  { %v9937_v11 = vpop.f32.mrb[20].mxu0 }
0x1506   :  { %v9950_v12 = vadd.f32 %v9945_v10, %v9937_v11  ;;  %v12714_v14 = vpop.f32.mrb[21].mxu0 }
0x1508   :  { %9955 = vst.msk [vmem:[%s17216_s20 + $0x20] sm:$0xff] %vm380_vm3, %v9950_v12 }

</bundles_post_ra>
